<compile_context>
chip_gen: v7x
topology: tpu7x:2x2x1
jax: 0.10.0
libtpu: 0.0.40
codegen_flags: <defaults>
</compile_context>

<pallas_src>
import functools

import jax
import jax.numpy as jnp
from jax.experimental import pallas as pl
from jax.experimental.pallas import tpu as pltpu


def _san_attention_kernel(vi_ref, vq_ref, wi_ref, wt_ref, bias_ref, wa_ref,
                          out_ref, *, s_valid, compute_dtype, precision):
    """TB batch elements per grid step.

    vi_ref  : (TB, S_pad, d)  image region features
    vq_ref  : (TB, d)         question features
    wi_ref  : (d, k)          ff_image weight   (resident)
    wt_ref  : (d, k)          ff_text  weight   (resident)
    bias_ref: (1, k)          bi + bt folded    (resident)
    wa_ref  : (1, k)          ff_attention weight (resident; ba dropped)
    out_ref : (TB, d)         u = attended image feature + vq
    """
    f32 = jnp.float32
    TB, S_pad, d = vi_ref.shape
    k = wi_ref.shape[1]

    # In-kernel operand cast (no extra HBM copy of the activations).
    vi = vi_ref[...].astype(compute_dtype)                     # (TB, S_pad, d)
    vq = vq_ref[...].astype(compute_dtype)                     # (TB, d)

    # hi = vi @ Wi   -- one big (TB*S_pad, d) x (d, k) MXU GEMM, f32 accumulation.
    hi = jnp.dot(vi.reshape(TB * S_pad, d), wi_ref[...],
                 preferred_element_type=f32,
                 precision=precision).reshape(TB, S_pad, k)
    # hq = vq @ Wt + (bi + bt)  -- batched (TB, d) x (d, k) MXU GEMM.
    hq = jnp.dot(vq, wt_ref[...], preferred_element_type=f32, precision=precision)
    hq = hq + bias_ref[...].astype(f32)                        # (TB, k)

    # ha = tanh(hi + hq).  Dropout(p=0.5) is identity at inference.
    # TODO(synk): training-mode dropout (p=0.5) not implemented.
    ha = jnp.tanh(hi + hq[:, None, :])                         # (TB, S_pad, k) f32

    # scores = ha . wa  (k-reduction) -> lane-dense (TB, S_pad).  The +ba bias of
    # ff_attention is dropped: softmax is shift-invariant, so it is a no-op.
    wa = wa_ref[...].astype(f32).reshape(1, 1, k)
    scores = jnp.sum(ha * wa, axis=-1)                         # (TB, S_pad)

    # Mask region-padding columns before the softmax (kept in f32).
    if S_pad != s_valid:
        col = jax.lax.broadcasted_iota(jnp.int32, (TB, S_pad), 1)
        scores = jnp.where(col < s_valid, scores, jnp.float32(-1e30))

    # Softmax over the region axis (lane axis) -- lane-dense max/exp/sum.
    m = jnp.max(scores, axis=-1, keepdims=True)                # (TB, 1)
    p = jnp.exp(scores - m)                                    # (TB, S_pad)
    pi = p / jnp.sum(p, axis=-1, keepdims=True)                # (TB, S_pad)

    # u = sum_s pi[b, s] * vi[b, s, :] + vq  -- batched (1, S_pad) x (S_pad, d)
    # MXU matmul with f32 accumulation (padded columns have pi == 0).
    att = jnp.einsum('bqs,bsd->bqd',
                     pi[:, None, :].astype(vi.dtype), vi,
                     preferred_element_type=f32,
                     precision=precision)[:, 0, :]             # (TB, d) f32
    out_ref[...] = (att + vq_ref[...].astype(f32)).astype(out_ref.dtype)


def san_attention_forward(vi, vq, wi, bi, wt, bt, wa, ba=None, *,
                          compute_dtype=None, tb=8):
    """vi: (B, S, d), vq: (B, d) -> u: (B, d) float32.

    compute_dtype: optional MXU operand dtype (e.g. jnp.bfloat16); cast happens
    inside the kernel, accumulation and the tanh/softmax epilogue stay f32.
    ba (ff_attention bias) is accepted for interface parity but unused: adding a
    constant to every score is a no-op under softmax.
    """
    B, S, d = vi.shape
    k = wi.shape[1]
    assert wi.shape == (d, k) and wt.shape == (d, k)
    assert bi.shape == (k,) and bt.shape == (k,) and wa.shape == (k,)

    cd = jnp.dtype(compute_dtype) if compute_dtype is not None else jnp.dtype(vi.dtype)
    # Full-precision MXU passes when operands are f32 (keeps the f32 reference
    # check tight); DEFAULT for bf16 operands.
    precision = (jax.lax.Precision.HIGHEST if cd == jnp.dtype(jnp.float32)
                 else jax.lax.Precision.DEFAULT)

    # Region-axis padding: 8 sublanes for 4-byte dtypes, 16 for 16-bit packing.
    row_mult = 8 if cd.itemsize >= 4 else 16
    S_pad = ((S + row_mult - 1) // row_mult) * row_mult
    if S_pad != S:
        vi = jnp.pad(vi, ((0, 0), (0, S_pad - S), (0, 0)))

    # Batch tiling: TB examples per grid step -> sublane-dense (TB, d) stores and
    # TB x higher MXU row occupancy.  Padded batch rows are computed and dropped.
    TB = max(8, min(int(tb), 64))
    B_pad = ((B + TB - 1) // TB) * TB
    if B_pad != B:
        vi = jnp.pad(vi, ((0, B_pad - B), (0, 0), (0, 0)))
        vq_p = jnp.pad(vq, ((0, B_pad - B), (0, 0)))
    else:
        vq_p = vq

    # Weights/biases: cast & fold once in the wrapper (tiny, resident across all
    # grid steps via constant index maps).
    wi_c = wi.astype(cd)
    wt_c = wt.astype(cd)
    bias = (bi + bt).reshape(1, k).astype(jnp.float32)   # bi + bt folded; ba dropped
    wa2 = wa.reshape(1, k).astype(jnp.float32)

    kernel = functools.partial(_san_attention_kernel, s_valid=S,
                               compute_dtype=cd, precision=precision)

    out = pl.pallas_call(
        kernel,
        out_shape=jax.ShapeDtypeStruct((B_pad, d), jnp.float32),
        grid_spec=pltpu.PrefetchScalarGridSpec(
            num_scalar_prefetch=0,
            grid=(B_pad // TB,),
            in_specs=[
                pl.BlockSpec((TB, S_pad, d), lambda b: (b, 0, 0)),  # vi tile
                pl.BlockSpec((TB, d), lambda b: (b, 0)),            # vq tile
                pl.BlockSpec((d, k), lambda b: (0, 0)),             # Wi (resident)
                pl.BlockSpec((d, k), lambda b: (0, 0)),             # Wt (resident)
                pl.BlockSpec((1, k), lambda b: (0, 0)),             # bi+bt (resident)
                pl.BlockSpec((1, k), lambda b: (0, 0)),             # wa (resident)
            ],
            out_specs=pl.BlockSpec((TB, d), lambda b: (b, 0)),
        ),
        compiler_params=pltpu.CompilerParams(
            dimension_semantics=("parallel",),
        ),
    )(vi, vq_p, wi_c, wt_c, bias, wa2)

    return out[:B]


if __name__ == "__main__":
    # Small shapes consistent with the module (paper uses d=1024, k=512, S=49;
    # scaled down here): B=2 examples, S=12 regions, d=256, k=128.
    B, S, d, k = 2, 12, 256, 128

    key = jax.random.PRNGKey(0)
    kv, kq, kwi, kbi, kwt, kbt, kwa, kba = jax.random.split(key, 8)

    vi = jax.random.normal(kv, (B, S, d), dtype=jnp.float32)
    vq = jax.random.normal(kq, (B, d), dtype=jnp.float32)
    wi = jax.random.normal(kwi, (d, k), dtype=jnp.float32) * 0.05
    bi = jax.random.normal(kbi, (k,), dtype=jnp.float32) * 0.02
    wt = jax.random.normal(kwt, (d, k), dtype=jnp.float32) * 0.05
    bt = jax.random.normal(kbt, (k,), dtype=jnp.float32) * 0.02
    wa = jax.random.normal(kwa, (k,), dtype=jnp.float32) * 0.1
    ba = jax.random.normal(kba, (), dtype=jnp.float32) * 0.02

    u = san_attention_forward(vi, vq, wi, bi, wt, bt, wa, ba)
    u = jax.block_until_ready(u)

    # Plain-JAX reference: Linear, Linear, tanh, dropout(eval)=id, Linear(k->1),
    # softmax over regions, weighted sum, residual add.
    hi = jnp.einsum('bsd,dk->bsk', vi, wi) + bi
    hq = (vq @ wt + bt)[:, None, :]
    ha = jnp.tanh(hi + hq)
    scores = jnp.sum(ha * wa[None, None, :], axis=-1) + ba        # (B, S)
    scores = scores - jnp.max(scores, axis=-1, keepdims=True)
    e = jnp.exp(scores)
    pi = e / jnp.sum(e, axis=-1, keepdims=True)
    ref = jnp.sum(pi[:, :, None] * vi, axis=1) + vq               # (B, d)

    assert u.shape == (B, d)
    max_err = float(jnp.max(jnp.abs(u - ref)))
    assert jnp.allclose(u, ref, atol=1e-3, rtol=1e-3), max_err

    print("KERNEL_OK")
</pallas_src>

<mosaic_0001>
module attributes {stable_mosaic.version = 11 : i64} {
  func.func @_san_attention_kernel(%arg0: i32, %arg1: memref<8x16x256xf32, #tpu.memory_space<vmem>>, %arg2: memref<8x256xf32, #tpu.memory_space<vmem>>, %arg3: memref<256x128xf32, #tpu.memory_space<vmem>>, %arg4: memref<256x128xf32, #tpu.memory_space<vmem>>, %arg5: memref<1x128xf32, #tpu.memory_space<vmem>>, %arg6: memref<1x128xf32, #tpu.memory_space<vmem>>, %arg7: memref<8x256xf32, #tpu.memory_space<vmem>>) attributes {dimension_semantics = [#tpu.dimension_semantics<parallel>], iteration_bounds = array<i64: 1>, scalar_prefetch = 0 : i64, scratch_operands = 0 : i64, tpu.core_type = #tpu.core_type<tc>, window_params = [{transform_indices = @transform_0, window_bounds = array<i64: 8, 16, 256>}, {transform_indices = @transform_1, window_bounds = array<i64: 8, 256>}, {pipeline_mode = #tpu.pipeline_mode<synchronous>, transform_indices = @transform_2, window_bounds = array<i64: 256, 128>}, {pipeline_mode = #tpu.pipeline_mode<synchronous>, transform_indices = @transform_3, window_bounds = array<i64: 256, 128>}, {pipeline_mode = #tpu.pipeline_mode<synchronous>, transform_indices = @transform_4, window_bounds = array<i64: 1, 128>}, {pipeline_mode = #tpu.pipeline_mode<synchronous>, transform_indices = @transform_5, window_bounds = array<i64: 1, 128>}, {transform_indices = @transform_6, window_bounds = array<i64: 8, 256>}]} {
    %c0 = arith.constant 0 : index
    %c0_0 = arith.constant 0 : index
    %c0_1 = arith.constant 0 : index
    %0 = vector.load %arg1[%c0, %c0_0, %c0_1] : memref<8x16x256xf32, #tpu.memory_space<vmem>>, vector<8x16x256xf32>
    %c0_2 = arith.constant 0 : index
    %c0_3 = arith.constant 0 : index
    %1 = vector.load %arg2[%c0_2, %c0_3] : memref<8x256xf32, #tpu.memory_space<vmem>>, vector<8x256xf32>
    %2 = vector.shape_cast %0 : vector<8x16x256xf32> to vector<128x256xf32>
    %c0_4 = arith.constant 0 : index
    %c0_5 = arith.constant 0 : index
    %3 = vector.load %arg3[%c0_4, %c0_5] : memref<256x128xf32, #tpu.memory_space<vmem>>, vector<256x128xf32>
    %cst = arith.constant dense<0.000000e+00> : vector<128x128xf32>
    %4 = tpu.matmul %2, %3, %cst {dimension_numbers = #tpu.dot_dimension_numbers<[1], [0], [0], [1], [0, 0, 1, 1], [], []>, precision = #tpu.contract_precision<fp32>} : vector<128x256xf32>, vector<256x128xf32>, vector<128x128xf32> -> vector<128x128xf32>
    %5 = vector.shape_cast %4 : vector<128x128xf32> to vector<8x16x128xf32>
    %c0_6 = arith.constant 0 : index
    %c0_7 = arith.constant 0 : index
    %6 = vector.load %arg4[%c0_6, %c0_7] : memref<256x128xf32, #tpu.memory_space<vmem>>, vector<256x128xf32>
    %cst_8 = arith.constant dense<0.000000e+00> : vector<8x128xf32>
    %7 = tpu.matmul %1, %6, %cst_8 {dimension_numbers = #tpu.dot_dimension_numbers<[1], [0], [0], [1], [0, 0, 1, 1], [], []>, precision = #tpu.contract_precision<fp32>} : vector<8x256xf32>, vector<256x128xf32>, vector<8x128xf32> -> vector<8x128xf32>
    %c0_9 = arith.constant 0 : index
    %c0_10 = arith.constant 0 : index
    %8 = vector.load %arg5[%c0_9, %c0_10] : memref<1x128xf32, #tpu.memory_space<vmem>>, vector<1x128xf32>
    %9 = vector.broadcast %8 : vector<1x128xf32> to vector<8x128xf32>
    %10 = arith.addf %7, %9 : vector<8x128xf32>
    %11 = vector.shape_cast %10 : vector<8x128xf32> to vector<8x1x128xf32>
    %12 = vector.broadcast %11 : vector<8x1x128xf32> to vector<8x16x128xf32>
    %13 = arith.addf %5, %12 : vector<8x16x128xf32>
    %14 = math.tanh %13 : vector<8x16x128xf32>
    %c0_11 = arith.constant 0 : index
    %c0_12 = arith.constant 0 : index
    %15 = vector.load %arg6[%c0_11, %c0_12] : memref<1x128xf32, #tpu.memory_space<vmem>>, vector<1x128xf32>
    %16 = vector.shape_cast %15 : vector<1x128xf32> to vector<1x1x128xf32>
    %17 = vector.broadcast %16 : vector<1x1x128xf32> to vector<8x16x128xf32>
    %18 = arith.mulf %14, %17 : vector<8x16x128xf32>
    %cst_13 = arith.constant dense<0.000000e+00> : vector<8x16xf32>
    %19 = vector.multi_reduction <add>, %18, %cst_13 [2] : vector<8x16x128xf32> to vector<8x16xf32>
    %20 = tpu.iota {dimensions = array<i32: 1>} : vector<8x16xi32>
    %c12_i32 = arith.constant 12 : i32
    %21 = vector.broadcast %c12_i32 : i32 to vector<8x16xi32>
    %22 = arith.cmpi slt, %20, %21 : vector<8x16xi32>
    %cst_14 = arith.constant -1.000000e+30 : f32
    %23 = vector.broadcast %cst_14 : f32 to vector<8x16xf32>
    %24 = arith.select %22, %19, %23 : vector<8x16xi1>, vector<8x16xf32>
    %cst_15 = arith.constant dense<0xFF800000> : vector<8xf32>
    %25 = vector.multi_reduction <maximumf>, %24, %cst_15 [1] : vector<8x16xf32> to vector<8xf32>
    %26 = vector.shape_cast %25 : vector<8xf32> to vector<8x1xf32>
    %27 = vector.broadcast %26 : vector<8x1xf32> to vector<8x16xf32>
    %28 = arith.subf %24, %27 : vector<8x16xf32>
    %29 = math.exp %28 : vector<8x16xf32>
    %cst_16 = arith.constant dense<0.000000e+00> : vector<8xf32>
    %30 = vector.multi_reduction <add>, %29, %cst_16 [1] : vector<8x16xf32> to vector<8xf32>
    %31 = vector.shape_cast %30 : vector<8xf32> to vector<8x1xf32>
    %32 = vector.broadcast %31 : vector<8x1xf32> to vector<8x16xf32>
    %33 = arith.divf %29, %32 : vector<8x16xf32>
    %34 = vector.shape_cast %33 : vector<8x16xf32> to vector<8x1x16xf32>
    "tpu.trace_start"() <{level = 10 : i32, message = "bqs,bsd->bqd"}> : () -> ()
    %cst_17 = arith.constant dense<0.000000e+00> : vector<8x1x256xf32>
    %35 = tpu.matmul %34, %0, %cst_17 {dimension_numbers = #tpu.dot_dimension_numbers<[2], [1], [1], [2], [0, 0, 0, 1, 1, 2], [0], [0]>, precision = #tpu.contract_precision<fp32>} : vector<8x1x16xf32>, vector<8x16x256xf32>, vector<8x1x256xf32> -> vector<8x1x256xf32>
    "tpu.trace_stop"() : () -> ()
    %36 = vector.shape_cast %35 : vector<8x1x256xf32> to vector<8x256xf32>
    %c0_18 = arith.constant 0 : index
    %c0_19 = arith.constant 0 : index
    %37 = vector.load %arg2[%c0_18, %c0_19] : memref<8x256xf32, #tpu.memory_space<vmem>>, vector<8x256xf32>
    %38 = arith.addf %36, %37 : vector<8x256xf32>
    %c0_20 = arith.constant 0 : index
    %c0_21 = arith.constant 0 : index
    %39 = vector.load %arg7[%c0_20, %c0_21] : memref<8x256xf32, #tpu.memory_space<vmem>>, vector<8x256xf32>
    tpu.vector_store %arg7[%c0_20, %c0_21], %38 {strides = array<i32>} : memref<8x256xf32, #tpu.memory_space<vmem>>, vector<8x256xf32>,
    return
  }
  func.func @transform_0(%arg0: i32) -> (i32, i32, i32) {
    %c0_i32 = arith.constant 0 : i32
    %c0_i32_0 = arith.constant 0 : i32
    %c0_i32_1 = arith.constant 0 : i32
    return %arg0, %c0_i32, %c0_i32_0 : i32, i32, i32
  }
  func.func @transform_1(%arg0: i32) -> (i32, i32) {
    %c0_i32 = arith.constant 0 : i32
    %c0_i32_0 = arith.constant 0 : i32
    return %arg0, %c0_i32 : i32, i32
  }
  func.func @transform_2(%arg0: i32) -> (i32, i32) {
    %c0_i32 = arith.constant 0 : i32
    %c0_i32_0 = arith.constant 0 : i32
    %c0_i32_1 = arith.constant 0 : i32
    return %c0_i32, %c0_i32_0 : i32, i32
  }
  func.func @transform_3(%arg0: i32) -> (i32, i32) {
    %c0_i32 = arith.constant 0 : i32
    %c0_i32_0 = arith.constant 0 : i32
    %c0_i32_1 = arith.constant 0 : i32
    return %c0_i32, %c0_i32_0 : i32, i32
  }
  func.func @transform_4(%arg0: i32) -> (i32, i32) {
    %c0_i32 = arith.constant 0 : i32
    %c0_i32_0 = arith.constant 0 : i32
    %c0_i32_1 = arith.constant 0 : i32
    return %c0_i32, %c0_i32_0 : i32, i32
  }
  func.func @transform_5(%arg0: i32) -> (i32, i32) {
    %c0_i32 = arith.constant 0 : i32
    %c0_i32_0 = arith.constant 0 : i32
    %c0_i32_1 = arith.constant 0 : i32
    return %c0_i32, %c0_i32_0 : i32, i32
  }
  func.func @transform_6(%arg0: i32) -> (i32, i32) {
    %c0_i32 = arith.constant 0 : i32
    %c0_i32_0 = arith.constant 0 : i32
    return %arg0, %c0_i32 : i32, i32
  }
}

</mosaic_0001>

<bundles_post_ra>
// kernel: tpu_custom_call.1
= control target key start
LH: loop header
LB: loop body
LE: loop exit
PB: predicated region body
PF: predicated region fallthrough
CT: control target
= control target key end

     0   :  { %11 = vsyncpa [#allocation3], 0  ;;  %s11071_s0 = inlined_call_operand.hbm [shape: f32[8,16,256], index: 0, kind: input, shape index: {}]   ;;  %s11072_s1 = inlined_call_operand.hbm [shape: f32[8,256], index: 1, kind: input, shape index: {}]   ;;  %s11073_s2 = inlined_call_operand.hbm [shape: f32[256,128], index: 2, kind: input, shape index: {}]   ;;  %s11074_s3 = inlined_call_operand.hbm [shape: f32[256,128], index: 3, kind: input, shape index: {}]   ;;  %s11075_s4 = inlined_call_operand.vmem [shape: f32[1,128], index: 4, kind: input, shape index: {}]   ;;  %s11076_s5 = inlined_call_operand.vmem [shape: f32[1,128], index: 5, kind: input, shape index: {}]   ;;  %s11077_s6 = inlined_call_operand.hbm [shape: f32[8,256], index: 6, kind: output, shape index: {}]  }
   0x1   :  { %12 = vsyncpa [#allocation6], 0 }
   0x2   :  { %13 = vsyncpa [#allocation9], 0 }
   0x3   :  { %14 = vsyncpa [#allocation4], 0  ;;  %s8666_s21 = smov [#allocation5]   ;;  %s8667_s23 = smov [#allocation2]  }
   0x4   :  { %s33_s22 = sshll.u32 %s8666_s21, 4  ;;  %s20_s24 = sshll.u32 %s8667_s23, 4  ;;  %s34_s22 = int_to_ptr.vmem [resolvable:$true] %s33_s22  ;;  %s8712_s24 = int_to_ptr.vmem [resolvable:$true] %s20_s24 }
   0x5   :  { %s8548_s27 = scalar_lea.hbm %s11072_s1, 256 }
   0x6   :  { %p8549_p0 = scmp.ne.s32.totalorder %s11072_s1, %s8548_s27  ;;  %p8552_p1 = scmp.lt.u32.totalorder %s8548_s27, %s11072_s1 }
   0x8   :  { %p8554_p2 = pnand %p8552_p1, %p8549_p0 }
   0xa   :  { %8557 = shalt.err (!%p8554_p2)
}
   0xb   :  { %s8558_s8 = scalar_lea.vmem %s34_s22, 256  ;;  %p8563_p4 = scmp.lt.s32.totalorder %s34_s22, %s34_s22 }
   0xc   :  { %p8559_p3 = scmp.ne.s32.totalorder %s34_s22, %s8558_s8  ;;  %p8564_p5 = scmp.lt.s32.totalorder %s8558_s8, %s8558_s8 }
   0xe   :  { %p8565_p6 = por %p8564_p5, %p8563_p4 }
  0x10   :  { %p8566_p7 = pnand %p8565_p6, %p8559_p3 }
  0x12   :  { %8569 = shalt.err (!%p8566_p7)
}
  0x13   :  { %36 = dma.hbm_to_vmem [thread:$0]  %s11072_s1, 256, %s34_s22, [#allocation6]  }
  0x14   :  { %s8570_s13 = scalar_lea.hbm %s11071_s0, 4096 }
  0x15   :  { %p8571_p8 = scmp.ne.s32.totalorder %s11071_s0, %s8570_s13  ;;  %p8574_p9 = scmp.lt.u32.totalorder %s8570_s13, %s11071_s0 }
  0x17   :  { %p8576_p10 = pnand %p8574_p9, %p8571_p8 }
  0x19   :  { %8579 = shalt.err (!%p8576_p10)
}
  0x1a   :  { %s8580_s18 = scalar_lea.vmem %s8712_s24, 4096  ;;  %p8585_p12 = scmp.lt.s32.totalorder %s8712_s24, %s8712_s24 }
  0x1b   :  { %p8581_p11 = scmp.ne.s32.totalorder %s8712_s24, %s8580_s18  ;;  %p8586_p13 = scmp.lt.s32.totalorder %s8580_s18, %s8580_s18 }
  0x1d   :  { %p8587_p0 = por %p8586_p13, %p8585_p12 }
  0x1f   :  { %p8588_p1 = pnand %p8587_p0, %p8581_p11 }
  0x21   :  { %8591 = shalt.err (!%p8588_p1)
}
  0x22   :  { %s8668_s1 = smov 256   ;;  %s8669_s19 = smov 16  }
  0x23   :  { %26 = dma.hbm_to_vmem [thread:$0]  %s11071_s0, 4096, %s8712_s24, [#allocation3], %s8668_s1, %s8668_s1, %s8669_s19  }
  0x24   :  { %s8670_s22 = smov [#allocation7]   ;;  %s8592_s27 = scalar_lea.hbm %s11073_s2, 4096 }
  0x25   :  { %s42_s23 = sshll.u32 %s8670_s22, 4  ;;  %p8593_p2 = scmp.ne.s32.totalorder %s11073_s2, %s8592_s27  ;;  %s43_s23 = int_to_ptr.vmem [resolvable:$true] %s42_s23 }
  0x26   :  { %p8596_p3 = scmp.lt.u32.totalorder %s8592_s27, %s11073_s2 }
  0x28   :  { %p8598_p4 = pnand %p8596_p3, %p8593_p2 }
  0x2a   :  { %8601 = shalt.err (!%p8598_p4)
}
  0x2b   :  { %s8602_s8 = scalar_lea.vmem %s43_s23, 4096  ;;  %p8607_p6 = scmp.lt.s32.totalorder %s43_s23, %s43_s23 }
  0x2c   :  { %p8603_p5 = scmp.ne.s32.totalorder %s43_s23, %s8602_s8  ;;  %p8608_p7 = scmp.lt.s32.totalorder %s8602_s8, %s8602_s8 }
  0x2e   :  { %p8609_p8 = por %p8608_p7, %p8607_p6 }
  0x30   :  { %p8610_p9 = pnand %p8609_p8, %p8603_p5 }
  0x32   :  { %8613 = shalt.err (!%p8610_p9)
}
  0x33   :  { %s8671_s0 = smov 128   ;;  %s8672_s24 = smov 8  }
  0x34   :  { %48 = dma.hbm_to_vmem [thread:$0]  %s11073_s2, 4096, %s43_s23, [#allocation6], %s8671_s0, %s8671_s0, %s8672_s24  }
  0x35   :  { %s8673_s11 = smov [#allocation8]   ;;  %s8614_s15 = scalar_lea.hbm %s11074_s3, 4096 }
  0x36   :  { %s54_s12 = sshll.u32 %s8673_s11, 4  ;;  %p8615_p10 = scmp.ne.s32.totalorder %s11074_s3, %s8614_s15  ;;  %s55_s12 = int_to_ptr.vmem [resolvable:$true] %s54_s12 }
  0x37   :  { %p8618_p11 = scmp.lt.u32.totalorder %s8614_s15, %s11074_s3 }
  0x39   :  { %p8620_p12 = pnand %p8618_p11, %p8615_p10 }
  0x3b   :  { %8623 = shalt.err (!%p8620_p12)
}
  0x3c   :  { %s8624_s19 = scalar_lea.vmem %s55_s12, 4096  ;;  %p8629_p0 = scmp.lt.s32.totalorder %s55_s12, %s55_s12 }
  0x3d   :  { %p8625_p13 = scmp.ne.s32.totalorder %s55_s12, %s8624_s19  ;;  %p8630_p1 = scmp.lt.s32.totalorder %s8624_s19, %s8624_s19 }
  0x3f   :  { %p8631_p2 = por %p8630_p1, %p8629_p0 }
  0x41   :  { %p8632_p3 = pnand %p8631_p2, %p8625_p13 }
  0x43   :  { %8635 = shalt.err (!%p8632_p3)
}
  0x44   :  { %60 = dma.hbm_to_vmem [thread:$0]  %s11074_s3, 4096, %s55_s12, [#allocation9], %s8671_s0, %s8671_s0, %s8672_s24  }
  0x45   :  { %8658 = dma.done.wait [#allocation3], 4096  }
  0x46   :  { %8659 = vsyncadd [#allocation3], 4294963200 }
  0x47   :  { %8660 = dma.done.wait [#allocation6], 4352  }
  0x48   :  { %8661 = vsyncadd [#allocation6], 4294962944 }
  0x49   :  { %8662 = dma.done.wait [#allocation9], 4096  }
  0x4a   :  { %8663 = vsyncadd [#allocation9], 4294963200  ;;  %v127_v0 = vld [vmem:[#allocation7 + $0x80] sm:$0xff]  ;;  %v128_v1 = vld [vmem:[#allocation7 + $0x88] sm:$0xff]  ;;  %vm2951_vm0 = vcmask 130112   ;;  %vm3016_vm1 = vcmask 1041409  }
  0x4b   :  { %v111_v2 = vld [vmem:[#allocation7] sm:$0xff]  ;;  %v192_v3 = vand.u32 4294901760, %v127_v0  ;;  %v195_v4 = vand.u32 4294901760, %v128_v1  ;;  %v112_v5 = vld [vmem:[#allocation7 + $0x8] sm:$0xff]  ;;  %v129_v7 = vld [vmem:[#allocation7 + $0x90] sm:$0xff]  ;;  %vm3018_vm2 = vcmask 1042434  }
  0x4c   :  { %v144_v6 = vand.u32 4294901760, %v111_v2  ;;  %v130_v8 = vld [vmem:[#allocation7 + $0x98] sm:$0xff]  ;;  %v147_v9 = vand.u32 4294901760, %v112_v5  ;;  %v198_v10 = vand.u32 4294901760, %v129_v7  ;;  %v113_v12 = vld [vmem:[#allocation7 + $0x10] sm:$0xff]  ;;  %v131_v18 = vld [vmem:[#allocation7 + $0xa0] sm:$0xff] }
  0x4d   :  { %v201_v11 = vand.u32 4294901760, %v130_v8  ;;  %v114_v13 = vld [vmem:[#allocation7 + $0x18] sm:$0xff]  ;;  %v8767_v14 = vpack.c.bf16 %v195_v4, %v192_v3  ;;  %v150_v16 = vand.u32 4294901760, %v113_v12  ;;  %v132_v19 = vld [vmem:[#allocation7 + $0xa8] sm:$0xff]  ;;  %v115_v24 = vld [vmem:[#allocation7 + $0x20] sm:$0xff]  ;;  %v204_v30 = vand.u32 4294901760, %v131_v18 }
  0x4e   :  { %v8769_v15 = vsub.f32 %v111_v2, %v144_v6  ;;  %v153_v17 = vand.u32 4294901760, %v114_v13  ;;  %v8771_v20 = vpack.c.bf16 %v147_v9, %v144_v6  ;;  %v8773_v21 = vsub.f32 %v112_v5, %v147_v9  ;;  %v116_v25 = vld [vmem:[#allocation7 + $0x28] sm:$0xff]  ;;  %v133_v38 = vld [vmem:[#allocation7 + $0xb0] sm:$0xff]  ;;  %v134_v43 = vld [vmem:[#allocation7 + $0xb8] sm:$0xff] }
  0x4f   :  { %v8775_v22 = vpack.c.bf16 %v201_v11, %v198_v10  ;;  %v8777_v23 = vsub.f32 %v129_v7, %v198_v10  ;;  %7846 = vmatprep.subr.bf16.mxu0 %v8767_v14  ;;  %v8780_v26 = vsub.f32 %v130_v8, %v201_v11  ;;  %v8784_v28 = vsub.f32 %v113_v12, %v150_v16  ;;  %v117_v56 = vld [vmem:[#allocation7 + $0x30] sm:$0xff]  ;;  %v118_v57 = vld [vmem:[#allocation7 + $0x38] sm:$0xff]  ;;  %v135_v6 = vld [vmem:[#allocation7 + $0xc0] sm:$0xff] }
  0x50   :  { %11431 = vst [vmem:[#allocation15_spill] sm:$0xff] %v8771_v20  ;;  %11432 = vst [vmem:[#allocation16_spill] sm:$0xff] %v8773_v21  ;;  %v8782_v27 = vpack.c.bf16 %v153_v17, %v150_v16  ;;  %v8786_v29 = vsub.f32 %v114_v13, %v153_v17  ;;  %7848 = vmatpush3.bf16.msra.mxu0 %v8771_v20  ;;  %v207_v31 = vand.u32 4294901760, %v132_v19  ;;  %v156_v34 = vand.u32 4294901760, %v115_v24  ;;  %v136_v7 = vld [vmem:[#allocation7 + $0xc8] sm:$0xff]  ;;  %v119_v12 = vld [vmem:[#allocation7 + $0x40] sm:$0xff] }
  0x51   :  { %11433 = vst [vmem:[#allocation17_spill] sm:$0xff] %v8780_v26  ;;  %11435 = vst [vmem:[#allocation19_spill] sm:$0xff] %v8784_v28  ;;  %v8789_v32 = vsub.f32 %v127_v0, %v192_v3  ;;  %v8791_v33 = vsub.f32 %v128_v1, %v195_v4  ;;  %7850 = vmatprep.subr.bf16.mxu0 %v8775_v22  ;;  %v159_v35 = vand.u32 4294901760, %v116_v25  ;;  %v11093_v36 = vand.u32 4294901760, %v8769_v15 }
  0x52   :  { %11434 = vst [vmem:[#allocation18_spill] sm:$0xff] %v8782_v27  ;;  %11436 = vst [vmem:[#allocation20_spill] sm:$0xff] %v8786_v29  ;;  %v11092_v37 = vand.u32 4294901760, %v8773_v21  ;;  %v8796_v39 = vpack.c.bf16 %v207_v31, %v204_v30  ;;  %v8798_v40 = vsub.f32 %v131_v18, %v204_v30  ;;  %v8800_v41 = vsub.f32 %v132_v19, %v207_v31  ;;  %v120_v31 = vld [vmem:[#allocation7 + $0x48] sm:$0xff] }
  0x53   :  { %11437 = vst [vmem:[#allocation21_spill] sm:$0xff] %v8789_v32  ;;  %11438 = vst [vmem:[#allocation22_spill] sm:$0xff] %v8791_v33  ;;  %v11097_v42 = vand.u32 4294901760, %v8789_v32  ;;  %v11096_v44 = vand.u32 4294901760, %v8791_v33  ;;  %v8804_v45 = vpack.c.bf16 %v159_v35, %v156_v34  ;;  %v8806_v46 = vsub.f32 %v115_v24, %v156_v34 }
  0x54   :  { %11439 = vst [vmem:[#allocation23_spill] sm:$0xff] %v8796_v39  ;;  %v8808_v47 = vsub.f32 %v116_v25, %v159_v35  ;;  %7852 = vmatpush3.bf16.msra.mxu0 %v8782_v27  ;;  %v484_v49 = vsub.f32 %v8769_v15, %v11093_v36  ;;  %v491_v50 = vsub.f32 %v8773_v21, %v11092_v37  ;;  %v210_v51 = vand.u32 4294901760, %v133_v38 }
  0x55   :  { %11440 = vst [vmem:[#allocation24_spill] sm:$0xff] %v8804_v45  ;;  %v596_v48 = vsub.f32 %v8789_v32, %v11097_v42  ;;  %7854 = vmatprep.subr.bf16.mxu0 %v8796_v39  ;;  %v603_v52 = vsub.f32 %v8791_v33, %v11096_v44  ;;  %v213_v53 = vand.u32 4294901760, %v134_v43  ;;  %v11091_v54 = vand.u32 4294901760, %v8777_v23  ;;  %v78_v44 = vld [vmem:[#allocation2 + $0x8] sm:$0xff]  ;;  %v80_v42 = vld [vmem:[#allocation2 + $0x18] sm:$0xff] }
  0x56   :  { %v11089_v55 = vand.u32 4294901760, %v8780_v26  ;;  %v485_v59 = vand.u32 4294901760, %v484_v49  ;;  %v492_v60 = vand.u32 4294901760, %v491_v50  ;;  %v8826_v61 = vsub.f32 %v133_v38, %v210_v51 }
  0x57   :  { %v597_v58 = vand.u32 4294901760, %v596_v48  ;;  %v604_v62 = vand.u32 4294901760, %v603_v52  ;;  %v8828_v63 = vpack.c.bf16 %v213_v53, %v210_v51  ;;  %v8830_v0 = vsub.f32 %v134_v43, %v213_v53 }
  0x58   :  { %v610_v1 = vsub.f32 %v8777_v23, %v11091_v54  ;;  %7856 = vmatpush3.bf16.msra.mxu0 %v8804_v45  ;;  %v7879_v2 = vpack.c.bf16 %v492_v60, %v485_v59  ;;  %v617_v3 = vsub.f32 %v8780_v26, %v11089_v55  ;;  %v162_v4 = vand.u32 4294901760, %v117_v56  ;;  %v138_v59 = vld [vmem:[#allocation7 + $0xd8] sm:$0xff] }
  0x59   :  { %11441 = vst [vmem:[#allocation25_spill] sm:$0xff] %v8828_v63  ;;  %v165_v5 = vand.u32 4294901760, %v118_v57  ;;  %v7877_v8 = vpack.c.bf16 %v604_v62, %v597_v58  ;;  %7858 = vmatprep.subr.bf16.mxu0 %v8828_v63  ;;  %v11087_v10 = vand.u32 4294901760, %v8784_v28  ;;  %v11086_v11 = vand.u32 4294901760, %v8786_v29  ;;  %v137_v58 = vld [vmem:[#allocation7 + $0xd0] sm:$0xff]  ;;  %v126_v54 = vld [vmem:[#allocation7 + $0x78] sm:$0xff] }
  0x5a   :  { %v611_v9 = vand.u32 4294901760, %v610_v1  ;;  %v618_v13 = vand.u32 4294901760, %v617_v3  ;;  %v8844_v17 = vsub.f32 %v117_v56, %v162_v4  ;;  %v216_v25 = vand.u32 4294901760, %v135_v6  ;;  %v121_v3 = vld [vmem:[#allocation7 + $0x50] sm:$0xff] }
  0x5b   :  { %v8842_v16 = vpack.c.bf16 %v165_v5, %v162_v4  ;;  %v8846_v18 = vsub.f32 %v118_v57, %v165_v5  ;;  %7878 = vmatprep.subr.bf16.mxu1 %v7877_v8  ;;  %v498_v19 = vsub.f32 %v8784_v28, %v11087_v10  ;;  %v505_v24 = vsub.f32 %v8786_v29, %v11086_v11  ;;  %v141_v11 = vld [vmem:[#allocation7 + $0xf0] sm:$0xff]  ;;  %v142_v10 = vld [vmem:[#allocation7 + $0xf8] sm:$0xff] }
  0x5c   :  { %11443 = vst [vmem:[#allocation27_spill] sm:$0xff] %v8844_v17  ;;  %v219_v30 = vand.u32 4294901760, %v136_v7  ;;  %7880 = vmatpush3.bf16.msra.mxu1 %v7879_v2  ;;  %v7881_v34 = vpack.c.bf16 %v618_v13, %v611_v9  ;;  %v11084_v35 = vand.u32 4294901760, %v8798_v40  ;;  %v11082_v38 = vand.u32 4294901760, %v8800_v41 }
  0x5d   :  { %11442 = vst [vmem:[#allocation26_spill] sm:$0xff] %v8842_v16  ;;  %11444 = vst [vmem:[#allocation28_spill] sm:$0xff] %v8846_v18  ;;  %7860 = vmatpush3.bf16.msra.mxu0 %v8842_v16  ;;  %v168_v43 = vand.u32 4294901760, %v119_v12  ;;  %v499_v48 = vand.u32 4294901760, %v498_v19  ;;  %v506_v49 = vand.u32 4294901760, %v505_v24  ;;  %v8859_v51 = vsub.f32 %v135_v6, %v216_v25  ;;  %v122_v19 = vld [vmem:[#allocation7 + $0x58] sm:$0xff] }
  0x5e   :  { %v8857_v50 = vpack.c.bf16 %v219_v30, %v216_v25  ;;  %7882 = vmatprep.subr.bf16.mxu1 %v7881_v34  ;;  %v8861_v52 = vsub.f32 %v136_v7, %v219_v30  ;;  %v624_v53 = vsub.f32 %v8798_v40, %v11084_v35  ;;  %v631_v56 = vsub.f32 %v8800_v41, %v11082_v38 }
  0x5f   :  { %11446 = vst [vmem:[#allocation30_spill] sm:$0xff] %v8859_v51  ;;  %v171_v57 = vand.u32 4294901760, %v120_v31  ;;  %v7883_v60 = vpack.c.bf16 %v506_v49, %v499_v48  ;;  %v8870_v62 = vsub.f32 %v119_v12, %v168_v43  ;;  %v11081_v1 = vand.u32 4294901760, %v8806_v46 }
  0x60   :  { %11445 = vst [vmem:[#allocation29_spill] sm:$0xff] %v8857_v50  ;;  %11447 = vst [vmem:[#allocation31_spill] sm:$0xff] %v8861_v52  ;;  %7862 = vmatprep.subr.bf16.mxu0 %v8857_v50  ;;  %v11079_v2 = vand.u32 4294901760, %v8808_v47  ;;  %v625_v4 = vand.u32 4294901760, %v624_v53  ;;  %v632_v5 = vand.u32 4294901760, %v631_v56  ;;  %v222_v12 = vand.u32 4294901760, %v137_v58 }
  0x61   :  { %v8874_v6 = vpack.c.bf16 %v171_v57, %v168_v43  ;;  %v8876_v7 = vsub.f32 %v120_v31, %v171_v57  ;;  %7884 = vmatpush3.bf16.msra.mxu1 %v7883_v60  ;;  %v512_v8 = vsub.f32 %v8806_v46, %v11081_v1  ;;  %v225_v13 = vand.u32 4294901760, %v138_v59  ;;  %v124_v1 = vld [vmem:[#allocation7 + $0x68] sm:$0xff] }
  0x62   :  { %v519_v9 = vsub.f32 %v8808_v47, %v11079_v2  ;;  %v7885_v24 = vpack.c.bf16 %v632_v5, %v625_v4  ;;  %v11078_v25 = vand.u32 4294901760, %v8826_v61  ;;  %v11080_v30 = vand.u32 4294901760, %v8830_v0  ;;  %v139_v4 = vld [vmem:[#allocation7 + $0xe0] sm:$0xff]  ;;  %v140_v5 = vld [vmem:[#allocation7 + $0xe8] sm:$0xff] }
  0x63   :  { %11448 = vst [vmem:[#allocation32_spill] sm:$0xff] %v8874_v6  ;;  %7864 = vmatpush3.bf16.msra.mxu0 %v8874_v6  ;;  %v174_v31 = vand.u32 4294901760, %v121_v3  ;;  %v513_v34 = vand.u32 4294901760, %v512_v8  ;;  %v8887_v48 = vpack.c.bf16 %v225_v13, %v222_v12  ;;  %v8889_v49 = vsub.f32 %v137_v58, %v222_v12  ;;  %v123_v12 = vld [vmem:[#allocation7 + $0x60] sm:$0xff] }
  0x64   :  { %v520_v43 = vand.u32 4294901760, %v519_v9  ;;  %7886 = vmatprep.subr.bf16.mxu1 %v7885_v24  ;;  %v8891_v53 = vsub.f32 %v138_v59, %v225_v13  ;;  %v638_v56 = vsub.f32 %v8826_v61, %v11078_v25  ;;  %v645_v57 = vsub.f32 %v8830_v0, %v11080_v30 }
  0x65   :  { %11449 = vst [vmem:[#allocation33_spill] sm:$0xff] %v8887_v48  ;;  %v177_v60 = vand.u32 4294901760, %v122_v19  ;;  %7866 = vmatprep.subr.bf16.mxu0 %v8887_v48  ;;  %v8900_v9 = vsub.f32 %v121_v3, %v174_v31  ;;  %v11083_v58 = vand.u32 4294901760, %v8844_v17  ;;  %v11085_v59 = vand.u32 4294901760, %v8846_v18 }
  0x66   :  { %v7887_v8 = vpack.c.bf16 %v520_v43, %v513_v34  ;;  %v639_v13 = vand.u32 4294901760, %v638_v56  ;;  %v646_v24 = vand.u32 4294901760, %v645_v57  ;;  %v228_v43 = vand.u32 4294901760, %v139_v4 }
  0x67   :  { %v8904_v25 = vpack.c.bf16 %v177_v60, %v174_v31  ;;  %v8906_v2 = vsub.f32 %v122_v19, %v177_v60  ;;  %v526_v34 = vsub.f32 %v8844_v17, %v11083_v58  ;;  %v533_v3 = vsub.f32 %v8846_v18, %v11085_v59 }
  0x68   :  { %7888 = vmatpush3.bf16.msra.mxu1 %v7887_v8  ;;  %v231_v30 = vand.u32 4294901760, %v140_v5  ;;  %v7889_v38 = vpack.c.bf16 %v646_v24, %v639_v13  ;;  %v11088_v31 = vand.u32 4294901760, %v8859_v51  ;;  %v11090_v19 = vand.u32 4294901760, %v8861_v52 }
  0x69   :  { %11450 = vst [vmem:[#allocation34_spill] sm:$0xff] %v8904_v25  ;;  %7868 = vmatpush3.bf16.msra.mxu0 %v8904_v25  ;;  %v180_v56 = vand.u32 4294901760, %v123_v12  ;;  %v527_v57 = vand.u32 4294901760, %v526_v34  ;;  %v534_v60 = vand.u32 4294901760, %v533_v3  ;;  %v8919_v58 = vsub.f32 %v139_v4, %v228_v43  ;;  %v125_v4 = vld [vmem:[#allocation7 + $0x70] sm:$0xff] }
  0x6a   :  { %v8917_v8 = vpack.c.bf16 %v231_v30, %v228_v43  ;;  %7890 = vmatprep.subr.bf16.mxu1 %v7889_v38  ;;  %v8921_v35 = vsub.f32 %v140_v5, %v231_v30  ;;  %v652_v13 = vsub.f32 %v8859_v51, %v11088_v31  ;;  %v659_v24 = vsub.f32 %v8861_v52, %v11090_v19 }
  0x6b   :  { %11452 = vst [vmem:[#allocation36_spill] sm:$0xff] %v8919_v58  ;;  %v183_v59 = vand.u32 4294901760, %v124_v1  ;;  %v7891_v34 = vpack.c.bf16 %v534_v60, %v527_v57  ;;  %v8930_v3 = vsub.f32 %v123_v12, %v180_v56  ;;  %v11094_v38 = vand.u32 4294901760, %v8870_v62 }
  0x6c   :  { %11451 = vst [vmem:[#allocation35_spill] sm:$0xff] %v8917_v8  ;;  %11453 = vst [vmem:[#allocation37_spill] sm:$0xff] %v8921_v35  ;;  %7870 = vmatprep.subr.bf16.mxu0 %v8917_v8  ;;  %v11095_v30 = vand.u32 4294901760, %v8876_v7  ;;  %v653_v5 = vand.u32 4294901760, %v652_v13  ;;  %v660_v43 = vand.u32 4294901760, %v659_v24  ;;  %v234_v60 = vand.u32 4294901760, %v141_v11 }
  0x6d   :  { %11454 = vst [vmem:[#allocation38_spill] sm:$0xff] %v8930_v3  ;;  %v8934_v31 = vpack.c.bf16 %v183_v59, %v180_v56  ;;  %v8936_v55 = vsub.f32 %v124_v1, %v183_v59  ;;  %7892 = vmatpush3.bf16.msra.mxu1 %v7891_v34  ;;  %v540_v57 = vsub.f32 %v8870_v62, %v11094_v38  ;;  %v237_v19 = vand.u32 4294901760, %v142_v10 }
  0x6e   :  { %v547_v12 = vsub.f32 %v8876_v7, %v11095_v30  ;;  %v7893_v37 = vpack.c.bf16 %v660_v43, %v653_v5  ;;  %v11098_v56 = vand.u32 4294901760, %v8889_v49  ;;  %v11101_v1 = vand.u32 4294901760, %v8891_v53 }
  0x6f   :  { %11455 = vst [vmem:[#allocation39_spill] sm:$0xff] %v8934_v31  ;;  %7872 = vmatpush3.bf16.msra.mxu0 %v8934_v31  ;;  %v186_v59 = vand.u32 4294901760, %v125_v4  ;;  %v541_v13 = vand.u32 4294901760, %v540_v57  ;;  %v8947_v34 = vpack.c.bf16 %v237_v19, %v234_v60  ;;  %v8949_v36 = vsub.f32 %v141_v11, %v234_v60  ;;  %v77_v11 = vld [vmem:[#allocation2] sm:$0xff] }
  0x70   :  { %v548_v24 = vand.u32 4294901760, %v547_v12  ;;  %7894 = vmatprep.subr.bf16.mxu1 %v7893_v37  ;;  %v8951_v38 = vsub.f32 %v142_v10, %v237_v19  ;;  %v666_v5 = vsub.f32 %v8889_v49, %v11098_v56  ;;  %v673_v43 = vsub.f32 %v8891_v53, %v11101_v1 }
  0x71   :  { %11456 = vst [vmem:[#allocation40_spill] sm:$0xff] %v8947_v34  ;;  %v189_v30 = vand.u32 4294901760, %v126_v54  ;;  %7874 = vmatprep.subr.bf16.mxu0 %v8947_v34  ;;  %v8960_v12 = vsub.f32 %v125_v4, %v186_v59  ;;  %v11105_v37 = vand.u32 4294901760, %v8900_v9  ;;  %v11104_v10 = vand.u32 4294901760, %v8906_v2 }
  0x72   :  { %v7895_v57 = vpack.c.bf16 %v548_v24, %v541_v13  ;;  %v667_v19 = vand.u32 4294901760, %v666_v5  ;;  %v674_v60 = vand.u32 4294901760, %v673_v43  ;;  %v8974_v24 = vand.u32 4294901760, %v78_v44 }
  0x73   :  { %v8964_v56 = vpack.c.bf16 %v189_v30, %v186_v59  ;;  %v8966_v31 = vsub.f32 %v126_v54, %v189_v30  ;;  %v554_v13 = vsub.f32 %v8900_v9, %v11105_v37  ;;  %v561_v4 = vsub.f32 %v8906_v2, %v11104_v10 }
  0x74   :  { %7896 = vmatpush3.bf16.msra.mxu1 %v7895_v57  ;;  %11459 = vst [vmem:[#allocation43_spill] sm:$0xff] %v8974_v24  ;;  %v8976_v1 = vand.u32 4294901760, %v80_v42  ;;  %v7897_v34 = vpack.c.bf16 %v674_v60, %v667_v19  ;;  %v8979_v59 = vand.u32 4294901760, %v77_v11  ;;  %v11108_v54 = vand.u32 4294901760, %v8919_v58  ;;  %705 = vmatprep.mubr.f32.mxu1 %v8974_v24 }
  0x75   :  { %11457 = vst [vmem:[#allocation41_spill] sm:$0xff] %v8964_v56  ;;  %11458 = vst [vmem:[#allocation42_spill] sm:$0xff] %v8966_v31  ;;  %7876 = vmatpush3.bf16.msra.mxu0 %v8964_v56  ;;  %v11111_v30 = vand.u32 4294901760, %v8921_v35  ;;  %v555_v5 = vand.u32 4294901760, %v554_v13  ;;  %v562_v43 = vand.u32 4294901760, %v561_v4  ;;  %v8984_v57 = vsub.f32 %v78_v44, %v8974_v24  ;;  %v79_v4 = vld [vmem:[#allocation2 + $0x10] sm:$0xff] }
  0x76   :  { %11460 = vst [vmem:[#allocation44_spill] sm:$0xff] %v8976_v1  ;;  %11461 = vst [vmem:[#allocation45_spill] sm:$0xff] %v8979_v59  ;;  %v8987_v10 = vsub.f32 %v80_v42, %v8976_v1  ;;  %7898 = vmatprep.subr.bf16.mxu1 %v7897_v34  ;;  %v8991_v19 = vsub.f32 %v77_v11, %v8979_v59  ;;  %v680_v60 = vsub.f32 %v8919_v58, %v11108_v54  ;;  %vm3020_vm3 = vcmask 1043459  }
  0x77   :  { %11462 = vst [vmem:[#allocation46_spill] sm:$0xff] %v8984_v57  ;;  %v687_v13 = vsub.f32 %v8921_v35, %v11111_v30  ;;  %v11118_v44 = vand.u32 4294901760, %v8930_v3  ;;  %v7899_v37 = vpack.c.bf16 %v562_v43, %v555_v5  ;;  %v9001_v42 = vand.u32 4294901760, %v8984_v57 }
  0x78   :  { %11463 = vst [vmem:[#allocation47_spill] sm:$0xff] %v8987_v10  ;;  %11464 = vst [vmem:[#allocation48_spill] sm:$0xff] %v8991_v19  ;;  %v9004_v34 = vand.u32 4294901760, %v8987_v10  ;;  %v11127_v11 = vand.u32 4294901760, %v8936_v55  ;;  %v9008_v24 = vand.u32 4294901760, %v8991_v19  ;;  %v681_v54 = vand.u32 4294901760, %v680_v60 }
  0x79   :  { %11465 = vst [vmem:[#allocation49_spill] sm:$0xff] %v9001_v42  ;;  %v688_v56 = vand.u32 4294901760, %v687_v13  ;;  %v568_v30 = vsub.f32 %v8930_v3, %v11118_v44  ;;  %7900 = vmatpush3.bf16.msra.mxu1 %v7899_v37  ;;  %v242_v5 = vsub.f32 %v8984_v57, %v9001_v42  ;;  %v9020_v35 = vand.u32 4294901760, %v79_v4 }
  0x7a   :  { %11466 = vst [vmem:[#allocation50_spill] sm:$0xff] %v9004_v34  ;;  %11467 = vst [vmem:[#allocation51_spill] sm:$0xff] %v9008_v24  ;;  %v257_v43 = vsub.f32 %v8987_v10, %v9004_v34  ;;  %v575_v8 = vsub.f32 %v8936_v55, %v11127_v11  ;;  %v248_v60 = vsub.f32 %v8991_v19, %v9008_v24  ;;  %v11128_v44 = vand.u32 4294901760, %v8949_v36 }
  0x7b   :  { %11468 = vst [vmem:[#allocation52_spill] sm:$0xff] %v9020_v35  ;;  %v7901_v13 = vpack.c.bf16 %v688_v56, %v681_v54  ;;  %v569_v58 = vand.u32 4294901760, %v568_v30  ;;  %v9025_v37 = vand.u32 4294901760, %v242_v5  ;;  %v9030_v34 = vsub.f32 %v79_v4, %v9020_v35  ;;  %v82_v30 = vld [vmem:[#allocation2 + $0x28] sm:$0xff] }
  0x7c   :  { %v9027_v3 = vand.u32 4294901760, %v257_v43  ;;  %v576_v42 = vand.u32 4294901760, %v575_v8  ;;  %v9032_v10 = vand.u32 4294901760, %v248_v60  ;;  %v694_v11 = vsub.f32 %v8949_v36, %v11128_v44  ;;  %v81_v60 = vld [vmem:[#allocation2 + $0x20] sm:$0xff] }
  0x7d   :  { %11469 = vst [vmem:[#allocation53_spill] sm:$0xff] %v9025_v37  ;;  %11471 = vst [vmem:[#allocation55_spill] sm:$0xff] %v9030_v34  ;;  %7902 = vmatprep.subr.bf16.mxu1 %v7901_v13  ;;  %v11134_v56 = vand.u32 4294901760, %v8951_v38  ;;  %244 = vmatprep.mubr.f32.mxu0 %v9025_v37  ;;  %v9043_v4 = vand.u32 4294901760, %v9030_v34  ;;  %v11142_v43 = vand.u32 4294901760, %v8966_v31  ;;  %v84_v13 = vld [vmem:[#allocation2 + $0x38] sm:$0xff] }
  0x7e   :  { %11470 = vst [vmem:[#allocation54_spill] sm:$0xff] %v9027_v3  ;;  %11472 = vst [vmem:[#allocation56_spill] sm:$0xff] %v9032_v10  ;;  %v7903_v5 = vpack.c.bf16 %v576_v42, %v569_v58  ;;  %250 = vmatmul.mubr.f32.vlgmr.msra.gmra.mrb[0].mxu0 %v9032_v10  ;;  %v695_v44 = vand.u32 4294901760, %v694_v11  ;;  %v11474_v24 = vand.u32 4294901760, %v8960_v12  ;;  %v7909_v58 = vpack.c.bf16 %v8791_v33, %v8789_v32  ;;  %v83_v42 = vld [vmem:[#allocation2 + $0x30] sm:$0xff] }
  0x7f   :  { %11473 = vst [vmem:[#allocation57_spill] sm:$0xff] %v9043_v4  ;;  %v701_v54 = vsub.f32 %v8951_v38, %v11134_v56  ;;  %259 = vmatprep.mubr.f32.mxu0 %v9027_v3  ;;  %v263_v8 = vsub.f32 %v9030_v34, %v9043_v4  ;;  %v589_v11 = vsub.f32 %v8966_v31, %v11142_v43  ;;  %v9061_v37 = vand.u32 4294901760, %v82_v30  ;;  %v86_v34 = vld [vmem:[#allocation2 + $0x48] sm:$0xff] }
  0x80   :  { %v582_v19 = vsub.f32 %v8960_v12, %v11474_v24  ;;  %7904 = vmatpush3.bf16.msra.mxu1 %v7903_v5  ;;  %v7911_v56 = vpack.c.bf16 %v8773_v21, %v8769_v15  ;;  %7910 = vmatprep.subr.bf16.mxu0 %v7909_v58  ;;  %v9065_v33 = vand.u32 4294901760, %v81_v60  ;;  %v9067_v5 = vand.u32 4294901760, %v84_v13  ;;  %v88_v58 = vld [vmem:[#allocation2 + $0x58] sm:$0xff] }
  0x81   :  { %11475 = vst [vmem:[#allocation58_spill] sm:$0xff] %v9061_v37  ;;  %v702_v24 = vand.u32 4294901760, %v701_v54  ;;  %v9069_v3 = vand.u32 4294901760, %v263_v8  ;;  %v590_v32 = vand.u32 4294901760, %v589_v11  ;;  %v9072_v4 = vsub.f32 %v82_v30, %v9061_v37  ;;  %v85_v8 = vld [vmem:[#allocation2 + $0x40] sm:$0xff] }
  0x82   :  { %v583_v57 = vand.u32 4294901760, %v582_v19  ;;  %11476 = vst [vmem:[#allocation59_spill] sm:$0xff] %v9065_v33  ;;  %11477 = vst [vmem:[#allocation60_spill] sm:$0xff] %v9067_v5  ;;  %7912 = vmatpush3.bf16.msra.mxu0 %v7911_v56  ;;  %v9074_v43 = vand.u32 4294901760, %v83_v42  ;;  %v9077_v21 = vsub.f32 %v81_v60, %v9065_v33  ;;  %v9080_v19 = vsub.f32 %v84_v13, %v9067_v5  ;;  %v87_v60 = vld [vmem:[#allocation2 + $0x50] sm:$0xff] }
  0x83   :  { %11478 = vst [vmem:[#allocation61_spill] sm:$0xff] %v9069_v3  ;;  %11479 = vst [vmem:[#allocation62_spill] sm:$0xff] %v9072_v4  ;;  %v7905_v31 = vpack.c.bf16 %v702_v24, %v695_v44  ;;  %v7913_v54 = vpack.c.bf16 %v8780_v26, %v8777_v23  ;;  %265 = vmatmul.mubr.f32.gmra.mrb[2].mxu0 %v9069_v3  ;;  %v9088_v11 = vand.u32 4294901760, %v9072_v4  ;;  %v9099_v26 = vand.u32 4294901760, %v86_v34 }
  0x84   :  { %11480 = vst [vmem:[#allocation63_spill] sm:$0xff] %v9074_v43  ;;  %11481 = vst [vmem:[#allocation64_spill] sm:$0xff] %v9077_v21  ;;  %v7907_v30 = vpack.c.bf16 %v590_v32, %v583_v57  ;;  %v9091_v44 = vsub.f32 %v83_v42, %v9074_v43  ;;  %v9094_v13 = vand.u32 4294901760, %v9077_v21  ;;  %v9097_v24 = vand.u32 4294901760, %v9080_v19 }
  0x85   :  { %11482 = vst [vmem:[#allocation65_spill] sm:$0xff] %v9080_v19  ;;  %11483 = vst [vmem:[#allocation66_spill] sm:$0xff] %v9088_v11  ;;  %7906 = vmatprep.subr.bf16.mxu1 %v7905_v31  ;;  %7914 = vmatprep.subr.bf16.mxu0 %v7913_v54  ;;  %v7915_v32 = vpack.c.bf16 %v8786_v29, %v8784_v28  ;;  %v272_v57 = vsub.f32 %v9072_v4, %v9088_v11  ;;  %v9108_v31 = vand.u32 4294901760, %v85_v8  ;;  %vm3022_vm4 = vcmask 1044484  }
  0x86   :  { %11484 = vst [vmem:[#allocation67_spill] sm:$0xff] %v9091_v44  ;;  %11485 = vst [vmem:[#allocation68_spill] sm:$0xff] %v9094_v13  ;;  %7908 = vmatpush3.bf16.msra.mxu1 %v7907_v30  ;;  %v9106_v42 = vand.u32 4294901760, %v9091_v44  ;;  %v9110_v56 = vand.u32 4294901760, %v88_v58  ;;  %v278_v10 = vsub.f32 %v9077_v21, %v9094_v13  ;;  %v287_v54 = vsub.f32 %v9080_v19, %v9097_v24  ;;  %v90_v21 = vld [vmem:[#allocation2 + $0x68] sm:$0xff] }
  0x87   :  { %11486 = vst [vmem:[#allocation69_spill] sm:$0xff] %v9097_v24  ;;  %11487 = vst [vmem:[#allocation70_spill] sm:$0xff] %v9099_v26  ;;  %7942 = vmatprep.subr.bf16.mxu1 %v8767_v14  ;;  %v9118_v30 = vsub.f32 %v86_v34, %v9099_v26  ;;  %7916 = vmatpush3.bf16.msra.mxu0 %v7915_v32  ;;  %v9120_v3 = vand.u32 4294901760, %v87_v60  ;;  %v9122_v11 = vand.u32 4294901760, %v272_v57  ;;  %vm3024_vm5 = vcmask 1045509  }
  0x88   :  { %11488 = vst [vmem:[#allocation71_spill] sm:$0xff] %v9106_v42  ;;  %11489 = vst [vmem:[#allocation72_spill] sm:$0xff] %v9108_v31  ;;  %v293_v4 = vsub.f32 %v9091_v44, %v9106_v42  ;;  %v9127_v29 = vsub.f32 %v85_v8, %v9108_v31  ;;  %v9130_v13 = vsub.f32 %v88_v58, %v9110_v56  ;;  %v9132_v28 = vand.u32 4294901760, %v278_v10  ;;  %v89_v42 = vld [vmem:[#allocation2 + $0x60] sm:$0xff]  ;;  %v91_v44 = vld [vmem:[#allocation2 + $0x70] sm:$0xff] }
  0x89   :  { %11490 = vst [vmem:[#allocation73_spill] sm:$0xff] %v9110_v56  ;;  %11491 = vst [vmem:[#allocation74_spill] sm:$0xff] %v9118_v30  ;;  %707 = vmatmul.mubr.f32.vlgmr.msra.gmra.mrb[0].mxu1 %v8979_v59  ;;  %v9135_v34 = vand.u32 4294901760, %v287_v54  ;;  %v9138_v32 = vand.u32 4294901760, %v9118_v30  ;;  %v9141_v57 = vsub.f32 %v87_v60, %v9120_v3  ;;  %274 = vmatprep.mubr.f32.mxu0 %v9122_v11  ;;  %v92_v59 = vld [vmem:[#allocation2 + $0x78] sm:$0xff]  ;;  %vm3026_vm6 = vcmask 1046534  }
  0x8a   :  { %11492 = vst [vmem:[#allocation75_spill] sm:$0xff] %v9120_v3  ;;  %11493 = vst [vmem:[#allocation76_spill] sm:$0xff] %v9122_v11  ;;  %7944 = vmatpush3.bf16.msra.mxu1 %v8771_v20  ;;  %v9145_v8 = vand.u32 4294901760, %v293_v4  ;;  %v9148_v10 = vand.u32 4294901760, %v9127_v29  ;;  %v9151_v58 = vand.u32 4294901760, %v9130_v13  ;;  %v7917_v54 = vpack.c.bf16 %v8800_v41, %v8798_v40  ;;  %280 = vmatmul.mubr.f32.gmra.mrb[4].mxu0 %v9132_v28 }
  0x8b   :  { %11494 = vst [vmem:[#allocation77_spill] sm:$0xff] %v9127_v29  ;;  %11495 = vst [vmem:[#allocation78_spill] sm:$0xff] %v9130_v13  ;;  %712 = vmatprep.mubr.f32.mxu1 %v8976_v1  ;;  %v302_v60 = vsub.f32 %v9118_v30, %v9138_v32  ;;  %v9160_v4 = vand.u32 4294901760, %v9141_v57  ;;  %v9162_v11 = vand.u32 4294901760, %v90_v21  ;;  %v7919_v24 = vpack.c.bf16 %v8808_v47, %v8806_v46 }
  0x8c   :  { %11496 = vst [vmem:[#allocation79_spill] sm:$0xff] %v9132_v28  ;;  %11497 = vst [vmem:[#allocation80_spill] sm:$0xff] %v9135_v34  ;;  %289 = vmatprep.mubr.f32.mxu0 %v9135_v34  ;;  %v308_v1 = vsub.f32 %v9127_v29, %v9148_v10  ;;  %7946 = vmatprep.subr.bf16.mxu1 %v8775_v22  ;;  %v9174_v30 = vand.u32 4294901760, %v89_v42  ;;  %v9184_v28 = vand.u32 4294901760, %v92_v59  ;;  %vm3028_vm7 = vcmask 1047559  }
  0x8d   :  { %11498 = vst [vmem:[#allocation81_spill] sm:$0xff] %v9138_v32  ;;  %11499 = vst [vmem:[#allocation82_spill] sm:$0xff] %v9141_v57  ;;  %v317_v32 = vsub.f32 %v9130_v13, %v9151_v58  ;;  %714 = vmatmul.mubr.f32.gmra.mrb[2].mxu1 %v9020_v35  ;;  %v9177_v20 = vand.u32 4294901760, %v302_v60  ;;  %v323_v34 = vsub.f32 %v9141_v57, %v9160_v4  ;;  %7918 = vmatprep.subr.bf16.mxu0 %v7917_v54  ;;  %v93_v54 = vld [vmem:[#allocation2 + $0x80] sm:$0xff]  ;;  %vm3032_vm9 = vcmask 130048  }
  0x8e   :  { %11500 = vst [vmem:[#allocation83_spill] sm:$0xff] %v9145_v8  ;;  %11501 = vst [vmem:[#allocation84_spill] sm:$0xff] %v9148_v10  ;;  %v9182_v19 = vsub.f32 %v90_v21, %v9162_v11  ;;  %v94_v10 = vld [vmem:[#allocation2 + $0x88] sm:$0xff]  ;;  %719 = vmatprep.mubr.f32.mxu1 %v9061_v37  ;;  %v9187_v29 = vand.u32 4294901760, %v308_v1  ;;  %7948 = vmatpush3.bf16.msra.mxu1 %v8782_v27  ;;  %v9193_v60 = vsub.f32 %v89_v42, %v9174_v30  ;;  %v96_v42 = vld [vmem:[#allocation2 + $0x98] sm:$0xff] }
  0x8f   :  { %11502 = vst [vmem:[#allocation85_spill] sm:$0xff] %v9151_v58  ;;  %11503 = vst [vmem:[#allocation86_spill] sm:$0xff] %v9160_v4  ;;  %v9190_v58 = vand.u32 4294901760, %v317_v32  ;;  %v9195_v35 = vand.u32 4294901760, %v91_v44  ;;  %295 = vmatmul.mubr.f32.gmra.mrb[6].mxu0 %v9145_v8  ;;  %v9198_v21 = vand.u32 4294901760, %v323_v34  ;;  %7950 = vmatprep.subr.bf16.mxu1 %v8796_v39  ;;  %v9205_v1 = vsub.f32 %v92_v59, %v9184_v28  ;;  %v95_v59 = vld [vmem:[#allocation2 + $0x90] sm:$0xff] }
  0x90   :  { %11504 = vst [vmem:[#allocation87_spill] sm:$0xff] %v9162_v11  ;;  %11505 = vst [vmem:[#allocation88_spill] sm:$0xff] %v9174_v30  ;;  %v9201_v4 = vand.u32 4294901760, %v9182_v19  ;;  %v7921_v32 = vpack.c.bf16 %v8830_v0, %v8826_v61  ;;  %304 = vmatprep.mubr.f32.mxu0 %v9177_v20  ;;  %7920 = vmatpush3.bf16.msra.mxu0 %v7919_v24  ;;  %v9211_v37 = vand.u32 4294901760, %v9193_v60  ;;  %v9216_v8 = vand.u32 4294901760, %v94_v10  ;;  %v11570_v27 = vld [vmem:[#allocation39_spill] sm:$0xff] }
  0x91   :  { %11506 = vst [vmem:[#allocation89_spill] sm:$0xff] %v9177_v20  ;;  %11507 = vst [vmem:[#allocation90_spill] sm:$0xff] %v9182_v19  ;;  %v9214_v34 = vsub.f32 %v91_v44, %v9195_v35  ;;  %v7923_v57 = vpack.c.bf16 %v8846_v18, %v8844_v17  ;;  %721 = vmatmul.mubr.f32.gmra.mrb[4].mxu1 %v9065_v33  ;;  %v9226_v20 = vand.u32 4294901760, %v9205_v1  ;;  %v9228_v44 = vand.u32 4294901760, %v93_v54 }
  0x92   :  { %11508 = vst [vmem:[#allocation91_spill] sm:$0xff] %v9184_v28  ;;  %11509 = vst [vmem:[#allocation92_spill] sm:$0xff] %v9187_v29  ;;  %v332_v24 = vsub.f32 %v9182_v19, %v9201_v4  ;;  %7922 = vmatprep.subr.bf16.mxu0 %v7921_v32  ;;  %726 = vmatprep.mubr.f32.mxu1 %v9067_v5  ;;  %v338_v39 = vsub.f32 %v9193_v60, %v9211_v37  ;;  %v9249_v5 = vand.u32 4294901760, %v95_v59 }
  0x93   :  { %11510 = vst [vmem:[#allocation93_spill] sm:$0xff] %v9190_v58  ;;  %11511 = vst [vmem:[#allocation94_spill] sm:$0xff] %v9193_v60  ;;  %7952 = vmatpush3.bf16.msra.mxu1 %v8804_v45  ;;  %v9235_v33 = vand.u32 4294901760, %v9214_v34  ;;  %v9238_v13 = vsub.f32 %v94_v10, %v9216_v8  ;;  %310 = vmatmul.mubr.f32.gmra.mrb[8].mxu0 %v9187_v29  ;;  %v9246_v19 = vsub.f32 %v93_v54, %v9228_v44 }
  0x94   :  { %11512 = vst [vmem:[#allocation95_spill] sm:$0xff] %v9195_v35  ;;  %11513 = vst [vmem:[#allocation96_spill] sm:$0xff] %v9198_v21  ;;  %v9243_v32 = vand.u32 4294901760, %v332_v24  ;;  %7954 = vmatprep.subr.bf16.mxu1 %v8828_v63  ;;  %319 = vmatprep.mubr.f32.mxu0 %v9190_v58  ;;  %v347_v10 = vsub.f32 %v9205_v1, %v9226_v20  ;;  %v97_v24 = vld [vmem:[#allocation2 + $0xa0] sm:$0xff]  ;;  %v9263_v63 = vand.u32 4294901760, %v338_v39 }
  0x95   :  { %11514 = vst [vmem:[#allocation97_spill] sm:$0xff] %v9201_v4  ;;  %11515 = vst [vmem:[#allocation98_spill] sm:$0xff] %v9205_v1  ;;  %v9240_v4 = vand.u32 4294901760, %v96_v42  ;;  %v353_v60 = vsub.f32 %v9214_v34, %v9235_v33  ;;  %v9257_v29 = vand.u32 4294901760, %v9238_v13  ;;  %7924 = vmatpush3.bf16.msra.mxu0 %v7923_v57  ;;  %728 = vmatmul.mubr.f32.gmra.mrb[6].mxu1 %v9074_v43  ;;  %v9266_v58 = vand.u32 4294901760, %v9246_v19 }
  0x96   :  { %11516 = vst [vmem:[#allocation99_spill] sm:$0xff] %v9211_v37  ;;  %11517 = vst [vmem:[#allocation100_spill] sm:$0xff] %v9214_v34  ;;  %v98_v37 = vld [vmem:[#allocation2 + $0xa8] sm:$0xff]  ;;  %733 = vmatprep.mubr.f32.mxu1 %v9099_v26  ;;  %v100_v34 = vld [vmem:[#allocation2 + $0xb8] sm:$0xff]  ;;  %v9295_v1 = vand.u32 4294901760, %v347_v10 }
  0x97   :  { %11518 = vst [vmem:[#allocation101_spill] sm:$0xff] %v9216_v8  ;;  %11519 = vst [vmem:[#allocation102_spill] sm:$0xff] %v9226_v20  ;;  %v9260_v54 = vsub.f32 %v96_v42, %v9240_v4  ;;  %v9269_v20 = vsub.f32 %v95_v59, %v9249_v5  ;;  %v9274_v57 = vand.u32 4294901760, %v353_v60  ;;  %v362_v42 = vsub.f32 %v9238_v13, %v9257_v29 }
  0x98   :  { %11520 = vst [vmem:[#allocation103_spill] sm:$0xff] %v9228_v44  ;;  %11521 = vst [vmem:[#allocation104_spill] sm:$0xff] %v9235_v33  ;;  %v7925_v33 = vpack.c.bf16 %v8861_v52, %v8859_v51  ;;  %7956 = vmatpush3.bf16.msra.mxu1 %v8842_v16  ;;  %v9282_v43 = vand.u32 4294901760, %v98_v37  ;;  %325 = vmatmul.mubr.f32.gmra.mrb[10].mxu0 %v9198_v21  ;;  %v368_v59 = vsub.f32 %v9246_v19, %v9266_v58  ;;  %v101_v21 = vld [vmem:[#allocation2 + $0xc0] sm:$0xff]  ;;  %v11588_v51 = vld [vmem:[#allocation22_spill] sm:$0xff] }
  0x99   :  { %11522 = vst [vmem:[#allocation105_spill] sm:$0xff] %v9238_v13  ;;  %11523 = vst [vmem:[#allocation106_spill] sm:$0xff] %v9240_v4  ;;  %v9280_v39 = vand.u32 4294901760, %v9260_v54  ;;  %v9288_v26 = vand.u32 4294901760, %v9269_v20  ;;  %v7927_v60 = vpack.c.bf16 %v8876_v7, %v8870_v62  ;;  %v99_v13 = vld [vmem:[#allocation2 + $0xb0] sm:$0xff]  ;;  %334 = vmatprep.mubr.f32.mxu0 %v9243_v32  ;;  %7958 = vmatprep.subr.bf16.mxu1 %v8857_v50  ;;  %v11589_v18 = vand.u32 4294901760, %v11588_v51 }
  0x9a   :  { %11524 = vst [vmem:[#allocation107_spill] sm:$0xff] %v9243_v32  ;;  %11525 = vst [vmem:[#allocation108_spill] sm:$0xff] %v9246_v19  ;;  %7926 = vmatprep.subr.bf16.mxu0 %v7925_v33  ;;  %v9300_v16 = vsub.f32 %v98_v37, %v9282_v43  ;;  %735 = vmatmul.mubr.f32.gmra.mrb[8].mxu1 %v9108_v31  ;;  %v9304_v33 = vand.u32 4294901760, %v362_v42  ;;  %v9311_v32 = vand.u32 4294901760, %v100_v34  ;;  %v9314_v37 = vand.u32 4294901760, %v368_v59 }
  0x9b   :  { %11526 = vst [vmem:[#allocation109_spill] sm:$0xff] %v9249_v5  ;;  %11527 = vst [vmem:[#allocation110_spill] sm:$0xff] %v9257_v29  ;;  %v9292_v29 = vand.u32 4294901760, %v97_v24  ;;  %v383_v19 = vsub.f32 %v9269_v20, %v9288_v26  ;;  %7928 = vmatpush3.bf16.msra.mxu0 %v7927_v60  ;;  %740 = vmatprep.mubr.f32.mxu1 %v9110_v56  ;;  %v377_v50 = vsub.f32 %v9260_v54, %v9280_v39 }
  0x9c   :  { %11528 = vst [vmem:[#allocation111_spill] sm:$0xff] %v9260_v54  ;;  %11529 = vst [vmem:[#allocation112_spill] sm:$0xff] %v9263_v63  ;;  %7960 = vmatpush3.bf16.msra.mxu1 %v8874_v6  ;;  %v9319_v42 = vand.u32 4294901760, %v99_v13  ;;  %v7929_v60 = vpack.c.bf16 %v8891_v53, %v8889_v49  ;;  %340 = vmatmul.mubr.f32.gmra.mrb[12].mxu0 %v9263_v63  ;;  %v9327_v31 = vand.u32 4294901760, %v9300_v16  ;;  %v103_v54 = vld [vmem:[#allocation2 + $0xd0] sm:$0xff] }
  0x9d   :  { %11530 = vst [vmem:[#allocation113_spill] sm:$0xff] %v9266_v58  ;;  %11531 = vst [vmem:[#allocation114_spill] sm:$0xff] %v9269_v20  ;;  %v102_v58 = vld [vmem:[#allocation2 + $0xc8] sm:$0xff]  ;;  %v9309_v10 = vsub.f32 %v97_v24, %v9292_v29  ;;  %v9324_v24 = vand.u32 4294901760, %v383_v19  ;;  %7962 = vmatprep.subr.bf16.mxu1 %v8887_v48  ;;  %349 = vmatprep.mubr.f32.mxu0 %v9295_v1  ;;  %v7931_v19 = vpack.c.bf16 %v8906_v2, %v8900_v9 }
  0x9e   :  { %11532 = vst [vmem:[#allocation115_spill] sm:$0xff] %v9274_v57  ;;  %11533 = vst [vmem:[#allocation116_spill] sm:$0xff] %v9280_v39  ;;  %v9332_v56 = vand.u32 4294901760, %v102_v58  ;;  %v9337_v39 = vsub.f32 %v100_v34, %v9311_v32  ;;  %v9340_v63 = vsub.f32 %v99_v13, %v9319_v42  ;;  %7930 = vmatprep.subr.bf16.mxu0 %v7929_v60  ;;  %v9344_v20 = vand.u32 4294901760, %v101_v21 }
  0x9f   :  { %11534 = vst [vmem:[#allocation117_spill] sm:$0xff] %v9282_v43  ;;  %11535 = vst [vmem:[#allocation118_spill] sm:$0xff] %v9288_v26  ;;  %v9330_v59 = vand.u32 4294901760, %v9309_v10  ;;  %v104_v26 = vld [vmem:[#allocation2 + $0xd8] sm:$0xff]  ;;  %742 = vmatmul.mubr.f32.gmra.mrb[10].mxu1 %v9120_v3  ;;  %7932 = vmatpush3.bf16.msra.mxu0 %v7931_v19  ;;  %v9364_v48 = vand.u32 4294901760, %v377_v50  ;;  %v392_v3 = vsub.f32 %v9300_v16, %v9327_v31  ;;  %v11559_v50 = vld [vmem:[#allocation36_spill] sm:$0xff] }
  0xa0   :  { %11536 = vst [vmem:[#allocation119_spill] sm:$0xff] %v9292_v29  ;;  %11537 = vst [vmem:[#allocation120_spill] sm:$0xff] %v9295_v1  ;;  %747 = vmatprep.mubr.f32.mxu1 %v9162_v11  ;;  %v9353_v13 = vand.u32 4294901760, %v9340_v63  ;;  %v9356_v34 = vsub.f32 %v102_v58, %v9332_v56  ;;  %v9359_v60 = vsub.f32 %v101_v21, %v9344_v20  ;;  %v9361_v6 = vand.u32 4294901760, %v104_v26 }
  0xa1   :  { %11538 = vst [vmem:[#allocation121_spill] sm:$0xff] %v9300_v16  ;;  %11539 = vst [vmem:[#allocation122_spill] sm:$0xff] %v9304_v33  ;;  %v398_v1 = vsub.f32 %v9309_v10, %v9330_v59  ;;  %355 = vmatmul.mubr.f32.gmra.mrb[14].mxu0 %v9274_v57  ;;  %7964 = vmatpush3.bf16.msra.mxu1 %v8904_v25  ;;  %v9369_v11 = vand.u32 4294901760, %v103_v54  ;;  %v9373_v58 = vand.u32 4294901760, %v9337_v39  ;;  %v11560_v57 = vld [vmem:[#allocation37_spill] sm:$0xff]  ;;  %v106_v25 = vld [vmem:[#allocation2 + $0xe8] sm:$0xff] }
  0xa2   :  { %11540 = vst [vmem:[#allocation123_spill] sm:$0xff] %v9309_v10  ;;  %11541 = vst [vmem:[#allocation124_spill] sm:$0xff] %v9311_v32  ;;  %364 = vmatprep.mubr.f32.mxu0 %v9304_v33  ;;  %v413_v21 = vsub.f32 %v9340_v63, %v9353_v13  ;;  %v9378_v19 = vand.u32 4294901760, %v9359_v60  ;;  %v105_v10 = vld [vmem:[#allocation2 + $0xe0] sm:$0xff]  ;;  %v9396_v45 = vsub.f32 %v104_v26, %v9361_v6  ;;  %v9410_v26 = vand.u32 4294901760, %v392_v3 }
  0xa3   :  { %11542 = vst [vmem:[#allocation125_spill] sm:$0xff] %v9314_v37  ;;  %11543 = vst [vmem:[#allocation126_spill] sm:$0xff] %v9319_v42  ;;  %749 = vmatmul.mubr.f32.gmra.mrb[12].mxu1 %v9174_v30  ;;  %v9384_v16 = vand.u32 4294901760, %v398_v1  ;;  %v9387_v33 = vsub.f32 %v103_v54, %v9369_v11  ;;  %v107_v1 = vld [vmem:[#allocation2 + $0xf0] sm:$0xff]  ;;  %v9416_v52 = vand.u32 4294901760, %v106_v25 }
  0xa4   :  { %11544 = vst [vmem:[#allocation127_spill] sm:$0xff] %v9324_v24  ;;  %11545 = vst [vmem:[#allocation128_spill] sm:$0xff] %v9327_v31  ;;  %v11561_v31 = vld [vmem:[#allocation35_spill] sm:$0xff]  ;;  %754 = vmatprep.mubr.f32.mxu1 %v9184_v28  ;;  %v428_v54 = vsub.f32 %v9359_v60, %v9378_v19  ;;  %v9424_v3 = vand.u32 4294901760, %v107_v1 }
  0xa5   :  { %11546 = vst [vmem:[#allocation129_spill] sm:$0xff] %v9330_v59  ;;  %11547 = vst [vmem:[#allocation130_spill] sm:$0xff] %v9332_v56  ;;  %v7933_v59 = vpack.c.bf16 %v11560_v57, %v11559_v50  ;;  %7966 = vmatprep.subr.bf16.mxu1 %v11561_v31  ;;  %v11567_v31 = vld [vmem:[#allocation38_spill] sm:$0xff]  ;;  %370 = vmatmul.mubr.f32.gmra.mrb[16].mxu0 %v9314_v37  ;;  %v9404_v28 = vand.u32 4294901760, %v9387_v33 }
  0xa6   :  { %11548 = vst [vmem:[#allocation131_spill] sm:$0xff] %v9337_v39  ;;  %11549 = vst [vmem:[#allocation132_spill] sm:$0xff] %v9340_v63  ;;  %v9393_v63 = vand.u32 4294901760, %v9356_v34  ;;  %v7935_v30 = vpack.c.bf16 %v8936_v55, %v11567_v31  ;;  %7968 = vmatpush3.bf16.msra.mxu1 %v11570_v27  ;;  %379 = vmatprep.mubr.f32.mxu0 %v9364_v48  ;;  %v11575_v27 = vld [vmem:[#allocation40_spill] sm:$0xff] }
  0xa7   :  { %11550 = vst [vmem:[#allocation133_spill] sm:$0xff] %v9344_v20  ;;  %11551 = vst [vmem:[#allocation134_spill] sm:$0xff] %v9353_v13  ;;  %v9390_v13 = vand.u32 4294901760, %v413_v21  ;;  %7934 = vmatprep.subr.bf16.mxu0 %v7933_v59  ;;  %v9406_v21 = vand.u32 4294901760, %v105_v10  ;;  %v407_v59 = vsub.f32 %v9337_v39, %v9373_v58  ;;  %756 = vmatmul.mubr.f32.gmra.mrb[14].mxu1 %v9195_v35 }
  0xa8   :  { %11552 = vst [vmem:[#allocation135_spill] sm:$0xff] %v9356_v34  ;;  %11553 = vst [vmem:[#allocation136_spill] sm:$0xff] %v9359_v60  ;;  %7936 = vmatpush3.bf16.msra.mxu0 %v7935_v30  ;;  %7970 = vmatprep.subr.bf16.mxu1 %v11575_v27  ;;  %v422_v37 = vsub.f32 %v9356_v34, %v9393_v63  ;;  %v9431_v30 = vand.u32 4294901760, %v9396_v45  ;;  %v7937_v35 = vpack.c.bf16 %v8951_v38, %v8949_v36  ;;  %v11582_v34 = vld [vmem:[#allocation41_spill] sm:$0xff] }
  0xa9   :  { %11554 = vst [vmem:[#allocation137_spill] sm:$0xff] %v9361_v6  ;;  %11555 = vst [vmem:[#allocation138_spill] sm:$0xff] %v9364_v48  ;;  %v9422_v60 = vsub.f32 %v105_v10, %v9406_v21  ;;  %v108_v48 = vld [vmem:[#allocation2 + $0xf8] sm:$0xff]  ;;  %761 = vmatprep.mubr.f32.mxu1 %v9216_v8  ;;  %385 = vmatmul.mubr.f32.gmra.mrb[18].mxu0 %v9324_v24  ;;  %v9450_v39 = vand.u32 4294901760, %v407_v59  ;;  %v9453_v27 = vsub.f32 %v106_v25, %v9416_v52 }
  0xaa   :  { %11556 = vst [vmem:[#allocation139_spill] sm:$0xff] %v9369_v11  ;;  %11557 = vst [vmem:[#allocation140_spill] sm:$0xff] %v9373_v58  ;;  %7972 = vmatpush3.bf16.msra.mxu1 %v11582_v34  ;;  %394 = vmatprep.mubr.f32.mxu0 %v9410_v26  ;;  %v9455_v24 = vand.u32 4294901760, %v108_v48 }
  0xab   :  { %11558 = vst [vmem:[#allocation141_spill] sm:$0xff] %v9378_v19  ;;  %11562 = vst [vmem:[#allocation36_spill] sm:$0xff] %v9384_v16  ;;  %v443_v19 = vsub.f32 %v9387_v33, %v9404_v28  ;;  %v9443_v8 = vand.u32 4294901760, %v9422_v60  ;;  %7938 = vmatprep.subr.bf16.mxu0 %v7937_v35  ;;  %763 = vmatmul.mubr.f32.gmra.mrb[16].mxu1 %v9228_v44  ;;  %v9471_v35 = vand.u32 4294901760, %v422_v37  ;;  %v9480_v25 = vand.u32 4294901760, %v9453_v27  ;;  %v11702_v44 = vld [vmem:[#allocation85_spill] sm:$0xff] }
  0xac   :  { %11563 = vst [vmem:[#allocation37_spill] sm:$0xff] %v9387_v33  ;;  %11564 = vst [vmem:[#allocation142_spill] sm:$0xff] %v9390_v13  ;;  %v9438_v33 = vand.u32 4294901760, %v428_v54  ;;  %768 = vmatprep.mubr.f32.mxu1 %v9240_v4  ;;  %8006 = vmatprep.subr.bf16.mxu1 %v8767_v14  ;;  %v11595_v37 = vand.u32 4294901760, %v8870_v62  ;;  %v11598_v14 = vand.u32 4294901760, %v8889_v49  ;;  %v11602_v62 = vand.u32 4294901760, %v11559_v50 }
  0xad   :  { %11565 = vst [vmem:[#allocation143_spill] sm:$0xff] %v9393_v63  ;;  %11566 = vst [vmem:[#allocation144_spill] sm:$0xff] %v9396_v45  ;;  %v9440_v58 = vand.u32 4294901760, %v443_v19  ;;  %v9446_v63 = vsub.f32 %v107_v1, %v9424_v3  ;;  %v11586_v19 = vld [vmem:[#allocation21_spill] sm:$0xff]  ;;  %v458_v59 = vsub.f32 %v9422_v60, %v9443_v8  ;;  %400 = vmatmul.mubr.f32.gmra.mrb[20].mxu0 %v9384_v16  ;;  %v11599_v16 = vand.u32 4294901760, %v8891_v53 }
  0xae   :  { %11568 = vst [vmem:[#allocation38_spill] sm:$0xff] %v9404_v28  ;;  %11569 = vst [vmem:[#allocation145_spill] sm:$0xff] %v9406_v21  ;;  %v11577_v28 = vld [vmem:[#allocation42_spill] sm:$0xff]  ;;  %v11587_v54 = vand.u32 4294901760, %v11586_v19  ;;  %409 = vmatprep.mubr.f32.mxu0 %v9450_v39  ;;  %v11596_v19 = vand.u32 4294901760, %v8876_v7  ;;  %v11603_v7 = vand.u32 4294901760, %v11560_v57 }
  0xaf   :  { %11571 = vst [vmem:[#allocation146_spill] sm:$0xff] %v9410_v26  ;;  %11572 = vst [vmem:[#allocation147_spill] sm:$0xff] %v9416_v52  ;;  %v7939_v10 = vpack.c.bf16 %v11577_v28, %v8960_v12  ;;  %v9467_v26 = vand.u32 4294901760, %v9446_v63  ;;  %770 = vmatmul.mubr.f32.gmra.mrb[18].mxu1 %v9249_v5  ;;  %v11604_v49 = vand.u32 4294901760, %v11567_v31  ;;  %v11605_v53 = vand.u32 4294901760, %v8936_v55  ;;  %v11621_v31 = vld [vmem:[#allocation48_spill] sm:$0xff] }
  0xb0   :  { %11573 = vst [vmem:[#allocation148_spill] sm:$0xff] %v9422_v60  ;;  %11574 = vst [vmem:[#allocation149_spill] sm:$0xff] %v9424_v3  ;;  %v7973_v17 = vpack.c.bf16 %v11589_v18, %v11587_v54  ;;  %v437_v18 = vsub.f32 %v9396_v45, %v9431_v30  ;;  %v9491_v54 = vpack.c.bf16 %v11596_v19, %v11595_v37  ;;  %775 = vmatprep.mubr.f32.mxu1 %v9282_v43  ;;  %v9801_v5 = vld [vmem:[#allocation8 + $0x68] sm:$0xff]  ;;  %v9847_v43 = vld [vmem:[#allocation8 + $0x78] sm:$0xff] }
  0xb1   :  { %11576 = vst [vmem:[#allocation150_spill] sm:$0xff] %v9431_v30  ;;  %11578 = vst [vmem:[#allocation42_spill] sm:$0xff] %v9438_v33  ;;  %7940 = vmatpush3.bf16.msra.mxu0 %v7939_v10  ;;  %v473_v51 = vsub.f32 %v9446_v63, %v9467_v26  ;;  %v9482_v10 = vand.u32 4294901760, %v458_v59  ;;  %v11600_v59 = vand.u32 4294901760, %v8900_v9  ;;  %v9512_v37 = vpack.c.bf16 %v11603_v7, %v11602_v62  ;;  %v11616_v7 = vld [vmem:[#allocation16_spill] sm:$0xff] }
  0xb2   :  { %11579 = vst [vmem:[#allocation151_spill] sm:$0xff] %v9440_v58  ;;  %11580 = vst [vmem:[#allocation152_spill] sm:$0xff] %v9443_v8  ;;  %7974 = vmatprep.subr.bf16.mxu0 %v7973_v17  ;;  %v9485_v17 = vsub.f32 %v108_v48, %v9455_v24  ;;  %v11601_v48 = vand.u32 4294901760, %v8906_v2  ;;  %v11606_v9 = vand.u32 4294901760, %v8949_v36  ;;  %v11607_v2 = vand.u32 4294901760, %v8951_v38  ;;  %415 = vmatmul.mubr.f32.gmra.mrb[22].mxu0 %v9390_v13 }
  0xb3   :  { %11581 = vst [vmem:[#allocation153_spill] sm:$0xff] %v9446_v63  ;;  %11583 = vst [vmem:[#allocation41_spill] sm:$0xff] %v9450_v39  ;;  %v9494_v1 = vand.u32 4294901760, %v473_v51  ;;  %v9500_v39 = vpack.c.bf16 %v11599_v16, %v11598_v14  ;;  %v9519_v16 = vpack.c.bf16 %v11605_v53, %v11604_v49  ;;  %v11608_v50 = vand.u32 4294901760, %v8960_v12  ;;  %424 = vmatprep.mubr.f32.mxu0 %v9471_v35  ;;  %v9565_v14 = vld [vmem:[#allocation8 + $0x80] sm:$0xff] }
  0xb4   :  { %11584 = vst [vmem:[#allocation154_spill] sm:$0xff] %v9453_v27  ;;  %11585 = vst [vmem:[#allocation155_spill] sm:$0xff] %v9455_v24  ;;  %v9506_v4 = vpack.c.bf16 %v11601_v48, %v11600_v59  ;;  %v9525_v51 = vpack.c.bf16 %v11607_v2, %v11606_v9  ;;  %v11609_v57 = vand.u32 4294901760, %v11577_v28  ;;  %v9537_v55 = vand.u32 4294901760, %v437_v18  ;;  %777 = vmatmul.mubr.f32.gmra.mrb[20].mxu1 %v9292_v29  ;;  %v9567_v59 = vld [vmem:[#allocation8 + $0x88] sm:$0xff]  ;;  %v11619_v2 = vld [vmem:[#allocation17_spill] sm:$0xff] }
  0xb5   :  { %11590 = vst [vmem:[#allocation21_spill] sm:$0xff] %v9467_v26  ;;  %11591 = vst [vmem:[#allocation22_spill] sm:$0xff] %v9471_v35  ;;  %v452_v36 = vsub.f32 %v9453_v27, %v9480_v25  ;;  %v9542_v38 = vand.u32 4294901760, %v9485_v17  ;;  %782 = vmatprep.mubr.f32.mxu1 %v9311_v32  ;;  %v11614_v48 = vld [vmem:[#allocation46_spill] sm:$0xff]  ;;  %v11615_v62 = vand.u32 4294901760, %v8769_v15  ;;  %v11617_v49 = vand.u32 4294901760, %v11616_v7 }
  0xb6   :  { %11592 = vst [vmem:[#allocation156_spill] sm:$0xff] %v9480_v25  ;;  %11593 = vst [vmem:[#allocation157_spill] sm:$0xff] %v9482_v10  ;;  %v9531_v19 = vpack.c.bf16 %v11609_v57, %v11608_v50  ;;  %430 = vmatmul.mubr.f32.gmra.mrb[24].mxu0 %v9438_v33  ;;  %v11618_v9 = vand.u32 4294901760, %v8777_v23  ;;  %v11620_v50 = vand.u32 4294901760, %v11619_v2  ;;  %v11623_v15 = vld [vmem:[#allocation19_spill] sm:$0xff]  ;;  %v11625_v7 = vld [vmem:[#allocation20_spill] sm:$0xff] }
  0xb7   :  { %11594 = vst [vmem:[#allocation158_spill] sm:$0xff] %v9485_v17  ;;  %11597 = vst [vmem:[#allocation159_spill] sm:$0xff] %v9494_v1  ;;  %439 = vmatprep.mubr.f32.mxu0 %v9537_v55  ;;  %v9548_v28 = vand.u32 4294901760, %v452_v36  ;;  %v467_v12 = vsub.f32 %v9485_v17, %v9542_v38  ;;  %v7975_v53 = vpack.c.bf16 %v11617_v49, %v11615_v62  ;;  %v11315_v36 = vand.u32 4294901760, %v9565_v14  ;;  %v11698_v32 = vld [vmem:[#allocation84_spill] sm:$0xff] }
  0xb8   :  { %11610 = vst [vmem:[#allocation160_spill] sm:$0xff] %v9537_v55  ;;  %11611 = vst [vmem:[#allocation161_spill] sm:$0xff] %v9542_v38  ;;  %784 = vmatmul.mubr.f32.gmra.mrb[22].mxu1 %v9319_v42  ;;  %v7977_v57 = vpack.c.bf16 %v11620_v50, %v11618_v9  ;;  %v11624_v62 = vand.u32 4294901760, %v11623_v15  ;;  %v11626_v49 = vand.u32 4294901760, %v11625_v7  ;;  %v11627_v23 = vand.u32 4294901760, %v8798_v40  ;;  %v11629_v50 = vld [vmem:[#allocation49_spill] sm:$0xff] }
  0xb9   :  { %11612 = vst [vmem:[#allocation162_spill] sm:$0xff] %v9548_v28  ;;  %789 = vmatprep.mubr.f32.mxu1 %v9332_v56  ;;  %v9556_v18 = vand.u32 4294901760, %v467_v12  ;;  %v1936_v12 = vand.u32 4294901760, %v9567_v59  ;;  %v11628_v9 = vand.u32 4294901760, %v8800_v41  ;;  %v9597_v33 = vsub.f32 %v9565_v14, %v11315_v36  ;;  %v11631_v15 = vld [vmem:[#allocation55_spill] sm:$0xff]  ;;  %v11693_v56 = vld [vmem:[#allocation90_spill] sm:$0xff] }
  0xba   :  { %445 = vmatmul.mubr.f32.gmra.mrb[26].mxu0 %v9440_v58  ;;  %v11633_v40 = vand.u32 4294901760, %v8806_v46  ;;  %v11634_v41 = vand.u32 4294901760, %v8808_v47  ;;  %v11635_v7 = vld [vmem:[#allocation51_spill] sm:$0xff]  ;;  %v11639_v58 = vld [vmem:[#allocation50_spill] sm:$0xff]  ;;  %v11646_v46 = vld [vmem:[#allocation57_spill] sm:$0xff]  ;;  %11701 = vst [vmem:[#allocation166_spill] sm:$0xff] %v9801_v5 }
  0xbb   :  { %454 = vmatprep.mubr.f32.mxu0 %v9548_v28  ;;  %11613 = vst [vmem:[#allocation163_spill] sm:$0xff] %v9556_v18  ;;  %v7981_v2 = vpack.c.bf16 %v11628_v9, %v11627_v23  ;;  %11630 = vst [vmem:[#allocation16_spill] sm:$0xff] %v9597_v33  ;;  %v11637_v23 = vand.u32 4294901760, %v8830_v0  ;;  %v11638_v36 = vld [vmem:[#allocation15_spill] sm:$0xff]  ;;  %v9631_v28 = vld [vmem:[#allocation8 + $0x98] sm:$0xff] }
  0xbc   :  { %791 = vmatmul.mubr.f32.gmra.mrb[24].mxu1 %v9344_v20  ;;  %v11642_v0 = vld [vmem:[#allocation27_spill] sm:$0xff]  ;;  %v11647_v47 = vld [vmem:[#allocation30_spill] sm:$0xff]  ;;  %v9765_v20 = vld [vmem:[#allocation8 + $0x58] sm:$0xff]  ;;  %11718 = vst [vmem:[#allocation171_spill] sm:$0xff] %v9847_v43 }
  0xbd   :  { %796 = vmatprep.mubr.f32.mxu1 %v9361_v6  ;;  %v11648_v55 = vand.u32 4294901760, %v11647_v47  ;;  %v9649_v47 = vld [vmem:[#allocation8 + $0x18] sm:$0xff]  ;;  %v9799_v42 = vld [vmem:[#allocation8 + $0x60] sm:$0xff] }
  0xbe   :  { %460 = vmatmul.mubr.f32.gmra.mrb[28].mxu0 %v9482_v10  ;;  %v11622_v10 = vld [vmem:[#allocation47_spill] sm:$0xff]  ;;  %11700 = vst [vmem:[#allocation165_spill] sm:$0xff] %v9799_v42 }
  0xbf   :  { %469 = vmatprep.mubr.f32.mxu0 %v9556_v18  ;;  %v9629_v18 = vld [vmem:[#allocation8 + $0x90] sm:$0xff] }
  0xc0   :  { %798 = vmatmul.mubr.f32.gmra.mrb[26].mxu1 %v9369_v11  ;;  %v9749_v11 = vld [vmem:[#allocation8 + $0x50] sm:$0xff] }
  0xc1   :  { %803 = vmatprep.mubr.f32.mxu1 %v9416_v52  ;;  %v9745_v52 = vld [vmem:[#allocation8 + $0xd0] sm:$0xff]  ;;  %11688 = vst [vmem:[#allocation164_spill] sm:$0xff] %v9749_v11 }
  0xc2   :  { %475 = vmatmul.mubr.f32.gmra.mrb[30].mxu0 %v9494_v1  ;;  %v7979_v1 = vpack.c.bf16 %v11626_v49, %v11624_v62  ;;  %v11632_v62 = vld [vmem:[#allocation62_spill] sm:$0xff]  ;;  %v11636_v49 = vand.u32 4294901760, %v8826_v61  ;;  %v11641_v61 = vld [vmem:[#allocation65_spill] sm:$0xff] }
  0xc3   :  { %947 = vmatprep.mubr.f32.mxu0 %v11614_v48  ;;  %v9714_v48 = vld [vmem:[#allocation8 + $0xc8] sm:$0xff] }
  0xc4   :  { %805 = vmatmul.mubr.f32.gmra.mrb[28].mxu1 %v9406_v21  ;;  %v7985_v9 = vpack.c.bf16 %v11637_v23, %v11636_v49 }
  0xc5   :  { %810 = vmatprep.mubr.f32.mxu1 %v9455_v24  ;;  %v11683_v24 = vld [vmem:[#allocation81_spill] sm:$0xff] }
  0xc6   :  { %950 = vmatmul.mubr.f32.vlgmr.msra.gmra.mrb[32].mxu0 %v11621_v31 }
  0xc7   :  { %956 = vmatprep.mubr.f32.mxu0 %v11622_v10  ;;  %7976 = vmatpush3.bf16.msra.mxu0 %v7975_v53  ;;  %v9600_v53 = vsub.f32 %v9567_v59, %v1936_v12  ;;  %v9613_v59 = vld [vmem:[#allocation8] sm:$0xff]  ;;  %v11672_v10 = vand.u32 4294901760, %v9629_v18 }
  0xc8   :  { %812 = vmatmul.mubr.f32.gmra.mrb[30].mxu1 %v9424_v3  ;;  %7978 = vmatprep.subr.bf16.mxu0 %v7977_v57  ;;  %v7983_v57 = vpack.c.bf16 %v11634_v41, %v11633_v40  ;;  %v11640_v40 = vld [vmem:[#allocation64_spill] sm:$0xff]  ;;  %v9732_v3 = vld [vmem:[#allocation8 + $0x48] sm:$0xff] }
  0xc9   :  { %1189 = vmatprep.mubr.f32.mxu1 %v11629_v50  ;;  %v11644_v41 = vld [vmem:[#allocation28_spill] sm:$0xff]  ;;  %v11654_v23 = vand.u32 4294901760, %v9600_v53 }
  0xca   :  { %959 = vmatmul.mubr.f32.gmra.mrb[34].mxu0 %v11631_v15  ;;  %v11645_v49 = vand.u32 4294901760, %v11644_v41  ;;  %v11652_v41 = vld [vmem:[#allocation18_spill] sm:$0xff]  ;;  %v11660_v50 = vld [vmem:[#allocation68_spill] sm:$0xff] }
  0xcb   :  { %965 = vmatprep.mubr.f32.mxu0 %v11632_v62  ;;  %7980 = vmatpush3.bf16.msra.mxu0 %v7979_v1  ;;  %v9617_v1 = vld [vmem:[#allocation8 + $0x8] sm:$0xff]  ;;  %v11666_v15 = vld [vmem:[#allocation24_spill] sm:$0xff]  ;;  %v11671_v62 = vld [vmem:[#allocation25_spill] sm:$0xff]  ;;  %11677 = vst [vmem:[#allocation18_spill] sm:$0xff] %v9714_v48 }
  0xcc   :  { %1193 = vmatmul.mubr.f32.vlgmr.msra.gmra.mrb[32].mxu1 %v11635_v7  ;;  %7982 = vmatprep.subr.bf16.mxu0 %v7981_v2  ;;  %v11643_v2 = vand.u32 4294901760, %v11642_v0  ;;  %v11651_v0 = vld [vmem:[#allocation66_spill] sm:$0xff]  ;;  %11682 = vst [vmem:[#allocation24_spill] sm:$0xff] %v9732_v3  ;;  %11686 = vst [vmem:[#allocation25_spill] sm:$0xff] %v9745_v52 }
  0xcd   :  { %8008 = vmatpush3.bf16.msra.mxu1 %v11638_v36  ;;  %1200 = vmatprep.mubr.f32.mxu1 %v11639_v58  ;;  %v11657_v7 = vld [vmem:[#allocation74_spill] sm:$0xff]  ;;  %v9665_v58 = vld [vmem:[#allocation8 + $0x20] sm:$0xff] }
  0xce   :  { %968 = vmatmul.mubr.f32.gmra.mrb[36].mxu0 %v11640_v40  ;;  %8010 = vmatprep.subr.bf16.mxu1 %v8775_v22  ;;  %v7987_v36 = vpack.c.bf16 %v11645_v49, %v11643_v2  ;;  %v11649_v22 = vld [vmem:[#allocation31_spill] sm:$0xff]  ;;  %v11653_v2 = vand.u32 4294901760, %v9597_v33  ;;  %11659 = vst [vmem:[#allocation17_spill] sm:$0xff] %v9665_v58  ;;  %v11665_v40 = vld [vmem:[#allocation69_spill] sm:$0xff] }
  0xcf   :  { %974 = vmatprep.mubr.f32.mxu0 %v11641_v61  ;;  %7984 = vmatpush3.bf16.msra.mxu0 %v7983_v57  ;;  %v11650_v35 = vand.u32 4294901760, %v11649_v22  ;;  %v11655_v22 = vld [vmem:[#allocation67_spill] sm:$0xff]  ;;  %v9655_v57 = vld [vmem:[#allocation8 + $0xa0] sm:$0xff] }
  0xd0   :  { %1204 = vmatmul.mubr.f32.gmra.mrb[34].mxu1 %v11646_v46  ;;  %7986 = vmatprep.subr.bf16.mxu0 %v7985_v9  ;;  %v2112_v49 = vsub.f32 %v9597_v33, %v11653_v2  ;;  %v2119_v46 = vsub.f32 %v9600_v53, %v11654_v23  ;;  %v9647_v9 = vld [vmem:[#allocation8 + $0x10] sm:$0xff]  ;;  %v11658_v2 = vand.u32 4294901760, %v9613_v59 }
  0xd1   :  { %v7989_v13 = vpack.c.bf16 %v11650_v35, %v11648_v55  ;;  %1211 = vmatprep.mubr.f32.mxu1 %v11651_v0  ;;  %8012 = vmatpush3.bf16.msra.mxu1 %v11652_v41  ;;  %v11656_v35 = vld [vmem:[#allocation23_spill] sm:$0xff]  ;;  %v9663_v0 = vld [vmem:[#allocation8 + $0xa8] sm:$0xff] }
  0xd2   :  { %977 = vmatmul.mubr.f32.gmra.mrb[38].mxu0 %v11655_v22  ;;  %8014 = vmatprep.subr.bf16.mxu1 %v11656_v35  ;;  %v9661_v23 = vsub.f32 %v9613_v59, %v11658_v2  ;;  %v11661_v35 = vand.u32 4294901760, %v9617_v1  ;;  %v9677_v2 = vld [vmem:[#allocation8 + $0xb0] sm:$0xff]  ;;  %v9679_v22 = vld [vmem:[#allocation8 + $0xb8] sm:$0xff]  ;;  %v2120_v31 = vand.u32 4294901760, %v2119_v46  ;;  %v11676_v55 = vld [vmem:[#allocation78_spill] sm:$0xff] }
  0xd3   :  { %983 = vmatprep.mubr.f32.mxu0 %v11657_v7  ;;  %7988 = vmatpush3.bf16.msra.mxu0 %v7987_v36  ;;  %v9675_v7 = vld [vmem:[#allocation8 + $0x28] sm:$0xff]  ;;  %11663 = vst [vmem:[#allocation20_spill] sm:$0xff] %v9677_v2  ;;  %11664 = vst [vmem:[#allocation15_spill] sm:$0xff] %v9679_v22  ;;  %v9688_v61 = vld [vmem:[#allocation8 + $0x30] sm:$0xff] }
  0xd4   :  { %1215 = vmatmul.mubr.f32.gmra.mrb[36].mxu1 %v11660_v50  ;;  %7990 = vmatprep.subr.bf16.mxu0 %v7989_v13  ;;  %v9671_v41 = vsub.f32 %v9617_v1, %v11661_v35  ;;  %11662 = vst [vmem:[#allocation19_spill] sm:$0xff] %v9675_v7  ;;  %v11667_v13 = vand.u32 4294901760, %v9565_v14  ;;  %v2113_v35 = vand.u32 4294901760, %v2112_v49  ;;  %11669 = vst [vmem:[#allocation28_spill] sm:$0xff] %v9688_v61  ;;  %v11670_v36 = vld [vmem:[#allocation77_spill] sm:$0xff]  ;;  %v9704_v49 = vld [vmem:[#allocation8 + $0x38] sm:$0xff] }
  0xd5   :  { %1222 = vmatprep.mubr.f32.mxu1 %v11665_v40  ;;  %8016 = vmatpush3.bf16.msra.mxu1 %v11666_v15  ;;  %v9695_v40 = vsub.f32 %v9629_v18, %v11672_v10  ;;  %v11673_v15 = vand.u32 4294901760, %v9631_v28  ;;  %11674 = vst [vmem:[#allocation30_spill] sm:$0xff] %v9704_v49  ;;  %v11679_v46 = vld [vmem:[#allocation71_spill] sm:$0xff] }
  0xd6   :  { %v9685_v50 = vpack.c.bf16 %v1936_v12, %v11667_v13  ;;  %986 = vmatmul.mubr.f32.gmra.mrb[40].mxu0 %v11670_v36  ;;  %8018 = vmatprep.subr.bf16.mxu1 %v11671_v62  ;;  %v9706_v13 = vld [vmem:[#allocation8 + $0xc0] sm:$0xff]  ;;  %v11681_v62 = vand.u32 4294901760, %v9649_v47 }
  0xd7   :  { %v9700_v14 = vsub.f32 %v9631_v28, %v11673_v15  ;;  %11675 = vst [vmem:[#allocation31_spill] sm:$0xff] %v9706_v13  ;;  %992 = vmatprep.mubr.f32.mxu0 %v11676_v55  ;;  %7992 = vmatpush3.bf16.msra.mxu0 %v9491_v54  ;;  %v9716_v12 = vld [vmem:[#allocation8 + $0x40] sm:$0xff]  ;;  %v11680_v54 = vand.u32 4294901760, %v9647_v9  ;;  %v11685_v55 = vand.u32 4294901760, %v9655_v57  ;;  %v9747_v15 = vld [vmem:[#allocation8 + $0xd8] sm:$0xff] }
  0xd8   :  { %11668 = vst [vmem:[#allocation27_spill] sm:$0xff] %v9685_v50  ;;  %11678 = vst [vmem:[#allocation23_spill] sm:$0xff] %v9716_v12  ;;  %1226 = vmatmul.mubr.f32.gmra.mrb[38].mxu1 %v11679_v46  ;;  %7994 = vmatprep.subr.bf16.mxu0 %v9500_v39  ;;  %v9729_v36 = vsub.f32 %v9649_v47, %v11681_v62  ;;  %v11684_v46 = vld [vmem:[#allocation26_spill] sm:$0xff]  ;;  %v9736_v39 = vpack.c.bf16 %v2120_v31, %v2113_v35  ;;  %v11691_v31 = vand.u32 4294901760, %v9663_v0 }
  0xd9   :  { %v9724_v10 = vsub.f32 %v9647_v9, %v11680_v54  ;;  %1233 = vmatprep.mubr.f32.mxu1 %v11683_v24  ;;  %8020 = vmatpush3.bf16.msra.mxu1 %v11684_v46  ;;  %v9741_v54 = vsub.f32 %v9655_v57, %v11685_v55  ;;  %11687 = vst [vmem:[#allocation26_spill] sm:$0xff] %v9747_v15  ;;  %v11689_v24 = vld [vmem:[#allocation82_spill] sm:$0xff]  ;;  %v11690_v46 = vld [vmem:[#allocation29_spill] sm:$0xff]  ;;  %v11692_v55 = vand.u32 4294901760, %v9665_v58  ;;  %v11696_v62 = vand.u32 4294901760, %v9679_v22 }
  0xda   :  { %995 = vmatmul.mubr.f32.gmra.mrb[42].mxu0 %v11689_v24  ;;  %8022 = vmatprep.subr.bf16.mxu1 %v11690_v46  ;;  %v9756_v35 = vsub.f32 %v9663_v0, %v11691_v31  ;;  %v11694_v46 = vand.u32 4294901760, %v9675_v7  ;;  %v11695_v24 = vand.u32 4294901760, %v9677_v2 }
  0xdb   :  { %v9761_v21 = vsub.f32 %v9665_v58, %v11692_v55  ;;  %1001 = vmatprep.mubr.f32.mxu0 %v11693_v56  ;;  %7996 = vmatpush3.bf16.msra.mxu0 %v9506_v4  ;;  %v9782_v6 = vsub.f32 %v9679_v22, %v11696_v62  ;;  %v9785_v56 = vld [vmem:[#allocation8 + $0xe0] sm:$0xff]  ;;  %v9787_v4 = vld [vmem:[#allocation8 + $0xe8] sm:$0xff]  ;;  %v9816_v62 = vld [vmem:[#allocation8 + $0xf0] sm:$0xff]  ;;  %v11727_v58 = vand.u32 4294901760, %v9765_v20 }
  0xdc   :  { %v9772_v31 = vsub.f32 %v9675_v7, %v11694_v46  ;;  %v9777_v55 = vsub.f32 %v9677_v2, %v11695_v24  ;;  %11697 = vst [vmem:[#allocation29_spill] sm:$0xff] %v9785_v56  ;;  %1237 = vmatmul.mubr.f32.gmra.mrb[40].mxu1 %v11698_v32  ;;  %7998 = vmatprep.subr.bf16.mxu0 %v9512_v37  ;;  %v11699_v46 = vand.u32 4294901760, %v9688_v61  ;;  %v11703_v32 = vld [vmem:[#allocation32_spill] sm:$0xff]  ;;  %v11704_v37 = vand.u32 4294901760, %v9704_v49 }
  0xdd   :  { %1244 = vmatprep.mubr.f32.mxu1 %v11702_v44  ;;  %8024 = vmatpush3.bf16.msra.mxu1 %v11703_v32  ;;  %11707 = vst [vmem:[#allocation167_spill] sm:$0xff] %v9816_v62  ;;  %v11708_v44 = vld [vmem:[#allocation94_spill] sm:$0xff]  ;;  %v11709_v32 = vld [vmem:[#allocation33_spill] sm:$0xff]  ;;  %v11710_v2 = vand.u32 4294901760, %v9714_v48  ;;  %v9834_v7 = vld [vmem:[#allocation8 + $0xf8] sm:$0xff] }
  0xde   :  { %v9794_v24 = vsub.f32 %v9688_v61, %v11699_v46  ;;  %v9808_v22 = vsub.f32 %v9704_v49, %v11704_v37  ;;  %v11705_v46 = vand.u32 4294901760, %v9706_v13  ;;  %1004 = vmatmul.mubr.f32.gmra.mrb[44].mxu0 %v11708_v44  ;;  %8026 = vmatprep.subr.bf16.mxu1 %v11709_v32  ;;  %v11711_v49 = vand.u32 4294901760, %v9716_v12  ;;  %11713 = vst [vmem:[#allocation168_spill] sm:$0xff] %v9834_v7  ;;  %v9836_v61 = vld [vmem:[#allocation8 + $0x70] sm:$0xff]  ;;  %v11715_v44 = vld [vmem:[#allocation98_spill] sm:$0xff] }
  0xdf   :  { %v9825_v37 = vsub.f32 %v9714_v48, %v11710_v2  ;;  %11714 = vst [vmem:[#allocation169_spill] sm:$0xff] %v9836_v61  ;;  %1010 = vmatprep.mubr.f32.mxu0 %v11715_v44  ;;  %8000 = vmatpush3.bf16.msra.mxu0 %v9519_v16  ;;  %v11716_v2 = vand.u32 4294901760, %v9732_v3  ;;  %v11719_v48 = vld [vmem:[#allocation86_spill] sm:$0xff]  ;;  %v11720_v16 = vand.u32 4294901760, %v9745_v52 }
  0xe0   :  { %v9813_v29 = vsub.f32 %v9706_v13, %v11705_v46  ;;  %v9830_v46 = vsub.f32 %v9716_v12, %v11711_v49  ;;  %1248 = vmatmul.mubr.f32.gmra.mrb[42].mxu1 %v11719_v48  ;;  %8002 = vmatprep.subr.bf16.mxu0 %v9525_v51  ;;  %v11724_v12 = vand.u32 4294901760, %v9749_v11  ;;  %v11725_v48 = vld [vmem:[#allocation97_spill] sm:$0xff]  ;;  %v11726_v51 = vld [vmem:[#allocation34_spill] sm:$0xff]  ;;  %v11730_v13 = vand.u32 4294901760, %v9785_v56 }
  0xe1   :  { %v9843_v32 = vsub.f32 %v9732_v3, %v11716_v2  ;;  %v9856_v44 = vsub.f32 %v9745_v52, %v11720_v16  ;;  %v11722_v2 = vand.u32 4294901760, %v9747_v15  ;;  %1255 = vmatprep.mubr.f32.mxu1 %v11725_v48  ;;  %8028 = vmatpush3.bf16.msra.mxu1 %v11726_v51  ;;  %v9874_v16 = vsub.f32 %v9765_v20, %v11727_v58  ;;  %v11738_v52 = vld [vmem:[#allocation39_spill] sm:$0xff] }
  0xe2   :  { %11706 = vst [vmem:[#allocation32_spill] sm:$0xff] %v9813_v29  ;;  %11712 = vst [vmem:[#allocation33_spill] sm:$0xff] %v9830_v46  ;;  %v9866_v3 = vsub.f32 %v9749_v11, %v11724_v12  ;;  %v11728_v12 = vld [vmem:[#allocation100_spill] sm:$0xff]  ;;  %v11729_v11 = vld [vmem:[#allocation35_spill] sm:$0xff]  ;;  %v9885_v51 = vsub.f32 %v9785_v56, %v11730_v13  ;;  %v11731_v48 = vand.u32 4294901760, %v9787_v4  ;;  %v11734_v56 = vand.u32 4294901760, %v9801_v5 }
  0xe3   :  { %11717 = vst [vmem:[#allocation170_spill] sm:$0xff] %v9843_v32  ;;  %11721 = vst [vmem:[#allocation172_spill] sm:$0xff] %v9856_v44  ;;  %v9861_v49 = vsub.f32 %v9747_v15, %v11722_v2  ;;  %1013 = vmatmul.mubr.f32.gmra.mrb[46].mxu0 %v11728_v12  ;;  %8030 = vmatprep.subr.bf16.mxu1 %v11729_v11  ;;  %v11732_v15 = vld [vmem:[#allocation105_spill] sm:$0xff]  ;;  %v11733_v12 = vand.u32 4294901760, %v9799_v42  ;;  %v11735_v2 = vld [vmem:[#allocation99_spill] sm:$0xff]  ;;  %v11736_v11 = vand.u32 4294901760, %v9816_v62 }
  0xe4   :  { %v9890_v58 = vsub.f32 %v9787_v4, %v11731_v48  ;;  %1019 = vmatprep.mubr.f32.mxu0 %v11732_v15  ;;  %8004 = vmatpush3.bf16.msra.mxu0 %v9531_v19  ;;  %v9906_v48 = vsub.f32 %v9801_v5, %v11734_v56  ;;  %v11737_v5 = vld [vmem:[#allocation102_spill] sm:$0xff]  ;;  %v11741_v56 = vld [vmem:[#allocation108_spill] sm:$0xff] }
  0xe5   :  { %11723 = vst [vmem:[#allocation173_spill] sm:$0xff] %v9861_v49  ;;  %v9901_v13 = vsub.f32 %v9799_v42, %v11733_v12  ;;  %1259 = vmatmul.mubr.f32.gmra.mrb[44].mxu1 %v11735_v2  ;;  %8038 = vmatprep.subr.bf16.mxu0 %v9685_v50  ;;  %v9916_v15 = vsub.f32 %v9816_v62, %v11736_v11  ;;  %v11739_v50 = vand.u32 4294901760, %v9834_v7  ;;  %v11740_v11 = vand.u32 4294901760, %v9836_v61 }
  0xe6   :  { %1266 = vmatprep.mubr.f32.mxu1 %v11737_v5  ;;  %8032 = vmatpush3.bf16.msra.mxu1 %v11738_v52  ;;  %v11742_v5 = vld [vmem:[#allocation40_spill] sm:$0xff]  ;;  %v11743_v2 = vand.u32 4294901760, %v9847_v43  ;;  %v11747_v12 = vand.u32 4294901760, %v9600_v53  ;;  %v11750_v52 = vand.u32 4294901760, %v9671_v41 }
  0xe7   :  { %v9928_v19 = vsub.f32 %v9834_v7, %v11739_v50  ;;  %v9933_v62 = vsub.f32 %v9836_v61, %v11740_v11  ;;  %1022 = vmatmul.mubr.f32.gmra.mrb[48].mxu0 %v11741_v56  ;;  %8034 = vmatprep.subr.bf16.mxu1 %v11742_v5  ;;  %v11744_v61 = vld [vmem:[#allocation111_spill] sm:$0xff]  ;;  %v11745_v56 = vld [vmem:[#allocation104_spill] sm:$0xff]  ;;  %v11749_v5 = vand.u32 4294901760, %v9661_v23  ;;  %v11753_v50 = vand.u32 4294901760, %v9695_v40 }
  0xe8   :  { %v9943_v42 = vsub.f32 %v9847_v43, %v11743_v2  ;;  %1028 = vmatprep.mubr.f32.mxu0 %v11744_v61  ;;  %v11746_v61 = vand.u32 4294901760, %v9597_v33  ;;  %v11752_v2 = vld [vmem:[#allocation110_spill] sm:$0xff]  ;;  %v11754_v11 = vand.u32 4294901760, %v9700_v14  ;;  %v11756_v33 = vand.u32 4294901760, %v9724_v10 }
  0xe9   :  { %1270 = vmatmul.mubr.f32.gmra.mrb[46].mxu1 %v11745_v56  ;;  %v9973_v7 = vpack.c.bf16 %v11750_v52, %v11749_v5  ;;  %v11374_v52 = vand.u32 4294901760, %v9741_v54  ;;  %v11760_v5 = vld [vmem:[#allocation121_spill] sm:$0xff] }
  0xea   :  { %v9967_v43 = vpack.c.bf16 %v11747_v12, %v11746_v61  ;;  %1277 = vmatprep.mubr.f32.mxu1 %v11752_v2  ;;  %8036 = vmatpush3.bf16.msra.mxu1 %v11582_v34  ;;  %v9981_v56 = vpack.c.bf16 %v11754_v11, %v11753_v50  ;;  %v11757_v61 = vand.u32 4294901760, %v9729_v36  ;;  %v11373_v34 = vand.u32 4294901760, %v9756_v35  ;;  %v11761_v11 = vld [vmem:[#allocation113_spill] sm:$0xff] }
  0xeb   :  { %11751 = vst [vmem:[#allocation35_spill] sm:$0xff] %v9973_v7  ;;  %8070 = vmatprep.subr.bf16.mxu1 %v9736_v39  ;;  %v11376_v2 = vand.u32 4294901760, %v9761_v21  ;;  %v11375_v50 = vand.u32 4294901760, %v9772_v31  ;;  %v11378_v39 = vand.u32 4294901760, %v9777_v55 }
  0xec   :  { %11748 = vst [vmem:[#allocation34_spill] sm:$0xff] %v9967_v43  ;;  %11755 = vst [vmem:[#allocation39_spill] sm:$0xff] %v9981_v56  ;;  %v9987_v12 = vpack.c.bf16 %v11757_v61, %v11756_v33  ;;  %v11759_v43 = vld [vmem:[#allocation114_spill] sm:$0xff]  ;;  %v10001_v33 = vpack.c.bf16 %v11373_v34, %v11374_v52  ;;  %v11763_v61 = vld [vmem:[#allocation116_spill] sm:$0xff]  ;;  %v11380_v56 = vand.u32 4294901760, %v9794_v24  ;;  %v11379_v34 = vand.u32 4294901760, %v9808_v22 }
  0xed   :  { %1031 = vmatmul.mubr.f32.gmra.mrb[50].mxu0 %v11759_v43  ;;  %1281 = vmatmul.mubr.f32.gmra.mrb[48].mxu1 %v11761_v11  ;;  %v11377_v43 = vand.u32 4294901760, %v9782_v6  ;;  %v11766_v11 = vld [vmem:[#allocation131_spill] sm:$0xff] }
  0xee   :  { %11758 = vst [vmem:[#allocation40_spill] sm:$0xff] %v9987_v12  ;;  %1037 = vmatprep.mubr.f32.mxu0 %v11760_v5  ;;  %11762 = vst [vmem:[#allocation174_spill] sm:$0xff] %v10001_v33  ;;  %1288 = vmatprep.mubr.f32.mxu1 %v11763_v61  ;;  %v10010_v5 = vpack.c.bf16 %v11375_v50, %v11376_v2  ;;  %v11765_v12 = vld [vmem:[#allocation123_spill] sm:$0xff]  ;;  %v11768_v61 = vld [vmem:[#allocation118_spill] sm:$0xff]  ;;  %v11382_v50 = vand.u32 4294901760, %v9813_v29  ;;  %v11381_v2 = vand.u32 4294901760, %v9825_v37 }
  0xef   :  { %v10020_v52 = vpack.c.bf16 %v11377_v43, %v11378_v39  ;;  %v11769_v33 = vld [vmem:[#allocation128_spill] sm:$0xff]  ;;  %v11384_v43 = vand.u32 4294901760, %v9830_v46  ;;  %v11383_v39 = vand.u32 4294901760, %v9843_v32 }
  0xf0   :  { %11764 = vst [vmem:[#allocation175_spill] sm:$0xff] %v10010_v5  ;;  %v11772_v5 = vld [vmem:[#allocation135_spill] sm:$0xff] }
  0xf1   :  { %1040 = vmatmul.mubr.f32.gmra.mrb[52].mxu0 %v11765_v12  ;;  %11767 = vst [vmem:[#allocation176_spill] sm:$0xff] %v10020_v52  ;;  %1292 = vmatmul.mubr.f32.gmra.mrb[50].mxu1 %v11768_v61  ;;  %v10030_v12 = vpack.c.bf16 %v11379_v34, %v11380_v56  ;;  %v10040_v61 = vpack.c.bf16 %v11381_v2, %v11382_v50  ;;  %v11775_v52 = vld [vmem:[#allocation140_spill] sm:$0xff]  ;;  %v11387_v34 = vand.u32 4294901760, %v9856_v44  ;;  %v11386_v56 = vand.u32 4294901760, %v9861_v49 }
  0xf2   :  { %1046 = vmatprep.mubr.f32.mxu0 %v11766_v11  ;;  %1299 = vmatprep.mubr.f32.mxu1 %v11769_v33  ;;  %v11771_v11 = vld [vmem:[#allocation132_spill] sm:$0xff]  ;;  %v11774_v33 = vld [vmem:[#allocation129_spill] sm:$0xff]  ;;  %v11389_v2 = vand.u32 4294901760, %v9866_v3  ;;  %v11388_v50 = vand.u32 4294901760, %v9874_v16 }
  0xf3   :  { %11770 = vst [vmem:[#allocation177_spill] sm:$0xff] %v10030_v12  ;;  %11773 = vst [vmem:[#allocation178_spill] sm:$0xff] %v10040_v61  ;;  %v11780_v61 = vld [vmem:[#allocation143_spill] sm:$0xff] }
  0xf5   :  { %1049 = vmatmul.mubr.f32.gmra.mrb[54].mxu0 %v11771_v11  ;;  %1303 = vmatmul.mubr.f32.gmra.mrb[52].mxu1 %v11774_v33  ;;  %v11777_v11 = vld [vmem:[#allocation136_spill] sm:$0xff]  ;;  %v10060_v33 = vpack.c.bf16 %v11386_v56, %v11387_v34  ;;  %v11394_v56 = vand.u32 4294901760, %v9901_v13  ;;  %v11393_v34 = vand.u32 4294901760, %v9906_v48 }
  0xf6   :  { %1055 = vmatprep.mubr.f32.mxu0 %v11772_v5  ;;  %1310 = vmatprep.mubr.f32.mxu1 %v11775_v52  ;;  %v10050_v5 = vpack.c.bf16 %v11383_v39, %v11384_v43  ;;  %v11779_v52 = vld [vmem:[#allocation134_spill] sm:$0xff]  ;;  %v11391_v39 = vand.u32 4294901760, %v9885_v51  ;;  %v11390_v43 = vand.u32 4294901760, %v9890_v58 }
  0xf7   :  { %11778 = vst [vmem:[#allocation180_spill] sm:$0xff] %v10060_v33 }
  0xf8   :  { %11776 = vst [vmem:[#allocation179_spill] sm:$0xff] %v10050_v5  ;;  %v11812_v5 = vld [vmem:[#allocation52_spill] sm:$0xff] }
  0xf9   :  { %1058 = vmatmul.mubr.f32.gmra.mrb[56].mxu0 %v11777_v11  ;;  %1314 = vmatmul.mubr.f32.gmra.mrb[54].mxu1 %v11779_v52  ;;  %v10070_v11 = vpack.c.bf16 %v11388_v50, %v11389_v2  ;;  %v11784_v52 = vld [vmem:[#allocation141_spill] sm:$0xff]  ;;  %v11399_v50 = vand.u32 4294901760, %v9916_v15  ;;  %v11398_v2 = vand.u32 4294901760, %v9928_v19 }
  0xfa   :  { %1064 = vmatprep.mubr.f32.mxu0 %v9396_v45  ;;  %1321 = vmatprep.mubr.f32.mxu1 %v11780_v61  ;;  %v11782_v45 = vld [vmem:[#allocation37_spill] sm:$0xff]  ;;  %v10080_v61 = vpack.c.bf16 %v11390_v43, %v11391_v39  ;;  %v11790_v39 = vand.u32 4294901760, %v9933_v62 }
  0xfb   :  { %11781 = vst [vmem:[#allocation181_spill] sm:$0xff] %v10070_v11 }
  0xfc   :  { %11783 = vst [vmem:[#allocation182_spill] sm:$0xff] %v10080_v61  ;;  %v11805_v61 = vld [vmem:[#allocation44_spill] sm:$0xff] }
  0xfd   :  { %1067 = vmatmul.mubr.f32.gmra.mrb[58].mxu0 %v11782_v45  ;;  %1325 = vmatmul.mubr.f32.gmra.mrb[56].mxu1 %v11784_v52  ;;  %v10090_v45 = vpack.c.bf16 %v11393_v34, %v11394_v56  ;;  %v10100_v52 = vpack.c.bf16 %v11398_v2, %v11399_v50  ;;  %v11788_v34 = vand.u32 4294901760, %v9661_v23  ;;  %v11793_v2 = vand.u32 4294901760, %v9695_v40 }
  0xfe   :  { %1073 = vmatprep.mubr.f32.mxu0 %v9453_v27  ;;  %1332 = vmatprep.mubr.f32.mxu1 %v9431_v30  ;;  %v11787_v30 = vld [vmem:[#allocation38_spill] sm:$0xff] }
  0xff   :  { %11785 = vst [vmem:[#allocation183_spill] sm:$0xff] %v10090_v45  ;;  %11786 = vst [vmem:[#allocation184_spill] sm:$0xff] %v10100_v52  ;;  %v2000_v56 = vsub.f32 %v9661_v23, %v11788_v34  ;;  %v2126_v50 = vsub.f32 %v9695_v40, %v11793_v2  ;;  %v11797_v52 = vand.u32 4294901760, %v9617_v1  ;;  %v11800_v2 = vand.u32 4294901760, %v9724_v10 }
 0x101   :  { %1076 = vmatmul.mubr.f32.gmra.mrb[60].mxu0 %v9422_v60  ;;  %1336 = vmatmul.mubr.f32.gmra.mrb[58].mxu1 %v11787_v30  ;;  %v11789_v60 = vand.u32 4294901760, %v9671_v41  ;;  %v11794_v30 = vand.u32 4294901760, %v9700_v14  ;;  %v2001_v1 = vand.u32 4294901760, %v2000_v56 }
 0x102   :  { %1082 = vmatprep.mubr.f32.mxu0 %v9485_v17  ;;  %1343 = vmatprep.mubr.f32.mxu1 %v9480_v25  ;;  %v11791_v17 = vand.u32 4294901760, %v9943_v42  ;;  %v11795_v25 = vld [vmem:[#allocation43_spill] sm:$0xff] }
 0x103   :  { %v2007_v43 = vsub.f32 %v9671_v41, %v11789_v60  ;;  %v2133_v34 = vsub.f32 %v9700_v14, %v11794_v30  ;;  %v11796_v60 = vand.u32 4294901760, %v9613_v59  ;;  %v2014_v30 = vsub.f32 %v9724_v10, %v11800_v2 }
 0x104   :  { %v10114_v27 = vpack.c.bf16 %v11791_v17, %v11790_v39  ;;  %v11798_v17 = vand.u32 4294901760, %v9629_v18  ;;  %v11799_v39 = vand.u32 4294901760, %v9631_v28  ;;  %v11803_v28 = vand.u32 4294901760, %v9756_v35 }
 0x105   :  { %1085 = vmatmul.mubr.f32.gmra.mrb[62].mxu0 %v9446_v63  ;;  %v10128_v45 = vpack.c.bf16 %v11797_v52, %v11796_v60  ;;  %1347 = vmatmul.mubr.f32.gmra.mrb[60].mxu1 %v9443_v8  ;;  %v2008_v52 = vand.u32 4294901760, %v2007_v43  ;;  %v11802_v60 = vand.u32 4294901760, %v9741_v54  ;;  %v2127_v8 = vand.u32 4294901760, %v2126_v50 }
 0x106   :  { %11792 = vst [vmem:[#allocation185_spill] sm:$0xff] %v10114_v27  ;;  %1524 = vmatprep.mubr.f32.mxu0 %v11795_v25  ;;  %v10135_v63 = vpack.c.bf16 %v11799_v39, %v11798_v17  ;;  %v11801_v27 = vand.u32 4294901760, %v9729_v36  ;;  %1354 = vmatprep.mubr.f32.mxu1 %v9542_v38  ;;  %v2147_v17 = vsub.f32 %v9756_v35, %v11803_v28  ;;  %v11804_v39 = vld [vmem:[#allocation45_spill] sm:$0xff]  ;;  %v2134_v2 = vand.u32 4294901760, %v2133_v34 }
 0x107   :  { %v2140_v18 = vsub.f32 %v9741_v54, %v11802_v60  ;;  %v11807_v43 = vand.u32 4294901760, %v9649_v47  ;;  %v11808_v60 = vand.u32 4294901760, %v9761_v21  ;;  %v11809_v28 = vand.u32 4294901760, %v9772_v31 }
 0x108   :  { %v2021_v59 = vsub.f32 %v9729_v36, %v11801_v27  ;;  %v11806_v27 = vand.u32 4294901760, %v9647_v9  ;;  %v2015_v50 = vand.u32 4294901760, %v2014_v30  ;;  %v11810_v9 = vand.u32 4294901760, %v9655_v57 }
 0x109   :  { %1526 = vmatmul.mubr.f32.vlgmr.msra.gmra.mrb[64].mxu0 %v11804_v39  ;;  %v2028_v38 = vsub.f32 %v9761_v21, %v11808_v60  ;;  %v2035_v11 = vsub.f32 %v9772_v31, %v11809_v28  ;;  %1358 = vmatmul.mubr.f32.gmra.mrb[62].mxu1 %v9467_v26  ;;  %v11811_v47 = vand.u32 4294901760, %v9663_v0  ;;  %v2141_v60 = vand.u32 4294901760, %v2140_v18  ;;  %v11816_v0 = vld [vmem:[#allocation17_spill] sm:$0xff] }
 0x10a   :  { %1531 = vmatprep.mubr.f32.mxu0 %v11805_v61  ;;  %8040 = vmatpush3.bf16.msra.mxu0 %v10128_v45  ;;  %v10157_v56 = vpack.c.bf16 %v11807_v43, %v11806_v27  ;;  %v2022_v34 = vand.u32 4294901760, %v2021_v59  ;;  %v8071_v43 = vpack.c.bf16 %v2008_v52, %v2001_v1  ;;  %v2148_v33 = vand.u32 4294901760, %v2147_v17  ;;  %v11815_v59 = vld [vmem:[#allocation58_spill] sm:$0xff]  ;;  %v11818_v1 = vld [vmem:[#allocation19_spill] sm:$0xff] }
 0x10b   :  { %8042 = vmatprep.subr.bf16.mxu0 %v10135_v63  ;;  %v10171_v27 = vpack.c.bf16 %v11811_v47, %v11810_v9  ;;  %1733 = vmatprep.mubr.f32.mxu1 %v11795_v25  ;;  %v8073_v28 = vpack.c.bf16 %v2134_v2, %v2127_v8  ;;  %v11813_v26 = vand.u32 4294901760, %v9777_v55  ;;  %v11814_v30 = vand.u32 4294901760, %v9782_v6 }
 0x10c   :  { %v11817_v9 = vand.u32 4294901760, %v11816_v0  ;;  %v11819_v52 = vand.u32 4294901760, %v11818_v1  ;;  %v2029_v17 = vand.u32 4294901760, %v2028_v38  ;;  %v2036_v8 = vand.u32 4294901760, %v2035_v11 }
 0x10d   :  { %1533 = vmatmul.mubr.f32.gmra.mrb[66].mxu0 %v11812_v5  ;;  %v2154_v12 = vsub.f32 %v9777_v55, %v11813_v26  ;;  %v2161_v57 = vsub.f32 %v9782_v6, %v11814_v30  ;;  %1735 = vmatmul.mubr.f32.vlgmr.msra.gmra.mrb[64].mxu1 %v11804_v39  ;;  %v8075_v2 = vpack.c.bf16 %v2022_v34, %v2015_v50  ;;  %v11820_v26 = vld [vmem:[#allocation20_spill] sm:$0xff]  ;;  %v11822_v30 = vld [vmem:[#allocation15_spill] sm:$0xff]  ;;  %v11826_v11 = vand.u32 4294901760, %v9808_v22 }
 0x10e   :  { %1538 = vmatprep.mubr.f32.mxu0 %v11815_v59  ;;  %8044 = vmatpush3.bf16.msra.mxu0 %v10157_v56  ;;  %v10187_v18 = vpack.c.bf16 %v11819_v52, %v11817_v9  ;;  %v11821_v47 = vand.u32 4294901760, %v11820_v26  ;;  %v11823_v25 = vand.u32 4294901760, %v11822_v30  ;;  %v8077_v0 = vpack.c.bf16 %v2148_v33, %v2141_v60  ;;  %v11827_v34 = vld [vmem:[#allocation59_spill] sm:$0xff]  ;;  %v11830_v60 = vld [vmem:[#allocation60_spill] sm:$0xff] }
 0x10f   :  { %8046 = vmatprep.subr.bf16.mxu0 %v10171_v27  ;;  %8072 = vmatpush3.bf16.msra.mxu1 %v8071_v43  ;;  %v11825_v9 = vand.u32 4294901760, %v9794_v24  ;;  %v2049_v50 = vsub.f32 %v9808_v22, %v11826_v11  ;;  %v2155_v1 = vand.u32 4294901760, %v2154_v12  ;;  %v2162_v52 = vand.u32 4294901760, %v2161_v57  ;;  %v11831_v30 = vld [vmem:[#allocation28_spill] sm:$0xff]  ;;  %v11833_v11 = vld [vmem:[#allocation30_spill] sm:$0xff]  ;;  %v11835_v12 = vld [vmem:[#allocation31_spill] sm:$0xff] }
 0x110   :  { %v10195_v7 = vpack.c.bf16 %v11823_v25, %v11821_v47  ;;  %1740 = vmatprep.mubr.f32.mxu1 %v11805_v61  ;;  %8074 = vmatprep.subr.bf16.mxu1 %v8073_v28  ;;  %v11828_v25 = vand.u32 4294901760, %v9813_v29  ;;  %v11829_v26 = vand.u32 4294901760, %v9825_v37  ;;  %v8079_v47 = vpack.c.bf16 %v2036_v8, %v2029_v17 }
 0x111   :  { %v2042_v38 = vsub.f32 %v9794_v24, %v11825_v9  ;;  %1540 = vmatmul.mubr.f32.gmra.mrb[68].mxu0 %v11827_v34  ;;  %v11832_v9 = vand.u32 4294901760, %v11831_v30  ;;  %v11834_v39 = vand.u32 4294901760, %v11833_v11  ;;  %1742 = vmatmul.mubr.f32.gmra.mrb[66].mxu1 %v11812_v5  ;;  %v11836_v57 = vand.u32 4294901760, %v11835_v12 }
 0x112   :  { %11824 = vst [vmem:[#allocation17_spill] sm:$0xff] %v10195_v7  ;;  %v2168_v43 = vsub.f32 %v9813_v29, %v11828_v25  ;;  %v2175_v33 = vsub.f32 %v9825_v37, %v11829_v26  ;;  %1545 = vmatprep.mubr.f32.mxu0 %v11830_v60  ;;  %8048 = vmatpush3.bf16.msra.mxu0 %v10187_v18  ;;  %v11837_v25 = vld [vmem:[#allocation18_spill] sm:$0xff]  ;;  %v11839_v29 = vand.u32 4294901760, %v9830_v46  ;;  %v11840_v8 = vand.u32 4294901760, %v9843_v32 }
 0x113   :  { %v10217_v28 = vpack.c.bf16 %v11834_v39, %v11832_v9  ;;  %8050 = vmatprep.subr.bf16.mxu0 %v10195_v7  ;;  %v11838_v61 = vand.u32 4294901760, %v11837_v25  ;;  %1747 = vmatprep.mubr.f32.mxu1 %v11815_v59  ;;  %v2043_v39 = vand.u32 4294901760, %v2042_v38  ;;  %v2050_v9 = vand.u32 4294901760, %v2049_v50  ;;  %v11843_v25 = vld [vmem:[#allocation63_spill] sm:$0xff]  ;;  %v11847_v50 = vld [vmem:[#allocation24_spill] sm:$0xff]  ;;  %v11851_v7 = vld [vmem:[#allocation26_spill] sm:$0xff] }
 0x114   :  { %v2056_v17 = vsub.f32 %v9830_v46, %v11839_v29  ;;  %v2063_v30 = vsub.f32 %v9843_v32, %v11840_v8  ;;  %8076 = vmatpush3.bf16.msra.mxu1 %v8075_v2  ;;  %v11841_v11 = vand.u32 4294901760, %v9856_v44  ;;  %v8081_v29 = vpack.c.bf16 %v2162_v52, %v2155_v1  ;;  %v11844_v8 = vld [vmem:[#allocation70_spill] sm:$0xff]  ;;  %v11845_v2 = vld [vmem:[#allocation23_spill] sm:$0xff] }
 0x115   :  { %v10225_v26 = vpack.c.bf16 %v11838_v61, %v11836_v57  ;;  %v11842_v61 = vand.u32 4294901760, %v9861_v49  ;;  %1547 = vmatmul.mubr.f32.gmra.mrb[70].mxu0 %v11843_v25  ;;  %8078 = vmatprep.subr.bf16.mxu1 %v8077_v0  ;;  %v2169_v5 = vand.u32 4294901760, %v2168_v43  ;;  %v2176_v46 = vand.u32 4294901760, %v2175_v33 }
 0x116   :  { %v2182_v12 = vsub.f32 %v9856_v44, %v11841_v11  ;;  %1552 = vmatprep.mubr.f32.mxu0 %v11844_v8  ;;  %8052 = vmatpush3.bf16.msra.mxu0 %v10217_v28  ;;  %v11846_v38 = vand.u32 4294901760, %v11845_v2  ;;  %v11848_v59 = vand.u32 4294901760, %v11847_v50  ;;  %v11849_v11 = vld [vmem:[#allocation25_spill] sm:$0xff]  ;;  %v2057_v0 = vand.u32 4294901760, %v2056_v17 }
 0x117   :  { %v2189_v57 = vsub.f32 %v9861_v49, %v11842_v61  ;;  %v11850_v44 = vand.u32 4294901760, %v11849_v11  ;;  %v11852_v61 = vand.u32 4294901760, %v11851_v7  ;;  %1749 = vmatmul.mubr.f32.gmra.mrb[68].mxu1 %v11827_v34  ;;  %8054 = vmatprep.subr.bf16.mxu0 %v10225_v26  ;;  %v2064_v1 = vand.u32 4294901760, %v2063_v30 }
 0x118   :  { %v10247_v32 = vpack.c.bf16 %v11848_v59, %v11846_v38  ;;  %v11853_v52 = vand.u32 4294901760, %v9866_v3  ;;  %v11854_v33 = vand.u32 4294901760, %v9874_v16  ;;  %1754 = vmatprep.mubr.f32.mxu1 %v11830_v60  ;;  %8080 = vmatpush3.bf16.msra.mxu1 %v8079_v47  ;;  %v8083_v7 = vpack.c.bf16 %v2050_v9, %v2043_v39  ;;  %v11855_v38 = vld [vmem:[#allocation72_spill] sm:$0xff] }
 0x119   :  { %v10253_v49 = vpack.c.bf16 %v11852_v61, %v11850_v44  ;;  %v2183_v44 = vand.u32 4294901760, %v2182_v12  ;;  %v2190_v2 = vand.u32 4294901760, %v2189_v57  ;;  %1554 = vmatmul.mubr.f32.gmra.mrb[72].mxu0 %v11855_v38  ;;  %8082 = vmatprep.subr.bf16.mxu1 %v8081_v29  ;;  %v8085_v50 = vpack.c.bf16 %v2176_v46, %v2169_v5  ;;  %v11859_v47 = vld [vmem:[#allocation164_spill] sm:$0xff]  ;;  %v11862_v29 = vld [vmem:[#allocation29_spill] sm:$0xff] }
 0x11a   :  { %v2070_v43 = vsub.f32 %v9866_v3, %v11853_v52  ;;  %v2077_v59 = vsub.f32 %v9874_v16, %v11854_v33  ;;  %v11856_v17 = vand.u32 4294901760, %v9885_v51  ;;  %v11857_v11 = vand.u32 4294901760, %v9890_v58  ;;  %v11858_v52 = vld [vmem:[#allocation73_spill] sm:$0xff]  ;;  %8056 = vmatpush3.bf16.msra.mxu0 %v10247_v32 }
 0x11b   :  { %1559 = vmatprep.mubr.f32.mxu0 %v11858_v52  ;;  %v11860_v39 = vand.u32 4294901760, %v11859_v47  ;;  %v11861_v9 = vand.u32 4294901760, %v9765_v20  ;;  %1756 = vmatmul.mubr.f32.gmra.mrb[70].mxu1 %v11843_v25  ;;  %v8087_v46 = vpack.c.bf16 %v2064_v1, %v2057_v0  ;;  %v11863_v33 = vand.u32 4294901760, %v11862_v29 }
 0x11c   :  { %v2196_v30 = vsub.f32 %v9885_v51, %v11856_v17  ;;  %v2203_v61 = vsub.f32 %v9890_v58, %v11857_v11  ;;  %8058 = vmatprep.subr.bf16.mxu0 %v10253_v49  ;;  %v2071_v5 = vand.u32 4294901760, %v2070_v43  ;;  %v2078_v57 = vand.u32 4294901760, %v2077_v59  ;;  %1761 = vmatprep.mubr.f32.mxu1 %v11844_v8  ;;  %v11867_v43 = vld [vmem:[#allocation75_spill] sm:$0xff] }
 0x11d   :  { %v10277_v12 = vpack.c.bf16 %v11861_v9, %v11860_v39  ;;  %v11864_v17 = vand.u32 4294901760, %v9787_v4  ;;  %8084 = vmatpush3.bf16.msra.mxu1 %v8083_v7  ;;  %v8089_v47 = vpack.c.bf16 %v2190_v2, %v2183_v44  ;;  %v11865_v20 = vand.u32 4294901760, %v9901_v13  ;;  %1561 = vmatmul.mubr.f32.gmra.mrb[74].mxu0 %v11867_v43  ;;  %v11870_v2 = vld [vmem:[#allocation87_spill] sm:$0xff] }
 0x11e   :  { %v11866_v0 = vand.u32 4294901760, %v9906_v48  ;;  %8086 = vmatprep.subr.bf16.mxu1 %v8085_v50  ;;  %v2197_v59 = vand.u32 4294901760, %v2196_v30  ;;  %v2204_v9 = vand.u32 4294901760, %v2203_v61  ;;  %v11868_v4 = vand.u32 4294901760, %v9916_v15  ;;  %1566 = vmatprep.mubr.f32.mxu0 %v11870_v2  ;;  %v11875_v30 = vld [vmem:[#allocation167_spill] sm:$0xff] }
 0x11f   :  { %v10285_v11 = vpack.c.bf16 %v11864_v17, %v11863_v33  ;;  %v2084_v39 = vsub.f32 %v9901_v13, %v11865_v20  ;;  %v11869_v7 = vand.u32 4294901760, %v9928_v19  ;;  %8060 = vmatpush3.bf16.msra.mxu0 %v10277_v12  ;;  %v11871_v33 = vld [vmem:[#allocation165_spill] sm:$0xff]  ;;  %v11873_v20 = vld [vmem:[#allocation166_spill] sm:$0xff]  ;;  %1763 = vmatmul.mubr.f32.gmra.mrb[72].mxu1 %v11855_v38  ;;  %v8091_v50 = vpack.c.bf16 %v2078_v57, %v2071_v5  ;;  %v11881_v57 = vld [vmem:[#allocation88_spill] sm:$0xff] }
 0x120   :  { %v2091_v1 = vsub.f32 %v9906_v48, %v11866_v0  ;;  %v2210_v29 = vsub.f32 %v9916_v15, %v11868_v4  ;;  %v11872_v17 = vand.u32 4294901760, %v11871_v33  ;;  %v11874_v0 = vand.u32 4294901760, %v11873_v20  ;;  %v11877_v4 = vld [vmem:[#allocation168_spill] sm:$0xff]  ;;  %1768 = vmatprep.mubr.f32.mxu1 %v11858_v52 }
 0x121   :  { %v2217_v44 = vsub.f32 %v9928_v19, %v11869_v7  ;;  %8062 = vmatprep.subr.bf16.mxu0 %v10285_v11  ;;  %v11876_v61 = vand.u32 4294901760, %v11875_v30  ;;  %v11878_v25 = vand.u32 4294901760, %v11877_v4  ;;  %8088 = vmatpush3.bf16.msra.mxu1 %v8087_v46  ;;  %v2085_v34 = vand.u32 4294901760, %v2084_v39  ;;  %v11883_v46 = vld [vmem:[#allocation169_spill] sm:$0xff] }
 0x122   :  { %v10307_v8 = vpack.c.bf16 %v11874_v0, %v11872_v17  ;;  %v2092_v33 = vand.u32 4294901760, %v2091_v1  ;;  %v11879_v20 = vand.u32 4294901760, %v9933_v62  ;;  %v11880_v0 = vand.u32 4294901760, %v9943_v42  ;;  %1568 = vmatmul.mubr.f32.gmra.mrb[76].mxu0 %v11881_v57  ;;  %8090 = vmatprep.subr.bf16.mxu1 %v8089_v47  ;;  %v11885_v1 = vld [vmem:[#allocation171_spill] sm:$0xff] }
 0x123   :  { %v10315_v7 = vpack.c.bf16 %v11878_v25, %v11876_v61  ;;  %v8093_v30 = vpack.c.bf16 %v2204_v9, %v2197_v59  ;;  %v2211_v4 = vand.u32 4294901760, %v2210_v29  ;;  %v2218_v25 = vand.u32 4294901760, %v2217_v44  ;;  %v11882_v61 = vld [vmem:[#allocation91_spill] sm:$0xff]  ;;  %1770 = vmatmul.mubr.f32.gmra.mrb[74].mxu1 %v11867_v43 }
 0x124   :  { %v2098_v17 = vsub.f32 %v9933_v62, %v11879_v20  ;;  %v2105_v5 = vsub.f32 %v9943_v42, %v11880_v0  ;;  %1573 = vmatprep.mubr.f32.mxu0 %v11882_v61  ;;  %8064 = vmatpush3.bf16.msra.mxu0 %v10307_v8  ;;  %v11884_v39 = vand.u32 4294901760, %v11883_v46  ;;  %v11886_v38 = vand.u32 4294901760, %v11885_v1  ;;  %v11887_v29 = vld [vmem:[#allocation95_spill] sm:$0xff]  ;;  %v11888_v20 = vld [vmem:[#allocation101_spill] sm:$0xff]  ;;  %v11898_v1 = vld [vmem:[#allocation126_spill] sm:$0xff] }
 0x125   :  { %8066 = vmatprep.subr.bf16.mxu0 %v10315_v7  ;;  %1775 = vmatprep.mubr.f32.mxu1 %v11870_v2  ;;  %v8095_v47 = vpack.c.bf16 %v2092_v33, %v2085_v34  ;;  %v8097_v44 = vpack.c.bf16 %v2218_v25, %v2211_v4  ;;  %v11892_v33 = vld [vmem:[#allocation106_spill] sm:$0xff]  ;;  %v11896_v4 = vld [vmem:[#allocation119_spill] sm:$0xff]  ;;  %v11897_v25 = vld [vmem:[#allocation124_spill] sm:$0xff] }
 0x126   :  { %v10331_v52 = vpack.c.bf16 %v11886_v38, %v11884_v39  ;;  %8092 = vmatpush3.bf16.msra.mxu1 %v8091_v50  ;;  %v2099_v59 = vand.u32 4294901760, %v2098_v17  ;;  %v2106_v9 = vand.u32 4294901760, %v2105_v5  ;;  %1575 = vmatmul.mubr.f32.gmra.mrb[78].mxu0 %v11887_v29  ;;  %v11889_v38 = vld [vmem:[#allocation16_spill] sm:$0xff]  ;;  %v11891_v50 = vld [vmem:[#allocation103_spill] sm:$0xff]  ;;  %v11893_v17 = vld [vmem:[#allocation109_spill] sm:$0xff] }
 0x127   :  { %8094 = vmatprep.subr.bf16.mxu1 %v8093_v30  ;;  %1580 = vmatprep.mubr.f32.mxu0 %v11888_v20  ;;  %v11890_v0 = vpack.c.bf16 %v9600_v53, %v11889_v38  ;;  %v11894_v5 = vld [vmem:[#allocation27_spill] sm:$0xff]  ;;  %v11895_v53 = vld [vmem:[#allocation117_spill] sm:$0xff]  ;;  %v110_v30 = vld [vmem:[#allocation5 + $0x8] sm:$0xff] }
 0x128   :  { %8068 = vmatpush3.bf16.msra.mxu0 %v10331_v52  ;;  %1777 = vmatmul.mubr.f32.gmra.mrb[76].mxu1 %v11881_v57  ;;  %v8099_v34 = vpack.c.bf16 %v2106_v9, %v2099_v59  ;;  %v10355_v46 = vand.u32 4294901760, %v110_v30  ;;  %v109_v39 = vld [vmem:[#allocation5] sm:$0xff]  ;;  %v11899_v59 = vld [vmem:[#allocation130_spill] sm:$0xff] }
 0x129   :  { %8102 = vmatprep.subr.bf16.mxu0 %v11890_v0  ;;  %1782 = vmatprep.mubr.f32.mxu1 %v11882_v61  ;;  %v11901_v0 = vld [vmem:[#allocation137_spill] sm:$0xff] }
 0x12a   :  { %8096 = vmatpush3.bf16.msra.mxu1 %v8095_v47  ;;  %1582 = vmatmul.mubr.f32.gmra.mrb[80].mxu0 %v11891_v50  ;;  %v10360_v47 = vand.u32 4294901760, %v109_v39  ;;  %v1981_v9 = vsub.f32 %v110_v30, %v10355_v46 }
 0x12b   :  { %8098 = vmatprep.subr.bf16.mxu1 %v8097_v44  ;;  %1587 = vmatprep.mubr.f32.mxu0 %v11892_v33  ;;  %v11900_v44 = vld [vmem:[#allocation133_spill] sm:$0xff] }
 0x12c   :  { %1784 = vmatmul.mubr.f32.gmra.mrb[78].mxu1 %v11887_v29  ;;  %v10368_v38 = vsub.f32 %v109_v39, %v10360_v47  ;;  %v11904_v39 = vld [vmem:[#allocation145_spill] sm:$0xff] }
 0x12d   :  { %1789 = vmatprep.mubr.f32.mxu1 %v11888_v20 }
 0x12e   :  { %8100 = vmatpush3.bf16.msra.mxu1 %v8099_v34  ;;  %1589 = vmatmul.mubr.f32.gmra.mrb[82].mxu0 %v11893_v17  ;;  %v1982_v34 = vand.u32 4294901760, %v1981_v9  ;;  %v1988_v30 = vand.u32 4294901760, %v10368_v38 }
 0x12f   :  { %8134 = vmatprep.subr.bf16.mxu1 %v11894_v5  ;;  %1594 = vmatprep.mubr.f32.mxu0 %v11895_v53 }
 0x130   :  { %1791 = vmatmul.mubr.f32.gmra.mrb[80].mxu1 %v11891_v50  ;;  %v11903_v50 = vld [vmem:[#allocation147_spill] sm:$0xff] }
 0x131   :  { %1796 = vmatprep.mubr.f32.mxu1 %v11892_v33 }
 0x132   :  { %1596 = vmatmul.mubr.f32.gmra.mrb[84].mxu0 %v11896_v4 }
 0x133   :  { %1601 = vmatprep.mubr.f32.mxu0 %v11897_v25 }
 0x134   :  { %1798 = vmatmul.mubr.f32.gmra.mrb[82].mxu1 %v11893_v17  ;;  %v11902_v17 = vld [vmem:[#allocation139_spill] sm:$0xff] }
 0x135   :  { %1803 = vmatprep.mubr.f32.mxu1 %v11895_v53  ;;  %v11906_v53 = vld [vmem:[#allocation149_spill] sm:$0xff] }
 0x136   :  { %1603 = vmatmul.mubr.f32.gmra.mrb[86].mxu0 %v11898_v1 }
 0x137   :  { %1608 = vmatprep.mubr.f32.mxu0 %v11899_v59 }
 0x138   :  { %1805 = vmatmul.mubr.f32.gmra.mrb[84].mxu1 %v11896_v4  ;;  %v1983_v4 = vsub.f32 %v1981_v9, %v1982_v34 }
 0x139   :  { %1810 = vmatprep.mubr.f32.mxu1 %v11897_v25  ;;  %v1989_v25 = vsub.f32 %v10368_v38, %v1988_v30 }
 0x13a   :  { %1610 = vmatmul.mubr.f32.gmra.mrb[88].mxu0 %v11900_v44 }
 0x13b   :  { %1615 = vmatprep.mubr.f32.mxu0 %v11901_v0  ;;  %v1990_v33 = vand.u32 4294901760, %v1989_v25  ;;  %v11909_v25 = vpack.c.bf16 %v9729_v36, %v9724_v10  ;;  %v11914_v36 = vld [vmem:[#allocation32_spill] sm:$0xff]  ;;  %v11916_v10 = vld [vmem:[#allocation17_spill] sm:$0xff] }
 0x13c   :  { %1812 = vmatmul.mubr.f32.gmra.mrb[86].mxu1 %v11898_v1  ;;  %v11905_v1 = vld [vmem:[#allocation155_spill] sm:$0xff] }
 0x13d   :  { %1817 = vmatprep.mubr.f32.mxu1 %v11899_v59  ;;  %v1984_v59 = vand.u32 4294901760, %v1983_v4  ;;  %v11908_v4 = vpack.c.bf16 %v9700_v14, %v9695_v40  ;;  %v11911_v40 = vpack.c.bf16 %v9772_v31, %v9761_v21  ;;  %v11915_v14 = vpack.c.bf16 %v9825_v37, %v11914_v36  ;;  %v11928_v36 = vld [vmem:[#allocation34_spill] sm:$0xff] }
 0x13e   :  { %1617 = vmatmul.mubr.f32.gmra.mrb[90].mxu0 %v11902_v17 }
 0x13f   :  { %1622 = vmatprep.mubr.f32.mxu0 %v11903_v50 }
 0x140   :  { %1819 = vmatmul.mubr.f32.gmra.mrb[88].mxu1 %v11900_v44  ;;  %v11907_v44 = vpack.c.bf16 %v9671_v41, %v9661_v23  ;;  %v11912_v41 = vpack.c.bf16 %v9782_v6, %v9777_v55  ;;  %v11913_v23 = vpack.c.bf16 %v9808_v22, %v9794_v24  ;;  %v11917_v6 = vld [vmem:[#allocation170_spill] sm:$0xff]  ;;  %v11923_v24 = vpack.c.bf16 %v9874_v16, %v9866_v3 }
 0x141   :  { %1824 = vmatprep.mubr.f32.mxu1 %v11901_v0 }
 0x142   :  { %1624 = vmatmul.mubr.f32.gmra.mrb[92].mxu0 %v11904_v39 }
 0x143   :  { %1629 = vmatprep.mubr.f32.mxu0 %v11905_v1 }
 0x144   :  { %1826 = vmatmul.mubr.f32.gmra.mrb[90].mxu1 %v11902_v17 }
 0x145   :  { %1831 = vmatprep.mubr.f32.mxu1 %v11903_v50 }
 0x146   :  { %1631 = vmatmul.mubr.f32.gmra.mrb[94].mxu0 %v11906_v53 }
 0x147   :  { %1985 = vmatprep.mubr.f32.mxu0 %v1984_v59  ;;  %v11920_v59 = vld [vmem:[#allocation173_spill] sm:$0xff] }
 0x148   :  { %1833 = vmatmul.mubr.f32.gmra.mrb[92].mxu1 %v11904_v39 }
 0x149   :  { %1838 = vmatprep.mubr.f32.mxu1 %v11905_v1 }
 0x14a   :  { %1991 = vmatmul.mubr.f32.vlgmr.msra.gmra.mrb[96].mxu0 %v1990_v33  ;;  %v11910_v33 = vpack.c.bf16 %v9756_v35, %v9741_v54  ;;  %v11918_v35 = vld [vmem:[#allocation33_spill] sm:$0xff] }
 0x14b   :  { %8104 = vmatpush3.bf16.msra.mxu0 %v11907_v44  ;;  %2358 = vmatprep.mubr.f32.mxu0 %v1981_v9  ;;  %v11919_v31 = vpack.c.bf16 %v11917_v6, %v11918_v35  ;;  %v11921_v9 = vld [vmem:[#allocation172_spill] sm:$0xff]  ;;  %v11929_v6 = vld [vmem:[#allocation35_spill] sm:$0xff] }
 0x14c   :  { %8106 = vmatprep.subr.bf16.mxu0 %v11908_v4  ;;  %1840 = vmatmul.mubr.f32.gmra.mrb[94].mxu1 %v11906_v53  ;;  %v11922_v44 = vpack.c.bf16 %v11920_v59, %v11921_v9  ;;  %v11930_v35 = vld [vmem:[#allocation39_spill] sm:$0xff] }
 0x14d   :  { %2221 = vmatprep.mubr.f32.mxu1 %v10355_v46 }
 0x14f   :  { %8108 = vmatpush3.bf16.msra.mxu0 %v11909_v25  ;;  %v11925_v25 = vpack.c.bf16 %v9906_v48, %v9901_v13 }
 0x150   :  { %8110 = vmatprep.subr.bf16.mxu0 %v11910_v33  ;;  %2223 = vmatmul.mubr.f32.vlgmr.msra.gmra.mrb[96].mxu1 %v10360_v47 }
 0x151   :  { %8136 = vmatpush3.bf16.msra.mxu1 %v10128_v45  ;;  %2465 = vmatprep.mubr.f32.mxu1 %v1982_v34  ;;  %v7187_v21 = vpop.f32.mrb[0].mxu0  ;;  %v11924_v34 = vpack.c.bf16 %v9890_v58, %v9885_v51 }
 0x152   :  { %8138 = vmatprep.subr.bf16.mxu1 %v10135_v63  ;;  %v7188_v54 = vpop.f32.mrb[1].mxu0 }
 0x153   :  { %8112 = vmatpush3.bf16.msra.mxu0 %v11911_v40  ;;  %v7189_v55 = vadd.f32 %v7188_v54, %v7187_v21  ;;  %v11926_v40 = vpack.c.bf16 %v9928_v19, %v9916_v15 }
 0x154   :  { %8114 = vmatprep.subr.bf16.mxu0 %v11912_v41 }
 0x155   :  { %8140 = vmatpush3.bf16.msra.mxu1 %v10157_v56 }
 0x156   :  { %8142 = vmatprep.subr.bf16.mxu1 %v10171_v27  ;;  %v7190_v22 = vpop.f32.mrb[2].mxu0 }
 0x157   :  { %8116 = vmatpush3.bf16.msra.mxu0 %v11913_v23  ;;  %v7191_v37 = vpop.f32.mrb[3].mxu0  ;;  %v11927_v23 = vpack.c.bf16 %v9943_v42, %v9933_v62 }
 0x158   :  { %8118 = vmatprep.subr.bf16.mxu0 %v11915_v14  ;;  %v7192_v4 = vadd.f32 %v7191_v37, %v7190_v22  ;;  %v11931_v22 = vld [vmem:[#allocation40_spill] sm:$0xff] }
 0x159   :  { %8144 = vmatpush3.bf16.msra.mxu1 %v10187_v18 }
 0x15a   :  { %8146 = vmatprep.subr.bf16.mxu1 %v11916_v10 }
 0x15b   :  { %8120 = vmatpush3.bf16.msra.mxu0 %v11919_v31 }
 0x15c   :  { %8122 = vmatprep.subr.bf16.mxu0 %v11922_v44  ;;  %v7267_v33 = vpop.f32.mrb[0].mxu1 }
 0x15d   :  { %8148 = vmatpush3.bf16.msra.mxu1 %v10217_v28  ;;  %v7268_v3 = vpop.f32.mrb[1].mxu1  ;;  %v7193_v51 = vpop.f32.mrb[4].mxu0 }
 0x15e   :  { %8150 = vmatprep.subr.bf16.mxu1 %v10225_v26  ;;  %v7269_v16 = vadd.f32 %v7268_v3, %v7267_v33  ;;  %v7194_v58 = vpop.f32.mrb[5].mxu0  ;;  %v11933_v3 = vld [vmem:[#allocation175_spill] sm:$0xff] }
 0x15f   :  { %8124 = vmatpush3.bf16.msra.mxu0 %v11923_v24  ;;  %v7195_v48 = vadd.f32 %v7194_v58, %v7193_v51 }
 0x160   :  { %8126 = vmatprep.subr.bf16.mxu0 %v11924_v34  ;;  %v10445_v41 = vadd.f32 %v7269_v16, %v7189_v55  ;;  %v7270_v13 = vpop.f32.mrb[2].mxu1  ;;  %v11932_v34 = vld [vmem:[#allocation174_spill] sm:$0xff] }
 0x161   :  { %8152 = vmatpush3.bf16.msra.mxu1 %v10247_v32  ;;  %v7271_v15 = vpop.f32.mrb[3].mxu1 }
 0x162   :  { %8154 = vmatprep.subr.bf16.mxu1 %v10253_v49  ;;  %v7272_v19 = vadd.f32 %v7271_v15, %v7270_v13  ;;  %v7196_v14 = vpop.f32.mrb[6].mxu0 }
 0x163   :  { %8128 = vmatpush3.bf16.msra.mxu0 %v11925_v25  ;;  %v7197_v21 = vpop.f32.mrb[7].mxu0 }
 0x164   :  { %8130 = vmatprep.subr.bf16.mxu0 %v11926_v40  ;;  %v10454_v54 = vadd.f32 %v7272_v19, %v7192_v4  ;;  %v7273_v42 = vpop.f32.mrb[4].mxu1  ;;  %v7198_v62 = vadd.f32 %v7197_v21, %v7196_v14 }
 0x165   :  { %8156 = vmatpush3.bf16.msra.mxu1 %v10277_v12  ;;  %v7274_v31 = vpop.f32.mrb[5].mxu1 }
 0x166   :  { %8158 = vmatprep.subr.bf16.mxu1 %v10285_v11  ;;  %v7275_v55 = vadd.f32 %v7274_v31, %v7273_v42  ;;  %v7199_v59 = vpop.f32.mrb[8].mxu0 }
 0x167   :  { %8132 = vmatpush3.bf16.msra.mxu0 %v11927_v23  ;;  %v7200_v9 = vpop.f32.mrb[9].mxu0 }
 0x168   :  { %8166 = vmatprep.subr.bf16.mxu0 %v11928_v36  ;;  %v10461_v44 = vadd.f32 %v7275_v55, %v7195_v48  ;;  %v7276_v24 = vpop.f32.mrb[6].mxu1  ;;  %v7201_v37 = vadd.f32 %v7200_v9, %v7199_v59  ;;  %v11936_v36 = vld [vmem:[#allocation178_spill] sm:$0xff] }
 0x169   :  { %8160 = vmatpush3.bf16.msra.mxu1 %v10307_v8  ;;  %v7277_v4 = vpop.f32.mrb[7].mxu1 }
 0x16a   :  { %2361 = vmatmul.mubr.f32.vlgmr.msra.gmra.mrb[98].mxu0 %v10368_v38  ;;  %8162 = vmatprep.subr.bf16.mxu1 %v10315_v7  ;;  %v7278_v25 = vadd.f32 %v7277_v4, %v7276_v24  ;;  %v11934_v38 = vld [vmem:[#allocation176_spill] sm:$0xff]  ;;  %v11940_v24 = vld [vmem:[#allocation182_spill] sm:$0xff] }
 0x16b   :  { %8168 = vmatpush3.bf16.msra.mxu0 %v11929_v6  ;;  %2635 = vmatprep.mubr.f32.mxu0 %v10355_v46  ;;  %v7202_v33 = vpop.f32.mrb[10].mxu0 }
 0x16c   :  { %8170 = vmatprep.subr.bf16.mxu0 %v11930_v35  ;;  %v10470_v40 = vadd.f32 %v7278_v25, %v7198_v62  ;;  %v11938_v62 = vld [vmem:[#allocation180_spill] sm:$0xff] }
 0x16d   :  { %8164 = vmatpush3.bf16.msra.mxu1 %v10331_v52  ;;  %v7279_v16 = vpop.f32.mrb[8].mxu1 }
 0x16e   :  { %8198 = vmatprep.subr.bf16.mxu1 %v11894_v5  ;;  %v7203_v5 = vpop.f32.mrb[11].mxu0 }
 0x16f   :  { %8172 = vmatpush3.bf16.msra.mxu0 %v11931_v22  ;;  %v7204_v51 = vadd.f32 %v7203_v5, %v7202_v33  ;;  %v7205_v23 = vpop.f32.mrb[12].mxu0 }
 0x170   :  { %2469 = vmatmul.mubr.f32.vlgmr.msra.gmra.mrb[98].mxu1 %v1988_v30  ;;  %8174 = vmatprep.subr.bf16.mxu0 %v11932_v34  ;;  %v7280_v30 = vpop.f32.mrb[9].mxu1 }
 0x171   :  { %8200 = vmatpush3.bf16.msra.mxu1 %v10128_v45  ;;  %2739 = vmatprep.mubr.f32.mxu1 %v10355_v46  ;;  %v7281_v58 = vadd.f32 %v7280_v30, %v7279_v16  ;;  %v7206_v45 = vpop.f32.mrb[13].mxu0 }
 0x172   :  { %8202 = vmatprep.subr.bf16.mxu1 %v10135_v63  ;;  %v11935_v63 = vld [vmem:[#allocation177_spill] sm:$0xff]  ;;  %v7282_v13 = vpop.f32.mrb[10].mxu1  ;;  %v7207_v48 = vadd.f32 %v7206_v45, %v7205_v23 }
 0x173   :  { %8176 = vmatpush3.bf16.msra.mxu0 %v11933_v3  ;;  %v10476_v46 = vadd.f32 %v7281_v58, %v7201_v37  ;;  %v7283_v15 = vpop.f32.mrb[11].mxu1  ;;  %v11942_v3 = vld [vmem:[#allocation184_spill] sm:$0xff] }
 0x174   :  { %8178 = vmatprep.subr.bf16.mxu0 %v11934_v38  ;;  %v7284_v19 = vadd.f32 %v7283_v15, %v7282_v13  ;;  %v7208_v14 = vpop.f32.mrb[14].mxu0 }
 0x175   :  { %8204 = vmatpush3.bf16.msra.mxu1 %v10157_v56  ;;  %v7209_v56 = vpop.f32.mrb[15].mxu0 }
 0x176   :  { %8206 = vmatprep.subr.bf16.mxu1 %v10171_v27  ;;  %v10482_v21 = vadd.f32 %v7284_v19, %v7204_v51  ;;  %v11937_v27 = vld [vmem:[#allocation179_spill] sm:$0xff]  ;;  %v7285_v6 = vpop.f32.mrb[12].mxu1  ;;  %v7210_v42 = vadd.f32 %v7209_v56, %v7208_v14 }
 0x177   :  { %8180 = vmatpush3.bf16.msra.mxu0 %v11935_v63  ;;  %v7286_v35 = vpop.f32.mrb[13].mxu1 }
 0x178   :  { %8182 = vmatprep.subr.bf16.mxu0 %v11936_v36  ;;  %v7287_v31 = vadd.f32 %v7286_v35, %v7285_v6  ;;  %v7211_v55 = vpop.f32.mrb[16].mxu0 }
 0x179   :  { %8208 = vmatpush3.bf16.msra.mxu1 %v10187_v18  ;;  %v7212_v18 = vpop.f32.mrb[17].mxu0 }
 0x17a   :  { %8210 = vmatprep.subr.bf16.mxu1 %v11916_v10  ;;  %v10488_v59 = vadd.f32 %v7287_v31, %v7207_v48  ;;  %v11939_v10 = vld [vmem:[#allocation181_spill] sm:$0xff]  ;;  %v7288_v9 = vpop.f32.mrb[14].mxu1  ;;  %v7213_v22 = vadd.f32 %v7212_v18, %v7211_v55 }
 0x17b   :  { %8184 = vmatpush3.bf16.msra.mxu0 %v11937_v27  ;;  %v7289_v37 = vpop.f32.mrb[15].mxu1 }
 0x17c   :  { %8186 = vmatprep.subr.bf16.mxu0 %v11938_v62  ;;  %v7290_v34 = vadd.f32 %v7289_v37, %v7288_v9  ;;  %v7214_v4 = vpop.f32.mrb[18].mxu0 }
 0x17d   :  { %8212 = vmatpush3.bf16.msra.mxu1 %v10217_v28  ;;  %v7215_v28 = vpop.f32.mrb[19].mxu0 }
 0x17e   :  { %8214 = vmatprep.subr.bf16.mxu1 %v10225_v26  ;;  %v10494_v25 = vadd.f32 %v7290_v34, %v7210_v42  ;;  %v11941_v26 = vld [vmem:[#allocation183_spill] sm:$0xff]  ;;  %v7291_v33 = vpop.f32.mrb[16].mxu1  ;;  %v7216_v5 = vadd.f32 %v7215_v28, %v7214_v4 }
 0x17f   :  { %8188 = vmatpush3.bf16.msra.mxu0 %v11939_v10  ;;  %v7292_v16 = vpop.f32.mrb[17].mxu1 }
 0x180   :  { %8190 = vmatprep.subr.bf16.mxu0 %v11940_v24  ;;  %v7293_v51 = vadd.f32 %v7292_v16, %v7291_v33  ;;  %v7217_v38 = vpop.f32.mrb[20].mxu0 }
 0x181   :  { %8216 = vmatpush3.bf16.msra.mxu1 %v10247_v32  ;;  %v7218_v32 = vpop.f32.mrb[21].mxu0 }
 0x182   :  { %8218 = vmatprep.subr.bf16.mxu1 %v10253_v49  ;;  %v10500_v30 = vadd.f32 %v7293_v51, %v7213_v22  ;;  %v11943_v49 = vld [vmem:[#allocation185_spill] sm:$0xff]  ;;  %v7294_v58 = vpop.f32.mrb[18].mxu1  ;;  %v7219_v23 = vadd.f32 %v7218_v32, %v7217_v38 }
 0x183   :  { %8192 = vmatpush3.bf16.msra.mxu0 %v11941_v26  ;;  %v7295_v45 = vpop.f32.mrb[19].mxu1 }
 0x184   :  { %8194 = vmatprep.subr.bf16.mxu0 %v11942_v3  ;;  %v7296_v63 = vadd.f32 %v7295_v45, %v7294_v58 }
 0x185   :  { %8220 = vmatpush3.bf16.msra.mxu1 %v10277_v12  ;;  %v7220_v13 = vpop.f32.mrb[22].mxu0 }
 0x186   :  { %8222 = vmatprep.subr.bf16.mxu1 %v10285_v11  ;;  %v7221_v12 = vpop.f32.mrb[23].mxu0  ;;  %v10506_v48 = vadd.f32 %v7296_v63, %v7216_v5 }
 0x187   :  { %8196 = vmatpush3.bf16.msra.mxu0 %v11943_v49  ;;  %v7297_v11 = vpop.f32.mrb[20].mxu1  ;;  %v7222_v36 = vadd.f32 %v7221_v12, %v7220_v13 }
 0x188   :  { %v7298_v15 = vpop.f32.mrb[21].mxu1 }
 0x189   :  { %8224 = vmatpush3.bf16.msra.mxu1 %v10307_v8  ;;  %v7299_v19 = vadd.f32 %v7298_v15, %v7297_v11  ;;  %v7223_v14 = vpop.f32.mrb[24].mxu0 }
 0x18a   :  { %2637 = vmatmul.mubr.f32.vlgmr.msra.gmra.mrb[100].mxu0 %v10360_v47  ;;  %8226 = vmatprep.subr.bf16.mxu1 %v10315_v7  ;;  %v7224_v56 = vpop.f32.mrb[25].mxu0 }
 0x18b   :  { %v10509_v27 = vadd.f32 %v7299_v19, %v7219_v23  ;;  %v7300_v6 = vpop.f32.mrb[22].mxu1  ;;  %v7225_v8 = vadd.f32 %v7224_v56, %v7223_v14 }
 0x18c   :  { %v7301_v42 = vpop.f32.mrb[23].mxu1 }
 0x18d   :  { %8228 = vmatpush3.bf16.msra.mxu1 %v10331_v52  ;;  %v7302_v62 = vadd.f32 %v7301_v42, %v7300_v6  ;;  %v7226_v7 = vpop.f32.mrb[26].mxu0 }
 0x18e   :  { %v7227_v35 = vpop.f32.mrb[27].mxu0 }
 0x18f   :  { %v10512_v31 = vadd.f32 %v7302_v62, %v7222_v36  ;;  %v7303_v55 = vpop.f32.mrb[24].mxu1  ;;  %v7228_v18 = vadd.f32 %v7227_v35, %v7226_v7 }
 0x190   :  { %2741 = vmatmul.mubr.f32.vlgmr.msra.gmra.mrb[100].mxu1 %v10360_v47  ;;  %v7304_v10 = vpop.f32.mrb[25].mxu1 }
 0x191   :  { %v7305_v9 = vadd.f32 %v7304_v10, %v7303_v55  ;;  %v7229_v22 = vpop.f32.mrb[28].mxu0 }
 0x192   :  { %v7230_v52 = vpop.f32.mrb[29].mxu0 }
 0x193   :  { %v10514_v24 = vadd.f32 %v7305_v9, %v7225_v8  ;;  %v7306_v37 = vpop.f32.mrb[26].mxu1  ;;  %v7231_v34 = vadd.f32 %v7230_v52, %v7229_v22 }
 0x194   :  { %v7307_v4 = vpop.f32.mrb[27].mxu1 }
 0x195   :  { %v7308_v28 = vadd.f32 %v7307_v4, %v7306_v37  ;;  %v7232_v26 = vpop.f32.mrb[30].mxu0 }
 0x196   :  { %v7233_v47 = vpop.f32.mrb[31].mxu0 }
 0x197   :  { %v10516_v33 = vadd.f32 %v7308_v28, %v7228_v18  ;;  %v7234_v5 = vadd.f32 %v7233_v47, %v7232_v26  ;;  %v7309_v3 = vpop.f32.mrb[28].mxu1 }
 0x198   :  { %v7310_v16 = vpop.f32.mrb[29].mxu1 }
 0x199   :  { %v7347_v51 = vpop.f32.mrb[32].mxu0  ;;  %v7311_v38 = vadd.f32 %v7310_v16, %v7309_v3 }
 0x19a   :  { %v7348_v32 = vpop.f32.mrb[33].mxu0 }
 0x19b   :  { %v10518_v49 = vadd.f32 %v7311_v38, %v7231_v34  ;;  %v7349_v58 = vadd.f32 %v7348_v32, %v7347_v51  ;;  %v7312_v23 = vpop.f32.mrb[30].mxu1 }
 0x19c   :  { %v7313_v45 = vpop.f32.mrb[31].mxu1 }
 0x19d   :  { %v952_v63 = vadd.f32 %v7349_v58, %v10445_v41  ;;  %v7350_v13 = vpop.f32.mrb[34].mxu0  ;;  %v7314_v12 = vadd.f32 %v7313_v45, %v7312_v23 }
 0x19e   :  { %v7351_v11 = vpop.f32.mrb[35].mxu0 }
 0x19f   :  { %v10521_v36 = vadd.f32 %v7314_v12, %v7234_v5  ;;  %v7352_v15 = vadd.f32 %v7351_v11, %v7350_v13  ;;  %v7427_v19 = vpop.f32.mrb[32].mxu1 }
 0x1a0   :  { %v7428_v14 = vpop.f32.mrb[33].mxu1 }
 0x1a1   :  { %v961_v56 = vadd.f32 %v7352_v15, %v10454_v54  ;;  %v7353_v6 = vpop.f32.mrb[36].mxu0  ;;  %v7429_v8 = vadd.f32 %v7428_v14, %v7427_v19 }
 0x1a2   :  { %v7354_v42 = vpop.f32.mrb[37].mxu0 }
 0x1a3   :  { %v7355_v62 = vadd.f32 %v7354_v42, %v7353_v6  ;;  %v10524_v7 = vadd.f32 %v7429_v8, %v952_v63  ;;  %v7430_v35 = vpop.f32.mrb[34].mxu1 }
 0x1a4   :  { %v7431_v55 = vpop.f32.mrb[35].mxu1 }
 0x1a5   :  { %v970_v41 = vadd.f32 %v7355_v62, %v10461_v44  ;;  %v7356_v18 = vpop.f32.mrb[38].mxu0  ;;  %v7432_v10 = vadd.f32 %v7431_v55, %v7430_v35 }
 0x1a6   :  { %v7357_v9 = vpop.f32.mrb[39].mxu0 }
 0x1a7   :  { %v7358_v22 = vadd.f32 %v7357_v9, %v7356_v18  ;;  %v10527_v52 = vadd.f32 %v7432_v10, %v961_v56  ;;  %v7433_v37 = vpop.f32.mrb[36].mxu1 }
 0x1a8   :  { %v7434_v34 = vpop.f32.mrb[37].mxu1 }
 0x1a9   :  { %v979_v54 = vadd.f32 %v7358_v22, %v10470_v40  ;;  %v7359_v4 = vpop.f32.mrb[40].mxu0  ;;  %v7435_v28 = vadd.f32 %v7434_v34, %v7433_v37 }
 0x1aa   :  { %v7360_v26 = vpop.f32.mrb[41].mxu0 }
 0x1ab   :  { %v7361_v47 = vadd.f32 %v7360_v26, %v7359_v4  ;;  %v10530_v5 = vadd.f32 %v7435_v28, %v970_v41  ;;  %v7436_v3 = vpop.f32.mrb[38].mxu1 }
 0x1ac   :  { %v7437_v16 = vpop.f32.mrb[39].mxu1 }
 0x1ad   :  { %v988_v44 = vadd.f32 %v7361_v47, %v10476_v46  ;;  %v7362_v51 = vpop.f32.mrb[42].mxu0  ;;  %v7438_v38 = vadd.f32 %v7437_v16, %v7436_v3 }
 0x1ae   :  { %v7363_v32 = vpop.f32.mrb[43].mxu0 }
 0x1af   :  { %v7364_v58 = vadd.f32 %v7363_v32, %v7362_v51  ;;  %v10533_v23 = vadd.f32 %v7438_v38, %v979_v54  ;;  %v7439_v45 = vpop.f32.mrb[40].mxu1 }
 0x1b0   :  { %v7440_v63 = vpop.f32.mrb[41].mxu1 }
 0x1b1   :  { %v997_v40 = vadd.f32 %v7364_v58, %v10482_v21  ;;  %v7365_v13 = vpop.f32.mrb[44].mxu0  ;;  %v7441_v12 = vadd.f32 %v7440_v63, %v7439_v45 }
 0x1b2   :  { %v7366_v11 = vpop.f32.mrb[45].mxu0 }
 0x1b3   :  { %v7367_v15 = vadd.f32 %v7366_v11, %v7365_v13  ;;  %v10536_v19 = vadd.f32 %v7441_v12, %v988_v44  ;;  %v7442_v14 = vpop.f32.mrb[42].mxu1 }
 0x1b4   :  { %v7443_v56 = vpop.f32.mrb[43].mxu1 }
 0x1b5   :  { %v1006_v46 = vadd.f32 %v7367_v15, %v10488_v59  ;;  %v7444_v8 = vadd.f32 %v7443_v56, %v7442_v14 }
 0x1b6   :  { %v7368_v6 = vpop.f32.mrb[46].mxu0 }
 0x1b7   :  { %v7369_v42 = vpop.f32.mrb[47].mxu0  ;;  %v10539_v35 = vadd.f32 %v7444_v8, %v997_v40 }
 0x1b8   :  { %v7370_v62 = vadd.f32 %v7369_v42, %v7368_v6  ;;  %v7445_v55 = vpop.f32.mrb[44].mxu1 }
 0x1b9   :  { %v7446_v41 = vpop.f32.mrb[45].mxu1 }
 0x1ba   :  { %v1015_v21 = vadd.f32 %v7370_v62, %v10494_v25  ;;  %v7371_v18 = vpop.f32.mrb[48].mxu0  ;;  %v7447_v10 = vadd.f32 %v7446_v41, %v7445_v55 }
 0x1bb   :  { %v7372_v9 = vpop.f32.mrb[49].mxu0 }
 0x1bc   :  { %v7373_v22 = vadd.f32 %v7372_v9, %v7371_v18  ;;  %v10542_v37 = vadd.f32 %v7447_v10, %v1006_v46  ;;  %v7448_v34 = vpop.f32.mrb[46].mxu1 }
 0x1bd   :  { %v7449_v54 = vpop.f32.mrb[47].mxu1 }
 0x1be   :  { %v1024_v59 = vadd.f32 %v7373_v22, %v10500_v30  ;;  %v7450_v28 = vadd.f32 %v7449_v54, %v7448_v34 }
 0x1c0   :  { %v7374_v4 = vpop.f32.mrb[50].mxu0  ;;  %v10545_v3 = vadd.f32 %v7450_v28, %v1015_v21  ;;  %v7451_v16 = vpop.f32.mrb[48].mxu1 }
 0x1c1   :  { %v7375_v26 = vpop.f32.mrb[51].mxu0  ;;  %v7452_v44 = vpop.f32.mrb[49].mxu1 }
 0x1c2   :  { %v7376_v47 = vadd.f32 %v7375_v26, %v7374_v4  ;;  %v7453_v38 = vadd.f32 %v7452_v44, %v7451_v16 }
 0x1c4   :  { %v1033_v25 = vadd.f32 %v7376_v47, %v10506_v48  ;;  %v7377_v51 = vpop.f32.mrb[52].mxu0  ;;  %v10548_v45 = vadd.f32 %v7453_v38, %v1024_v59  ;;  %v7454_v63 = vpop.f32.mrb[50].mxu1 }
 0x1c5   :  { %v7378_v32 = vpop.f32.mrb[53].mxu0  ;;  %v7455_v40 = vpop.f32.mrb[51].mxu1 }
 0x1c6   :  { %v7379_v58 = vadd.f32 %v7378_v32, %v7377_v51  ;;  %v7456_v12 = vadd.f32 %v7455_v40, %v7454_v63 }
 0x1c8   :  { %v1042_v30 = vadd.f32 %v7379_v58, %v10509_v27  ;;  %v7380_v13 = vpop.f32.mrb[54].mxu0  ;;  %v10551_v14 = vadd.f32 %v7456_v12, %v1033_v25  ;;  %v7457_v56 = vpop.f32.mrb[52].mxu1 }
 0x1c9   :  { %v7381_v11 = vpop.f32.mrb[55].mxu0  ;;  %v7458_v46 = vpop.f32.mrb[53].mxu1 }
 0x1ca   :  { %v7382_v15 = vadd.f32 %v7381_v11, %v7380_v13  ;;  %v7459_v8 = vadd.f32 %v7458_v46, %v7457_v56 }
 0x1cc   :  { %v1051_v48 = vadd.f32 %v7382_v15, %v10512_v31  ;;  %v7383_v6 = vpop.f32.mrb[56].mxu0  ;;  %v10554_v55 = vadd.f32 %v7459_v8, %v1042_v30  ;;  %v7460_v41 = vpop.f32.mrb[54].mxu1 }
 0x1cd   :  { %v7384_v42 = vpop.f32.mrb[57].mxu0  ;;  %v7461_v21 = vpop.f32.mrb[55].mxu1 }
 0x1ce   :  { %v7385_v62 = vadd.f32 %v7384_v42, %v7383_v6  ;;  %v7462_v10 = vadd.f32 %v7461_v21, %v7460_v41 }
 0x1d0   :  { %v1060_v27 = vadd.f32 %v7385_v62, %v10514_v24  ;;  %v7386_v18 = vpop.f32.mrb[58].mxu0  ;;  %v10557_v34 = vadd.f32 %v7462_v10, %v1051_v48  ;;  %v7463_v54 = vpop.f32.mrb[56].mxu1 }
 0x1d1   :  { %v7387_v9 = vpop.f32.mrb[59].mxu0  ;;  %v7464_v59 = vpop.f32.mrb[57].mxu1 }
 0x1d2   :  { %v7388_v22 = vadd.f32 %v7387_v9, %v7386_v18  ;;  %v7465_v28 = vadd.f32 %v7464_v59, %v7463_v54 }
 0x1d4   :  { %v1069_v31 = vadd.f32 %v7388_v22, %v10516_v33  ;;  %v7389_v4 = vpop.f32.mrb[60].mxu0  ;;  %v10560_v16 = vadd.f32 %v7465_v28, %v1060_v27  ;;  %v7466_v44 = vpop.f32.mrb[58].mxu1 }
 0x1d5   :  { %v7390_v26 = vpop.f32.mrb[61].mxu0  ;;  %v7467_v25 = vpop.f32.mrb[59].mxu1 }
 0x1d6   :  { %v7391_v47 = vadd.f32 %v7390_v26, %v7389_v4  ;;  %v7468_v38 = vadd.f32 %v7467_v25, %v7466_v44 }
 0x1d8   :  { %v1078_v24 = vadd.f32 %v7391_v47, %v10518_v49  ;;  %v7392_v51 = vpop.f32.mrb[62].mxu0  ;;  %v10563_v63 = vadd.f32 %v7468_v38, %v1069_v31  ;;  %v7469_v40 = vpop.f32.mrb[60].mxu1 }
 0x1d9   :  { %v7393_v32 = vpop.f32.mrb[63].mxu0  ;;  %v7470_v30 = vpop.f32.mrb[61].mxu1 }
 0x1da   :  { %v7394_v58 = vadd.f32 %v7393_v32, %v7392_v51  ;;  %v7471_v12 = vadd.f32 %v7470_v30, %v7469_v40 }
 0x1dc   :  { %v1087_v33 = vadd.f32 %v7394_v58, %v10521_v36  ;;  %v7507_v13 = vpop.f32.mrb[64].mxu0  ;;  %v10566_v15 = vadd.f32 %v7471_v12, %v1078_v24  ;;  %v7472_v46 = vpop.f32.mrb[62].mxu1 }
 0x1dd   :  { %v7508_v11 = vpop.f32.mrb[65].mxu0  ;;  %v7473_v48 = vpop.f32.mrb[63].mxu1 }
 0x1de   :  { %v7509_v56 = vadd.f32 %v7508_v11, %v7507_v13  ;;  %v7474_v8 = vadd.f32 %v7473_v48, %v7472_v46 }
 0x1e0   :  { %v1528_v49 = vadd.f32 %v7509_v56, %v10524_v7  ;;  %v7510_v6 = vpop.f32.mrb[66].mxu0  ;;  %v10569_v62 = vadd.f32 %v7474_v8, %v1087_v33  ;;  %v7587_v21 = vpop.f32.mrb[64].mxu1 }
 0x1e1   :  { %v7511_v42 = vpop.f32.mrb[67].mxu0  ;;  %v7588_v27 = vpop.f32.mrb[65].mxu1 }
 0x1e2   :  { %v7512_v41 = vadd.f32 %v7511_v42, %v7510_v6  ;;  %v7589_v10 = vadd.f32 %v7588_v27, %v7587_v21 }
 0x1e4   :  { %v1535_v36 = vadd.f32 %v7512_v41, %v10527_v52  ;;  %v7513_v18 = vpop.f32.mrb[68].mxu0  ;;  %v10572_v54 = vadd.f32 %v7589_v10, %v1528_v49  ;;  %v7590_v59 = vpop.f32.mrb[66].mxu1 }
 0x1e5   :  { %v7514_v9 = vpop.f32.mrb[69].mxu0  ;;  %v7591_v31 = vpop.f32.mrb[67].mxu1 }
 0x1e6   :  { %v7515_v22 = vadd.f32 %v7514_v9, %v7513_v18  ;;  %v7592_v28 = vadd.f32 %v7591_v31, %v7590_v59 }
 0x1e8   :  { %v1542_v7 = vadd.f32 %v7515_v22, %v10530_v5  ;;  %v7516_v4 = vpop.f32.mrb[70].mxu0  ;;  %v10575_v44 = vadd.f32 %v7592_v28, %v1535_v36 }
 0x1e9   :  { %v7517_v26 = vpop.f32.mrb[71].mxu0 }
 0x1ea   :  { %v7518_v47 = vadd.f32 %v7517_v26, %v7516_v4  ;;  %v7593_v25 = vpop.f32.mrb[68].mxu1 }
 0x1eb   :  { %v7594_v24 = vpop.f32.mrb[69].mxu1 }
 0x1ec   :  { %v1549_v52 = vadd.f32 %v7518_v47, %v10533_v23  ;;  %v7519_v51 = vpop.f32.mrb[72].mxu0  ;;  %v7595_v38 = vadd.f32 %v7594_v24, %v7593_v25 }
 0x1ed   :  { %v7520_v32 = vpop.f32.mrb[73].mxu0 }
 0x1ee   :  { %v7521_v58 = vadd.f32 %v7520_v32, %v7519_v51  ;;  %v10578_v40 = vadd.f32 %v7595_v38, %v1542_v7  ;;  %v7596_v30 = vpop.f32.mrb[70].mxu1 }
 0x1ef   :  { %v7597_v33 = vpop.f32.mrb[71].mxu1 }
 0x1f0   :  { %v1556_v5 = vadd.f32 %v7521_v58, %v10536_v19  ;;  %v7522_v13 = vpop.f32.mrb[74].mxu0  ;;  %v7598_v12 = vadd.f32 %v7597_v33, %v7596_v30 }
 0x1f1   :  { %v7523_v11 = vpop.f32.mrb[75].mxu0 }
 0x1f2   :  { %v7524_v56 = vadd.f32 %v7523_v11, %v7522_v13  ;;  %v10581_v46 = vadd.f32 %v7598_v12, %v1549_v52  ;;  %v7599_v48 = vpop.f32.mrb[72].mxu1 }
 0x1f3   :  { %v7600_v49 = vpop.f32.mrb[73].mxu1 }
 0x1f4   :  { %v1563_v23 = vadd.f32 %v7524_v56, %v10539_v35  ;;  %v7601_v8 = vadd.f32 %v7600_v49, %v7599_v48 }
 0x1f5   :  { %v7525_v6 = vpop.f32.mrb[76].mxu0 }
 0x1f6   :  { %v7526_v42 = vpop.f32.mrb[77].mxu0  ;;  %v10584_v21 = vadd.f32 %v7601_v8, %v1556_v5  ;;  %v7602_v27 = vpop.f32.mrb[74].mxu1 }
 0x1f7   :  { %v7527_v41 = vadd.f32 %v7526_v42, %v7525_v6  ;;  %v7603_v36 = vpop.f32.mrb[75].mxu1 }
 0x1f8   :  { %v7604_v10 = vadd.f32 %v7603_v36, %v7602_v27 }
 0x1f9   :  { %v1570_v19 = vadd.f32 %v7527_v41, %v10542_v37  ;;  %v7528_v18 = vpop.f32.mrb[78].mxu0 }
 0x1fa   :  { %v7529_v9 = vpop.f32.mrb[79].mxu0  ;;  %v10587_v59 = vadd.f32 %v7604_v10, %v1563_v23 }
 0x1fb   :  { %v7530_v22 = vadd.f32 %v7529_v9, %v7528_v18  ;;  %v7605_v31 = vpop.f32.mrb[76].mxu1 }
 0x1fc   :  { %v7606_v7 = vpop.f32.mrb[77].mxu1 }
 0x1fd   :  { %v1577_v35 = vadd.f32 %v7530_v22, %v10545_v3  ;;  %v7531_v4 = vpop.f32.mrb[80].mxu0  ;;  %v7607_v28 = vadd.f32 %v7606_v7, %v7605_v31 }
 0x1fe   :  { %v7532_v26 = vpop.f32.mrb[81].mxu0 }
 0x1ff   :  { %v7533_v47 = vadd.f32 %v7532_v26, %v7531_v4  ;;  %v10590_v25 = vadd.f32 %v7607_v28, %v1570_v19  ;;  %v7608_v24 = vpop.f32.mrb[78].mxu1 }
 0x200   :  { %v7609_v52 = vpop.f32.mrb[79].mxu1 }
 0x201   :  { %v1584_v37 = vadd.f32 %v7533_v47, %v10548_v45  ;;  %v7534_v51 = vpop.f32.mrb[82].mxu0  ;;  %v7610_v38 = vadd.f32 %v7609_v52, %v7608_v24 }
 0x202   :  { %v7535_v32 = vpop.f32.mrb[83].mxu0 }
 0x203   :  { %v7536_v58 = vadd.f32 %v7535_v32, %v7534_v51  ;;  %v10593_v30 = vadd.f32 %v7610_v38, %v1577_v35  ;;  %v7611_v33 = vpop.f32.mrb[80].mxu1 }
 0x204   :  { %v7612_v5 = vpop.f32.mrb[81].mxu1 }
 0x205   :  { %v1591_v3 = vadd.f32 %v7536_v58, %v10551_v14  ;;  %v7537_v13 = vpop.f32.mrb[84].mxu0  ;;  %v7613_v12 = vadd.f32 %v7612_v5, %v7611_v33 }
 0x206   :  { %v7538_v11 = vpop.f32.mrb[85].mxu0 }
 0x207   :  { %v7539_v56 = vadd.f32 %v7538_v11, %v7537_v13  ;;  %v10596_v48 = vadd.f32 %v7613_v12, %v1584_v37  ;;  %v7614_v49 = vpop.f32.mrb[82].mxu1 }
 0x208   :  { %v7615_v23 = vpop.f32.mrb[83].mxu1 }
 0x209   :  { %v1598_v45 = vadd.f32 %v7539_v56, %v10554_v55  ;;  %v7540_v6 = vpop.f32.mrb[86].mxu0  ;;  %v7616_v8 = vadd.f32 %v7615_v23, %v7614_v49 }
 0x20a   :  { %v7541_v42 = vpop.f32.mrb[87].mxu0 }
 0x20b   :  { %v7542_v41 = vadd.f32 %v7541_v42, %v7540_v6  ;;  %v10599_v27 = vadd.f32 %v7616_v8, %v1591_v3  ;;  %v7617_v36 = vpop.f32.mrb[84].mxu1 }
 0x20c   :  { %v7618_v19 = vpop.f32.mrb[85].mxu1 }
 0x20d   :  { %v1605_v14 = vadd.f32 %v7542_v41, %v10557_v34  ;;  %v7543_v18 = vpop.f32.mrb[88].mxu0  ;;  %v7619_v10 = vadd.f32 %v7618_v19, %v7617_v36 }
 0x20e   :  { %v7544_v9 = vpop.f32.mrb[89].mxu0 }
 0x20f   :  { %v7545_v22 = vadd.f32 %v7544_v9, %v7543_v18  ;;  %v10602_v31 = vadd.f32 %v7619_v10, %v1598_v45  ;;  %v7620_v7 = vpop.f32.mrb[86].mxu1 }
 0x210   :  { %v7621_v35 = vpop.f32.mrb[87].mxu1 }
 0x211   :  { %v1612_v55 = vadd.f32 %v7545_v22, %v10560_v16  ;;  %v7546_v4 = vpop.f32.mrb[90].mxu0  ;;  %v7622_v28 = vadd.f32 %v7621_v35, %v7620_v7 }
 0x212   :  { %v7547_v26 = vpop.f32.mrb[91].mxu0 }
 0x213   :  { %v7548_v47 = vadd.f32 %v7547_v26, %v7546_v4  ;;  %v10605_v24 = vadd.f32 %v7622_v28, %v1605_v14  ;;  %v7623_v52 = vpop.f32.mrb[88].mxu1 }
 0x214   :  { %v7624_v37 = vpop.f32.mrb[89].mxu1 }
 0x215   :  { %v1619_v34 = vadd.f32 %v7548_v47, %v10563_v63  ;;  %v7549_v51 = vpop.f32.mrb[92].mxu0  ;;  %v7625_v38 = vadd.f32 %v7624_v37, %v7623_v52 }
 0x216   :  { %v7550_v32 = vpop.f32.mrb[93].mxu0 }
 0x217   :  { %v7551_v58 = vadd.f32 %v7550_v32, %v7549_v51  ;;  %v10608_v33 = vadd.f32 %v7625_v38, %v1612_v55  ;;  %v7626_v5 = vpop.f32.mrb[90].mxu1  ;;  %v8674_v38 = vmov 1966171168  }
 0x218   :  { %v7627_v3 = vpop.f32.mrb[91].mxu1  ;;  %v2749_v32 = vunpack.c.l.s4 %v8674_v38 }
 0x219   :  { %v1626_v16 = vadd.f32 %v7551_v58, %v10566_v15  ;;  %v7552_v13 = vpop.f32.mrb[94].mxu0  ;;  %v7628_v12 = vadd.f32 %v7627_v3, %v7626_v5  ;;  %v7153_v15 = vld [vmem:[%s11075_s4] ss:$0 sm:$0xff]  ;;  %v2751_v58 = vlaneseq }
 0x21a   :  { %v7553_v11 = vpop.f32.mrb[95].mxu0 }
 0x21b   :  { %v7554_v56 = vadd.f32 %v7553_v11, %v7552_v13  ;;  %v10611_v49 = vadd.f32 %v7628_v12, %v1619_v34  ;;  %v7629_v23 = vpop.f32.mrb[92].mxu1  ;;  %v2750_v13 = vunpack.c.0.s8 %v2749_v32  ;;  %v10622_v12 = vshrl.u32 %v2751_v58, 7 }
 0x21c   :  { %v7630_v45 = vpop.f32.mrb[93].mxu1 }
 0x21d   :  { %v1633_v63 = vadd.f32 %v7554_v56, %v10569_v62  ;;  %v7631_v6 = vadd.f32 %v7630_v45, %v7629_v23  ;;  %v7667_v8 = vpop.f32.mrb[96].mxu0  ;;  %v10625_v45 = vsub.s32 %v2750_v13, %v10622_v12 }
 0x21e   :  { %v7668_v42 = vpop.f32.mrb[97].mxu0 }
 0x21f   :  { %v10614_v41 = vadd.f32 %v7631_v6, %v1626_v16  ;;  %v7632_v36 = vpop.f32.mrb[94].mxu1  ;;  %v7669_v19 = vadd.f32 %v7668_v42, %v7667_v8  ;;  %v2798_v42 = vsub.s32 0, %v10622_v12 }
 0x220   :  { %v7633_v14 = vpop.f32.mrb[95].mxu1 }
 0x221   :  { %v7634_v18 = vadd.f32 %v7633_v14, %v7632_v36  ;;  %v1993_v9 = vadd.f32 %v7669_v19, %v7153_v15 }
 0x223   :  { %v10619_v10 = vadd.f32 %v7634_v18, %v1633_v63  ;;  %v7702_v22 = vpop.f32.mrb[96].mxu1 }
 0x224   :  { %v7703_v7 = vpop.f32.mrb[97].mxu1 }
 0x225   :  { %v7704_v35 = vadd.f32 %v7703_v7, %v7702_v22 }
 0x227   :  { %v2225_v62 = vadd.f32 %v7704_v35, %v1993_v9 }
 0x23d   :  { %v7737_v55 = vpop.f32.mrb[98].mxu0 }
 0x23e   :  { %v7738_v4 = vpop.f32.mrb[99].mxu0 }
 0x23f   :  { %v7739_v28 = vadd.f32 %v7738_v4, %v7737_v55 }
 0x241   :  { %v2363_v26 = vadd.f32 %v7739_v28, %v2225_v62 }
 0x243   :  { %v7772_v47 = vpop.f32.mrb[98].mxu1 }
 0x244   :  { %v7773_v52 = vpop.f32.mrb[99].mxu1 }
 0x245   :  { %v7774_v37 = vadd.f32 %v7773_v52, %v7772_v47 }
 0x247   :  { %v2471_v34 = vadd.f32 %v7774_v37, %v2363_v26 }
 0x25d   :  { %v7807_v51 = vpop.f32.mrb[100].mxu0 }
 0x25e   :  { %v7808_v5 = vpop.f32.mrb[101].mxu0 }
 0x25f   :  { %v7809_v3 = vadd.f32 %v7808_v5, %v7807_v51 }
 0x261   :  { %v2639_v16 = vadd.f32 %v7809_v3, %v2471_v34 }
 0x263   :  { %v7842_v11 = vpop.f32.mrb[100].mxu1 }
 0x264   :  { %v7843_v56 = vpop.f32.mrb[101].mxu1 }
 0x265   :  { %v7844_v23 = vadd.f32 %v7843_v56, %v7842_v11 }
 0x267   :  { %v2743_v63 = vadd.f32 %v7844_v23, %v2639_v16 }
 0x269   :  { %v2747_v6 = vcombine.high %v2743_v63, %v2743_v63  ;;  %v2754_v8 = vrot.slane %v2743_v63, %v10625_v45 }
 0x26b   :  { %v2761_v36 = vrot.slane %v2747_v6, %v10625_v45  ;;  %v2762_v19 = vcombine.high %v2754_v8, %v2754_v8  ;;  %v2770_v14 = vrot.slane %v2754_v8, %v10625_v45 }
 0x26d   :  { %v2763_v15 = vcombine.high %v2761_v36, %v2761_v36  ;;  %v2777_v18 = vrot.slane %v2761_v36, %v10625_v45  ;;  %v2784_v9 = vrot.slane %v2762_v19, %v10625_v45  ;;  %v2792_v22 = vcombine.high %v2770_v14, %v2770_v14 }
 0x26e   :  { %v2799_v7 = vrot.slane %v2770_v14, %v2798_v42 }
 0x26f   :  { %v2791_v35 = vrot.slane %v2763_v15, %v10625_v45  ;;  %v2793_v62 = vcombine.high %v2777_v18, %v2777_v18  ;;  %v2794_v55 = vcombine.high %v2784_v9, %v2784_v9  ;;  %v2803_v4 = vrot.slane %v2784_v9, %v2798_v42 }
 0x270   :  { %v2807_v28 = vrot.slane %v2792_v22, %v2798_v42  ;;  %v2815_v26 = vrot.slane %v2777_v18, %v2798_v42  ;;  %v2836_v47 = vadd.f32 %v2799_v7, %v10572_v54  ;;  %v2837_v52 = vadd.f32 %v2799_v7, %v10575_v44 }
 0x271   :  { %v2795_v37 = vcombine.high %v2791_v35, %v2791_v35  ;;  %v2811_v34 = vrot.slane %v2794_v55, %v2798_v42  ;;  %v2819_v51 = vrot.slane %v2791_v35, %v2798_v42  ;;  %v2823_v38 = vrot.slane %v2793_v62, %v2798_v42 }
 0x272   :  { %v2839_v32 = vadd.f32 %v2803_v4, %v10581_v46  ;;  %v2840_v5 = vadd.f32 %v2807_v28, %v10584_v21  ;;  %v2841_v3 = vadd.f32 %v2807_v28, %v10587_v59  ;;  %v2844_v16 = vadd.f32 %v2815_v26, %v10596_v48 }
 0x273   :  { %v2827_v13 = vrot.slane %v2795_v37, %v2798_v42  ;;  %v2845_v11 = vadd.f32 %v2815_v26, %v10599_v27  ;;  %v2838_v56 = vadd.f32 %v2803_v4, %v10578_v40  ;;  %8512 = vtanh.f32 %v2836_v47  ;;  %v7154_v40 = vld [vmem:[%s11076_s5] ss:$0 sm:$0xff]  ;;  %s8676_s5 = smov [#allocation10]  }
 0x274   :  { %v2842_v54 = vadd.f32 %v2811_v34, %v10590_v25  ;;  %v2843_v44 = vadd.f32 %v2811_v34, %v10593_v30  ;;  %v2846_v23 = vadd.f32 %v2819_v51, %v10602_v31  ;;  %v2847_v46 = vadd.f32 %v2819_v51, %v10605_v24  ;;  %s7142_s23 = sshll.u32 %s8676_s5, 4  ;;  %s7143_s23 = int_to_ptr.vmem [resolvable:$true] %s7142_s23 }
 0x275   :  { %8514 = vtanh.f32 %v2838_v56  ;;  %v2848_v21 = vadd.f32 %v2823_v38, %v10608_v33  ;;  %v2849_v59 = vadd.f32 %v2823_v38, %v10611_v49  ;;  %v2850_v48 = vadd.f32 %v2827_v13, %v10614_v41  ;;  %s8636_s25 = scalar_lea.vmem %s7143_s23, 256  ;;  %p8641_p5 = scmp.lt.s32.totalorder %s7143_s23, %s7143_s23 }
 0x276   :  { %8516 = vtanh.f32 %v2837_v52  ;;  %v2851_v27 = vadd.f32 %v2827_v13, %v10619_v10  ;;  %v2924_v56 = vand.u32 127, %v2751_v58  ;;  %p8637_p4 = scmp.ne.s32.totalorder %s7143_s23, %s8636_s25  ;;  %p8642_p6 = scmp.lt.s32.totalorder %s8636_s25, %s8636_s25 }
 0x277   :  { %8518 = vtanh.f32 %v2839_v32 }
 0x278   :  { %8520 = vtanh.f32 %v2840_v5  ;;  %vm2925_vm8 = vcmp.lt.s32.totalorder %v2924_v56, 12  ;;  %p8643_p7 = por %p8642_p6, %p8641_p5 }
 0x279   :  { %8522 = vtanh.f32 %v2841_v3 }
 0x27a   :  { %8524 = vtanh.f32 %v2844_v16  ;;  %p8644_p8 = pnand %p8643_p7, %p8637_p4 }
 0x27b   :  { %8526 = vtanh.f32 %v2845_v11 }
 0x27c   :  { %8528 = vtanh.f32 %v2842_v54  ;;  %v2946_v54 = vadd.s32 4294967288, %v2924_v56 }
 0x27d   :  { %v8513_v25 = vpop.eup %8512  ;;  %8530 = vtanh.f32 %v2843_v44 }
 0x27e   :  { %v2875_v31 = vmul.f32 %v8513_v25, %v7154_v40  ;;  %8532 = vtanh.f32 %v2846_v23 }
 0x27f   :  { %v8515_v30 = vpop.eup %8514  ;;  %8534 = vtanh.f32 %v2847_v46  ;;  %v2949_v46 = vsub.s32 %v2946_v54, %v10622_v12 }
 0x280   :  { %v8517_v24 = vpop.eup %8516  ;;  %v2877_v33 = vmul.f32 %v8515_v30, %v7154_v40  ;;  %2891 = vadd.xlane.f32.xlu0 %v2875_v31  ;;  %8536 = vtanh.f32 %v2848_v21 }
 0x281   :  { %v8519_v49 = vpop.eup %8518  ;;  %v2876_v41 = vmul.f32 %v8517_v24, %v7154_v40  ;;  %8538 = vtanh.f32 %v2849_v59 }
 0x282   :  { %2895 = vadd.xlane.f32.xlu1 %v2877_v33  ;;  %v8521_v10 = vpop.eup %8520  ;;  %v2878_v63 = vmul.f32 %v8519_v49, %v7154_v40  ;;  %8540 = vtanh.f32 %v2850_v48  ;;  %v2944_v48 = vsub.s32 %v2924_v56, %v10622_v12 }
 0x283   :  { %v8523_v6 = vpop.eup %8522  ;;  %v2879_v8 = vmul.f32 %v8521_v10, %v7154_v40  ;;  %8542 = vtanh.f32 %v2851_v27 }
 0x284   :  { %2893 = vadd.xlane.f32.xlu0 %v2876_v41  ;;  %v8525_v42 = vpop.eup %8524  ;;  %v2880_v36 = vmul.f32 %v8523_v6, %v7154_v40 }
 0x285   :  { %v8527_v19 = vpop.eup %8526  ;;  %v2883_v14 = vmul.f32 %v8525_v42, %v7154_v40 }
 0x286   :  { %2897 = vadd.xlane.f32.xlu1 %v2878_v63  ;;  %v8529_v15 = vpop.eup %8528  ;;  %v2884_v18 = vmul.f32 %v8527_v19, %v7154_v40 }
 0x287   :  { %v8531_v9 = vpop.eup %8530  ;;  %v2881_v22 = vmul.f32 %v8529_v15, %v7154_v40 }
 0x288   :  { %2899 = vadd.xlane.f32.xlu0 %v2879_v8  ;;  %v8533_v7 = vpop.eup %8532  ;;  %v2882_v35 = vmul.f32 %v8531_v9, %v7154_v40 }
 0x289   :  { %v8535_v62 = vpop.eup %8534  ;;  %v2885_v55 = vmul.f32 %v8533_v7, %v7154_v40 }
 0x28a   :  { %2901 = vadd.xlane.f32.xlu1 %v2880_v36  ;;  %v8537_v4 = vpop.eup %8536  ;;  %v2886_v28 = vmul.f32 %v8535_v62, %v7154_v40 }
 0x28b   :  { %v8539_v26 = vpop.eup %8538  ;;  %v2887_v47 = vmul.f32 %v8537_v4, %v7154_v40 }
 0x28c   :  { %2907 = vadd.xlane.f32.xlu0 %v2883_v14  ;;  %v8541_v52 = vpop.eup %8540  ;;  %v2888_v37 = vmul.f32 %v8539_v26, %v7154_v40 }
 0x28d   :  { %v8543_v34 = vpop.eup %8542  ;;  %v2889_v51 = vmul.f32 %v8541_v52, %v7154_v40 }
 0x28e   :  { %2909 = vadd.xlane.f32.xlu1 %v2884_v18  ;;  %v2890_v38 = vmul.f32 %v8543_v34, %v7154_v40 }
 0x290   :  { %2903 = vadd.xlane.f32.xlu0 %v2881_v22 }
 0x292   :  { %2905 = vadd.xlane.f32.xlu1 %v2882_v35 }
 0x294   :  { %2911 = vadd.xlane.f32.xlu0 %v2885_v55 }
 0x296   :  { %2913 = vadd.xlane.f32.xlu1 %v2886_v28 }
 0x298   :  { %2915 = vadd.xlane.f32.xlu0 %v2887_v47 }
 0x29a   :  { %2917 = vadd.xlane.f32.xlu1 %v2888_v37 }
 0x29c   :  { %2919 = vadd.xlane.f32.xlu0 %v2889_v51 }
 0x29e   :  { %2921 = vadd.xlane.f32.xlu1 %v2890_v38 }
 0x30d   :  { %v2892_v32 = vpop.xlane.xlu0 %2891 }
 0x30e   :  { %v2945_v41 = vrot.slane %v2892_v32, %v2944_v48 }
 0x30f   :  { %v2896_v5 = vpop.xlane.xlu1 %2895 }
 0x310   :  { %v2956_v25 = vrot.slane %v2896_v5, %v2944_v48 }
 0x311   :  { %v2894_v3 = vpop.xlane.xlu0 %2893 }
 0x312   :  { %v2950_v30 = vrot.slane %v2894_v3, %v2949_v46 }
 0x313   :  { %v2898_v16 = vpop.xlane.xlu1 %2897 }
 0x314   :  { %v2960_v27 = vrot.slane %v2898_v16, %v2949_v46  ;;  %v2952_v6 = vsel %vm2951_vm0, %v2950_v30, %v2945_v41  ;;  %v11949_v30 = vld [vmem:[#allocation59_spill] sm:$0xff]  ;;  %v11954_v41 = vld [vmem:[#allocation76_spill] sm:$0xff] }
 0x315   :  { %v2900_v13 = vpop.xlane.xlu0 %2899 }
 0x316   :  { %v2965_v33 = vrot.slane %v2900_v13, %v2944_v48  ;;  %v2961_v58 = vsel %vm2951_vm0, %v2960_v27, %v2956_v25  ;;  %v11948_v27 = vld [vmem:[#allocation58_spill] sm:$0xff]  ;;  %v8675_v25 = vmov 0.0  }
 0x317   :  { %v2902_v11 = vpop.xlane.xlu1 %2901  ;;  %v3017_v36 = vsel %vm3016_vm1, %v2961_v58, %v2952_v6  ;;  %3164 = vmatprep.mubr.f32.mxu0 %v8675_v25  ;;  %3657 = vmatprep.mubr.f32.mxu1 %v8675_v25  ;;  %v11955_v58 = vld [vmem:[#allocation80_spill] sm:$0xff] }
 0x318   :  { %v2969_v40 = vrot.slane %v2902_v11, %v2949_v46 }
 0x319   :  { %v2908_v44 = vpop.xlane.xlu0 %2907 }
 0x31a   :  { %v2970_v63 = vsel %vm2951_vm0, %v2969_v40, %v2965_v33  ;;  %v2983_v22 = vrot.slane %v2908_v44, %v2944_v48  ;;  %v11944_v44 = vld [vmem:[#allocation43_spill] sm:$0xff]  ;;  %v10683_v40 = vpack.c.bf16 %v11830_v60, %v11948_v27  ;;  %v11951_v33 = vld [vmem:[#allocation54_spill] sm:$0xff]  ;;  %v11952_v60 = vld [vmem:[#allocation53_spill] sm:$0xff] }
 0x31b   :  { %v2910_v23 = vpop.xlane.xlu1 %2909  ;;  %v3019_v15 = vsel %vm3018_vm2, %v2970_v63, %v3017_v36  ;;  %v11970_v27 = vld [vmem:[#allocation49_spill] sm:$0xff] }
 0x31c   :  { %v2987_v19 = vrot.slane %v2910_v23, %v2949_v46  ;;  %v11945_v23 = vld [vmem:[#allocation44_spill] sm:$0xff]  ;;  %8254 = vmatprep.subr.bf16.mxu1 %v10683_v40 }
 0x31d   :  { %v2904_v21 = vpop.xlane.xlu0 %2903 }
 0x31e   :  { %v2974_v10 = vrot.slane %v2904_v21, %v2944_v48  ;;  %v2988_v4 = vsel %vm2951_vm0, %v2987_v19, %v2983_v22  ;;  %v11946_v21 = vld [vmem:[#allocation45_spill] sm:$0xff] }
 0x31f   :  { %v2906_v59 = vpop.xlane.xlu1 %2905 }
 0x320   :  { %v2978_v31 = vrot.slane %v2906_v59, %v2949_v46  ;;  %v11947_v59 = vld [vmem:[#allocation52_spill] sm:$0xff] }
 0x321   :  { %v2912_v24 = vpop.xlane.xlu0 %2911 }
 0x322   :  { %v2979_v12 = vsel %vm2951_vm0, %v2978_v31, %v2974_v10  ;;  %v2992_v18 = vrot.slane %v2912_v24, %v2944_v48  ;;  %v11950_v31 = vld [vmem:[#allocation63_spill] sm:$0xff]  ;;  %v8257_v10 = vpack.c.bf16 %v11955_v58, %v11954_v41 }
 0x323   :  { %v2914_v49 = vpop.xlane.xlu1 %2913  ;;  %v3021_v7 = vsel %vm3020_vm3, %v2979_v12, %v3019_v15  ;;  %v10688_v24 = vpack.c.bf16 %v11950_v31, %v11949_v30  ;;  %v11971_v30 = vld [vmem:[#allocation50_spill] sm:$0xff]  ;;  %v11974_v58 = vld [vmem:[#allocation51_spill] sm:$0xff] }
 0x324   :  { %v2996_v8 = vrot.slane %v2914_v49, %v2949_v46  ;;  %v3023_v37 = vsel %vm3022_vm4, %v2988_v4, %v3021_v7  ;;  %v11953_v49 = vpack.c.bf16 %v11951_v33, %v11952_v60  ;;  %v8245_v31 = vpack.c.bf16 %v11971_v30, %v11970_v27  ;;  %v11972_v33 = vld [vmem:[#allocation66_spill] sm:$0xff]  ;;  %v11973_v60 = vld [vmem:[#allocation69_spill] sm:$0xff]  ;;  %v11998_v30 = vld [vmem:[#allocation100_spill] sm:$0xff] }
 0x325   :  { %v2916_v42 = vpop.xlane.xlu0 %2915  ;;  %8256 = vmatpush1.bf16.msra.mxu1 %v10688_v24  ;;  %v11997_v27 = vld [vmem:[#allocation94_spill] sm:$0xff] }
 0x326   :  { %v3001_v35 = vrot.slane %v2916_v42, %v2944_v48  ;;  %v2997_v62 = vsel %vm2951_vm0, %v2996_v8, %v2992_v18  ;;  %8258 = vmatprep.subr.bf16.mxu1 %v8257_v10  ;;  %v11975_v10 = vld [vmem:[#allocation57_spill] sm:$0xff] }
 0x327   :  { %v2918_v14 = vpop.xlane.xlu1 %2917  ;;  %v3025_v34 = vsel %vm3024_vm5, %v2997_v62, %v3023_v37 }
 0x328   :  { %v3005_v9 = vrot.slane %v2918_v14, %v2949_v46 }
 0x329   :  { %v2920_v55 = vpop.xlane.xlu0 %2919 }
 0x32a   :  { %v3006_v28 = vsel %vm2951_vm0, %v3005_v9, %v3001_v35  ;;  %v3010_v47 = vrot.slane %v2920_v55, %v2944_v48  ;;  %v10679_v48 = vpack.c.bf16 %v11947_v59, %v11946_v21  ;;  %v11969_v21 = vld [vmem:[#allocation67_spill] sm:$0xff] }
 0x32b   :  { %v2922_v26 = vpop.xlane.xlu1 %2921  ;;  %v3027_v38 = vsel %vm3026_vm6, %v3006_v28, %v3025_v34  ;;  %v11958_v34 = vld [vmem:[#allocation62_spill] sm:$0xff] }
 0x32c   :  { %v3014_v52 = vrot.slane %v2922_v26, %v2949_v46  ;;  %v10675_v46 = vpack.c.bf16 %v11945_v23, %v11944_v44  ;;  %v11956_v26 = vld [vmem:[#allocation46_spill] sm:$0xff]  ;;  %v11968_v23 = vld [vmem:[#allocation64_spill] sm:$0xff] }
 0x32d   :  { %v8263_v59 = vpack.c.bf16 %v11969_v21, %v11968_v23  ;;  %v11995_v23 = vld [vmem:[#allocation77_spill] sm:$0xff]  ;;  %v11996_v21 = vld [vmem:[#allocation82_spill] sm:$0xff] }
 0x32e   :  { %v3015_v51 = vsel %vm2951_vm0, %v3014_v52, %v3010_v47  ;;  %8230 = vmatprep.subr.bf16.mxu0 %v10675_v46  ;;  %v11957_v47 = vld [vmem:[#allocation47_spill] sm:$0xff] }
 0x32f   :  { %v3029_v32 = vsel %vm3028_vm7, %v3015_v51, %v3027_v38  ;;  %8232 = vmatpush1.bf16.msra.mxu0 %v10679_v48  ;;  %v8237_v52 = vpack.c.bf16 %v11957_v47, %v11956_v26  ;;  %v11959_v51 = vld [vmem:[#allocation65_spill] sm:$0xff] }
 0x330   :  { %v3031_v5 = vsel %vm2925_vm8, %v3029_v32, -1e+30  ;;  %8234 = vmatprep.subr.bf16.mxu0 %v11953_v49  ;;  %v8261_v38 = vpack.c.bf16 %v11959_v51, %v11958_v34  ;;  %v11960_v32 = vld [vmem:[#allocation61_spill] sm:$0xff]  ;;  %v8269_v49 = vpack.c.bf16 %v11973_v60, %v11972_v33  ;;  %v11983_v34 = vld [vmem:[#allocation107_spill] sm:$0xff]  ;;  %v11984_v51 = vld [vmem:[#allocation120_spill] sm:$0xff] }
 0x331   :  { %v3033_v3 = vsel %vm3032_vm9, %v3031_v5, -inf  ;;  %v11981_v26 = vld [vmem:[#allocation89_spill] sm:$0xff] }
 0x332   :  { %3034 = vmax.xlane.f32.xlu0 %v3033_v3  ;;  %v11982_v47 = vld [vmem:[#allocation93_spill] sm:$0xff] }
 0x3bf   :  { %v3035_v16 = vpop.xlane.xlu0 %3034 }
 0x3c0   :  { %v3036_v13 = vsub.f32 %v3031_v5, %v3035_v16  ;;  %v11961_v5 = vld [vmem:[#allocation56_spill] sm:$0xff]  ;;  %v11963_v16 = vld [vmem:[#allocation83_spill] sm:$0xff] }
 0x3c1   :  { %v11962_v3 = vpack.c.bf16 %v11960_v32, %v11961_v5  ;;  %v11985_v32 = vld [vmem:[#allocation74_spill] sm:$0xff] }
 0x3c2   :  { %v3037_v11 = vmul.f32 1.442695, %v3036_v13  ;;  %v11964_v13 = vld [vmem:[#allocation79_spill] sm:$0xff]  ;;  %v11986_v5 = vld [vmem:[#allocation78_spill] sm:$0xff] }
 0x3c4   :  { %8544 = vpow2.f32 %v3037_v11  ;;  %v11965_v11 = vpack.c.bf16 %v11963_v16, %v11964_v13  ;;  %v11989_v13 = vld [vmem:[#allocation96_spill] sm:$0xff] }
 0x3ce   :  { %v8545_v54 = vpop.eup %8544 }
 0x3cf   :  { %v3039_v56 = vsel %vm3032_vm9, %v8545_v54, 0.0 }
 0x3d0   :  { %3040 = vadd.xlane.f32.xlu1 %v3039_v56  ;;  %v11967_v56 = vld [vmem:[#allocation55_spill] sm:$0xff] }
 0x45d   :  { %v3041_v63 = vpop.xlane.xlu1 %3040 }
 0x45e   :  { %8546 = vrcp.f32 %v3041_v63  ;;  %v8247_v63 = vpack.c.bf16 %v11975_v10, %v11974_v58  ;;  %v12002_v10 = vld [vmem:[#allocation102_spill] sm:$0xff] }
 0x468   :  { %v8547_v6 = vpop.eup %8546 }
 0x469   :  { %v10700_v12 = vmul.f32 %v8547_v6, %v8545_v54  ;;  %v11966_v54 = vld [vmem:[#allocation48_spill] sm:$0xff] }
 0x46a   :  { %v8239_v44 = vpack.c.bf16 %v11967_v56, %v11966_v54  ;;  %v11993_v56 = vld [vmem:[#allocation112_spill] sm:$0xff] }
 0x46b   :  { %v3052_v8 = vrot.slane %v10700_v12, %v10625_v45  ;;  %v3045_v33 = vcombine.high %v10700_v12, %v10700_v12  ;;  %v12001_v12 = vld [vmem:[#allocation97_spill] sm:$0xff] }
 0x46d   :  { %v3060_v42 = vcombine.high %v3052_v8, %v3052_v8  ;;  %v3068_v36 = vrot.slane %v3052_v8, %v10625_v45  ;;  %v11976_v8 = vld [vmem:[#allocation68_spill] sm:$0xff]  ;;  %v3059_v60 = vrot.slane %v3045_v33, %v10625_v45 }
 0x46f   :  { %v3094_v19 = vsel %vm3032_vm9, %v3068_v36, 0  ;;  %v3082_v14 = vrot.slane %v3060_v42, %v10625_v45  ;;  %v3090_v41 = vcombine.high %v3068_v36, %v3068_v36  ;;  %v11977_v42 = vld [vmem:[#allocation71_spill] sm:$0xff] }
 0x470   :  { %v10707_v15 = vand.u32 4294901760, %v3094_v19 }
 0x471   :  { %v3587_v18 = vsel %vm3032_vm9, %v3082_v14, 0  ;;  %v3092_v6 = vcombine.high %v3082_v14, %v3082_v14 }
 0x472   :  { %v3166_v9 = vsub.f32 %v3094_v19, %v10707_v15  ;;  %v10711_v22 = vand.u32 4294901760, %v3587_v18  ;;  %v8271_v19 = vpack.c.bf16 %v11977_v42, %v11976_v8  ;;  %v10838_v8 = vrot.slane %v3059_v60, %v10625_v45  ;;  %v12003_v42 = vld [vmem:[#allocation84_spill] sm:$0xff] }
 0x474   :  { %v3167_v7 = vand.u32 4294901760, %v3166_v9  ;;  %v3659_v35 = vsub.f32 %v3587_v18, %v10711_v22  ;;  %v4080_v18 = vsel %vm3032_vm9, %v3090_v41, 0  ;;  %v12000_v41 = vld [vmem:[#allocation85_spill] sm:$0xff] }
 0x475   :  { %v10752_v36 = vand.u32 4294901760, %v4080_v18 }
 0x476   :  { %v3168_v62 = vsub.f32 %v3166_v9, %v3167_v7  ;;  %v3660_v55 = vand.u32 4294901760, %v3659_v35 }
 0x478   :  { %v3169_v4 = vand.u32 4294901760, %v3168_v62  ;;  %v3661_v28 = vsub.f32 %v3659_v35, %v3660_v55  ;;  %v11979_v62 = vld [vmem:[#allocation73_spill] sm:$0xff] }
 0x47a   :  { %3170 = vmatmul.mubr.f32.vlgmr.msra.gmra.mrb[102].mxu0 %v3169_v4  ;;  %v3662_v37 = vand.u32 4294901760, %v3661_v28  ;;  %v10763_v4 = vsub.f32 %v4080_v18, %v10752_v36 }
 0x47b   :  { %8236 = vmatpush1.bf16.msra.mxu0 %v11962_v3  ;;  %3260 = vmatprep.mubr.f32.mxu0 %v8675_v25  ;;  %v8285_v3 = vpack.c.bf16 %v11986_v5, %v11985_v32  ;;  %v12013_v32 = vld [vmem:[#allocation138_spill] sm:$0xff] }
 0x47c   :  { %3663 = vmatmul.mubr.f32.vlgmr.msra.gmra.mrb[102].mxu1 %v3662_v37  ;;  %8238 = vmatprep.subr.bf16.mxu0 %v8237_v52  ;;  %v8281_v52 = vpack.c.bf16 %v11982_v47, %v11981_v26  ;;  %v10791_v37 = vpack.c.bf16 %v11887_v29, %v11881_v57  ;;  %v11987_v29 = vld [vmem:[#allocation90_spill] sm:$0xff] }
 0x47d   :  { %8260 = vmatpush1.bf16.msra.mxu1 %v11965_v11  ;;  %3753 = vmatprep.mubr.f32.mxu1 %v8675_v25  ;;  %v11990_v11 = vld [vmem:[#allocation92_spill] sm:$0xff] }
 0x47e   :  { %8262 = vmatprep.subr.bf16.mxu1 %v8261_v38  ;;  %v8305_v38 = vpack.c.bf16 %v11984_v51, %v11983_v34  ;;  %v11991_v54 = vpack.c.bf16 %v11989_v13, %v11990_v11  ;;  %v12010_v34 = vld [vmem:[#allocation103_spill] sm:$0xff]  ;;  %v12011_v51 = vld [vmem:[#allocation109_spill] sm:$0xff] }
 0x482   :  { %3262 = vmatmul.mubr.f32.vlgmr.msra.gmra.mrb[102].mxu0 %v10707_v15 }
 0x483   :  { %8240 = vmatpush1.bf16.msra.mxu0 %v8239_v44  ;;  %3340 = vmatprep.mubr.f32.mxu0 %v8675_v25 }
 0x484   :  { %3755 = vmatmul.mubr.f32.vlgmr.msra.gmra.mrb[102].mxu1 %v10711_v22  ;;  %8242 = vmatprep.subr.bf16.mxu0 %v10675_v46 }
 0x485   :  { %8264 = vmatpush1.bf16.msra.mxu1 %v8263_v59  ;;  %3833 = vmatprep.mubr.f32.mxu1 %v8675_v25  ;;  %v8287_v59 = vpack.c.bf16 %v11996_v21, %v11995_v23  ;;  %v12021_v23 = vld [vmem:[#allocation131_spill] sm:$0xff] }
 0x486   :  { %8266 = vmatprep.subr.bf16.mxu1 %v10683_v40 }
 0x48a   :  { %3343 = vmatmul.mubr.f32.vlgmr.msra.gmra.mrb[102].mxu0 %v3166_v9  ;;  %v4573_v9 = vsel %vm3032_vm9, %v3092_v6, 0  ;;  %v3061_v6 = vcombine.high %v3059_v60, %v3059_v60  ;;  %v12028_v60 = vld [vmem:[#allocation108_spill] sm:$0xff] }
 0x48b   :  { %8244 = vmatpush1.bf16.msra.mxu0 %v10679_v48  ;;  %3417 = vmatprep.mubr.f32.mxu0 %v8675_v25  ;;  %v10756_v14 = vand.u32 4294901760, %v4573_v9 }
 0x48c   :  { %3836 = vmatmul.mubr.f32.vlgmr.msra.gmra.mrb[102].mxu1 %v3659_v35  ;;  %8246 = vmatprep.subr.bf16.mxu0 %v8245_v31  ;;  %v11978_v35 = vld [vmem:[#allocation70_spill] sm:$0xff]  ;;  %v8311_v31 = vpack.c.bf16 %v11998_v30, %v11997_v27  ;;  %v12023_v27 = vld [vmem:[#allocation125_spill] sm:$0xff] }
 0x48d   :  { %8268 = vmatpush1.bf16.msra.mxu1 %v10688_v24  ;;  %3910 = vmatprep.mubr.f32.mxu1 %v8675_v25 }
 0x48e   :  { %8270 = vmatprep.subr.bf16.mxu1 %v8269_v49  ;;  %v11999_v49 = vld [vmem:[#allocation81_spill] sm:$0xff] }
 0x48f   :  { %v8293_v58 = vpack.c.bf16 %v12000_v41, %v11999_v49  ;;  %v12029_v49 = vld [vmem:[#allocation114_spill] sm:$0xff] }
 0x490   :  { %v8335_v41 = vpack.c.bf16 %v12029_v49, %v12028_v60  ;;  %v12061_v60 = vld [vmem:[#allocation150_spill] sm:$0xff] }
 0x492   :  { %3421 = vmatmul.mubr.f32.vlgmr.msra.gmra.mrb[102].mxu0 %v3167_v7  ;;  %v10760_v7 = vpack.c.bf16 %v11979_v62, %v11978_v35  ;;  %v12005_v35 = vld [vmem:[#allocation99_spill] sm:$0xff]  ;;  %v12006_v62 = vld [vmem:[#allocation104_spill] sm:$0xff] }
 0x493   :  { %8248 = vmatpush1.bf16.msra.mxu0 %v8247_v63  ;;  %3503 = vmatprep.mubr.f32.mxu0 %v8675_v25  ;;  %v8317_v63 = vpack.c.bf16 %v12002_v10, %v12001_v12  ;;  %v12031_v12 = vld [vmem:[#allocation132_spill] sm:$0xff] }
 0x494   :  { %3914 = vmatmul.mubr.f32.vlgmr.msra.gmra.mrb[102].mxu1 %v3660_v55  ;;  %8250 = vmatprep.subr.bf16.mxu0 %v10675_v46  ;;  %v10768_v46 = vpack.c.bf16 %v11882_v61, %v11870_v2  ;;  %v10771_v55 = vsub.f32 %v4573_v9, %v10756_v14  ;;  %v11980_v61 = vld [vmem:[#allocation72_spill] sm:$0xff]  ;;  %v10843_v9 = vrot.slane %v3061_v6, %v10625_v45 }
 0x495   :  { %8272 = vmatpush1.bf16.msra.mxu1 %v8271_v19  ;;  %3996 = vmatprep.mubr.f32.mxu1 %v8675_v25  ;;  %v10784_v28 = vpack.c.bf16 %v11867_v43, %v11980_v61  ;;  %v12004_v19 = vld [vmem:[#allocation86_spill] sm:$0xff]  ;;  %v12033_v6 = vld [vmem:[#allocation116_spill] sm:$0xff] }
 0x496   :  { %8274 = vmatprep.subr.bf16.mxu1 %v10683_v40  ;;  %v4153_v40 = vand.u32 4294901760, %v10763_v4  ;;  %v4646_v2 = vand.u32 4294901760, %v10771_v55  ;;  %v8295_v18 = vpack.c.bf16 %v12004_v19, %v12003_v42  ;;  %v5559_v61 = vsel %vm3032_vm9, %v10843_v9, 0  ;;  %v12034_v19 = vld [vmem:[#allocation128_spill] sm:$0xff] }
 0x497   :  { %v10857_v45 = vand.u32 4294901760, %v5559_v61 }
 0x49a   :  { %3505 = vmatmul.mubr.f32.vlgmr.msra.gmra.mrb[102].mxu0 %v10707_v15 }
 0x49b   :  { %8252 = vmatpush1.bf16.msra.mxu0 %v10679_v48  ;;  %3579 = vmatprep.mubr.f32.mxu0 %v8675_v25  ;;  %v4154_v48 = vsub.f32 %v10763_v4, %v4153_v40 }
 0x49c   :  { %3998 = vmatmul.mubr.f32.vlgmr.msra.gmra.mrb[102].mxu1 %v10711_v22  ;;  %8278 = vmatprep.subr.bf16.mxu0 %v10760_v7 }
 0x49d   :  { %8276 = vmatpush1.bf16.msra.mxu1 %v10688_v24  ;;  %4072 = vmatprep.mubr.f32.mxu1 %v8675_v25  ;;  %v4647_v24 = vsub.f32 %v10771_v55, %v4646_v2  ;;  %v4155_v43 = vand.u32 4294901760, %v4154_v48 }
 0x49e   :  { %8302 = vmatprep.subr.bf16.mxu1 %v10768_v46 }
 0x49f   :  { %v4648_v57 = vand.u32 4294901760, %v4647_v24  ;;  %v10872_v24 = vsub.f32 %v5559_v61, %v10857_v45 }
 0x4a2   :  { %3581 = vmatmul.mubr.f32.vlgmr.msra.gmra.mrb[102].mxu0 %v10707_v15  ;;  %v11988_v15 = vld [vmem:[#allocation98_spill] sm:$0xff] }
 0x4a3   :  { %8280 = vmatpush1.bf16.msra.mxu0 %v10784_v28  ;;  %4150 = vmatprep.mubr.f32.mxu0 %v8675_v25  ;;  %v8309_v16 = vpack.c.bf16 %v11988_v15, %v11987_v29  ;;  %v12016_v15 = vld [vmem:[#allocation146_spill] sm:$0xff] }
 0x4a4   :  { %4074 = vmatmul.mubr.f32.vlgmr.msra.gmra.mrb[102].mxu1 %v10711_v22  ;;  %8282 = vmatprep.subr.bf16.mxu0 %v8281_v52  ;;  %v11992_v22 = vld [vmem:[#allocation115_spill] sm:$0xff] }
 0x4a5   :  { %8304 = vmatpush1.bf16.msra.mxu1 %v10791_v37  ;;  %4643 = vmatprep.mubr.f32.mxu1 %v8675_v25  ;;  %v11994_v44 = vpack.c.bf16 %v11992_v22, %v11993_v56  ;;  %v12019_v22 = vld [vmem:[#allocation111_spill] sm:$0xff] }
 0x4a6   :  { %4156 = vmatmul.mubr.f32.vlgmr.msra.gmra.mrb[104].mxu0 %v4155_v43  ;;  %8306 = vmatprep.subr.bf16.mxu1 %v8305_v38  ;;  %v10885_v38 = vpack.c.bf16 %v12011_v51, %v12010_v34  ;;  %v12012_v43 = vld [vmem:[#allocation122_spill] sm:$0xff] }
 0x4a7   :  { %8284 = vmatpush1.bf16.msra.mxu0 %v11991_v54  ;;  %4246 = vmatprep.mubr.f32.mxu0 %v8675_v25  ;;  %v8329_v5 = vpack.c.bf16 %v12013_v32, %v12012_v43  ;;  %v12018_v54 = vld [vmem:[#allocation105_spill] sm:$0xff]  ;;  %v12040_v51 = vld [vmem:[#allocation130_spill] sm:$0xff] }
 0x4a8   :  { %4649 = vmatmul.mubr.f32.vlgmr.msra.gmra.mrb[104].mxu1 %v4648_v57  ;;  %8286 = vmatprep.subr.bf16.mxu0 %v8285_v3  ;;  %v12014_v3 = vld [vmem:[#allocation119_spill] sm:$0xff]  ;;  %v12015_v57 = vld [vmem:[#allocation126_spill] sm:$0xff]  ;;  %v8333_v56 = vpack.c.bf16 %v12019_v22, %v12018_v54 }
 0x4a9   :  { %8308 = vmatpush1.bf16.msra.mxu1 %v11994_v44  ;;  %4739 = vmatprep.mubr.f32.mxu1 %v8675_v25  ;;  %v10892_v29 = vpack.c.bf16 %v12015_v57, %v12014_v3  ;;  %v12020_v44 = vld [vmem:[#allocation121_spill] sm:$0xff]  ;;  %v12042_v32 = vld [vmem:[#allocation22_spill] sm:$0xff]  ;;  %v8399_v3 = vpack.c.bf16 %v11906_v53, %v11904_v39  ;;  %v12050_v22 = vld [vmem:[#allocation151_spill] sm:$0xff] }
 0x4aa   :  { %8310 = vmatprep.subr.bf16.mxu1 %v8309_v16  ;;  %v12017_v16 = vld [vmem:[#allocation41_spill] sm:$0xff]  ;;  %v8357_v21 = vpack.c.bf16 %v12021_v23, %v12020_v44  ;;  %v12048_v39 = vld [vmem:[#allocation154_spill] sm:$0xff] }
 0x4ab   :  { %v8353_v13 = vpack.c.bf16 %v12017_v16, %v12016_v15  ;;  %v12054_v44 = vld [vmem:[#allocation157_spill] sm:$0xff] }
 0x4ae   :  { %4248 = vmatmul.mubr.f32.vlgmr.msra.gmra.mrb[104].mxu0 %v10752_v36 }
 0x4af   :  { %8288 = vmatpush1.bf16.msra.mxu0 %v8287_v59  ;;  %4326 = vmatprep.mubr.f32.mxu0 %v8675_v25  ;;  %v12022_v59 = vld [vmem:[#allocation127_spill] sm:$0xff] }
 0x4b0   :  { %4741 = vmatmul.mubr.f32.vlgmr.msra.gmra.mrb[104].mxu1 %v10756_v14  ;;  %8290 = vmatprep.subr.bf16.mxu0 %v10760_v7  ;;  %v12024_v30 = vpack.c.bf16 %v12022_v59, %v12023_v27  ;;  %v12057_v59 = vld [vmem:[#allocation37_spill] sm:$0xff] }
 0x4b1   :  { %8312 = vmatpush1.bf16.msra.mxu1 %v8311_v31  ;;  %4819 = vmatprep.mubr.f32.mxu1 %v8675_v25  ;;  %v12026_v31 = vld [vmem:[#allocation36_spill] sm:$0xff] }
 0x4b2   :  { %8314 = vmatprep.subr.bf16.mxu1 %v10768_v46 }
 0x4b6   :  { %4329 = vmatmul.mubr.f32.vlgmr.msra.gmra.mrb[104].mxu0 %v10763_v4  ;;  %v8319_v4 = vpack.c.bf16 %v12006_v62, %v12005_v35  ;;  %v3091_v62 = vcombine.high %v10838_v8, %v10838_v8 }
 0x4b7   :  { %8292 = vmatpush1.bf16.msra.mxu0 %v10784_v28  ;;  %4403 = vmatprep.mubr.f32.mxu0 %v8675_v25 }
 0x4b8   :  { %4822 = vmatmul.mubr.f32.vlgmr.msra.gmra.mrb[104].mxu1 %v10771_v55  ;;  %8294 = vmatprep.subr.bf16.mxu0 %v8293_v58  ;;  %v5066_v55 = vsel %vm3032_vm9, %v10838_v8, 0  ;;  %v12030_v58 = vld [vmem:[#allocation123_spill] sm:$0xff] }
 0x4b9   :  { %8316 = vmatpush1.bf16.msra.mxu1 %v10791_v37  ;;  %4896 = vmatprep.mubr.f32.mxu1 %v8675_v25  ;;  %v10853_v48 = vand.u32 4294901760, %v5066_v55  ;;  %v8359_v10 = vpack.c.bf16 %v12031_v12, %v12030_v58  ;;  %v12063_v58 = vld [vmem:[#allocation161_spill] sm:$0xff] }
 0x4ba   :  { %8318 = vmatprep.subr.bf16.mxu1 %v8317_v63  ;;  %v12032_v63 = vld [vmem:[#allocation110_spill] sm:$0xff] }
 0x4bb   :  { %v10864_v47 = vsub.f32 %v5066_v55, %v10853_v48  ;;  %v8341_v42 = vpack.c.bf16 %v12033_v6, %v12032_v63  ;;  %v12037_v55 = vld [vmem:[#allocation118_spill] sm:$0xff] }
 0x4bc   :  { %v12065_v63 = vld [vmem:[#allocation38_spill] sm:$0xff] }
 0x4be   :  { %4407 = vmatmul.mubr.f32.vlgmr.msra.gmra.mrb[104].mxu0 %v4153_v40  ;;  %v12007_v40 = vld [vmem:[#allocation106_spill] sm:$0xff] }
 0x4bf   :  { %8296 = vmatpush1.bf16.msra.mxu0 %v8295_v18  ;;  %4489 = vmatprep.mubr.f32.mxu0 %v8675_v25  ;;  %v10861_v26 = vpack.c.bf16 %v12007_v40, %v11888_v20  ;;  %v5139_v20 = vand.u32 4294901760, %v10864_v47  ;;  %v12035_v18 = vld [vmem:[#allocation140_spill] sm:$0xff]  ;;  %v3093_v40 = vcombine.high %v10843_v9, %v10843_v9 }
 0x4c0   :  { %4900 = vmatmul.mubr.f32.vlgmr.msra.gmra.mrb[104].mxu1 %v4646_v2  ;;  %8298 = vmatprep.subr.bf16.mxu0 %v10760_v7  ;;  %v12008_v2 = vld [vmem:[#allocation117_spill] sm:$0xff]  ;;  %v12009_v7 = vld [vmem:[#allocation124_spill] sm:$0xff]  ;;  %v8365_v35 = vpack.c.bf16 %v12035_v18, %v12034_v19 }
 0x4c1   :  { %8320 = vmatpush1.bf16.msra.mxu1 %v8319_v4  ;;  %4982 = vmatprep.mubr.f32.mxu1 %v8675_v25  ;;  %v10869_v52 = vpack.c.bf16 %v12009_v7, %v12008_v2  ;;  %v12036_v4 = vld [vmem:[#allocation113_spill] sm:$0xff]  ;;  %v12039_v2 = vld [vmem:[#allocation134_spill] sm:$0xff]  ;;  %v6545_v34 = vsel %vm3032_vm9, %v3093_v40, 0 }
 0x4c2   :  { %8322 = vmatprep.subr.bf16.mxu1 %v10768_v46  ;;  %v5632_v46 = vand.u32 4294901760, %v10872_v24  ;;  %v8343_v61 = vpack.c.bf16 %v12037_v55, %v12036_v4  ;;  %v10951_v9 = vand.u32 4294901760, %v6545_v34  ;;  %v12067_v19 = vld [vmem:[#allocation21_spill] sm:$0xff] }
 0x4c6   :  { %4491 = vmatmul.mubr.f32.vlgmr.msra.gmra.mrb[104].mxu0 %v10752_v36 }
 0x4c7   :  { %8300 = vmatpush1.bf16.msra.mxu0 %v10784_v28  ;;  %4565 = vmatprep.mubr.f32.mxu0 %v8675_v25  ;;  %v5140_v28 = vsub.f32 %v10864_v47, %v5139_v20 }
 0x4c8   :  { %4984 = vmatmul.mubr.f32.vlgmr.msra.gmra.mrb[104].mxu1 %v10756_v14  ;;  %8326 = vmatprep.subr.bf16.mxu0 %v10861_v26 }
 0x4c9   :  { %8324 = vmatpush1.bf16.msra.mxu1 %v10791_v37  ;;  %5058 = vmatprep.mubr.f32.mxu1 %v8675_v25  ;;  %v5633_v37 = vsub.f32 %v10872_v24, %v5632_v46  ;;  %v5141_v11 = vand.u32 4294901760, %v5140_v28 }
 0x4ca   :  { %8350 = vmatprep.subr.bf16.mxu1 %v10869_v52 }
 0x4ce   :  { %4567 = vmatmul.mubr.f32.vlgmr.msra.gmra.mrb[104].mxu0 %v10752_v36  ;;  %v5634_v36 = vand.u32 4294901760, %v5633_v37  ;;  %v12044_v37 = vld [vmem:[#allocation162_spill] sm:$0xff] }
 0x4cf   :  { %8328 = vmatpush1.bf16.msra.mxu0 %v10885_v38  ;;  %5136 = vmatprep.mubr.f32.mxu0 %v8675_v25 }
 0x4d0   :  { %5060 = vmatmul.mubr.f32.vlgmr.msra.gmra.mrb[104].mxu1 %v10756_v14  ;;  %8330 = vmatprep.subr.bf16.mxu0 %v8329_v5  ;;  %v12025_v14 = vld [vmem:[#allocation142_spill] sm:$0xff] }
 0x4d1   :  { %8352 = vmatpush1.bf16.msra.mxu1 %v10892_v29  ;;  %5629 = vmatprep.mubr.f32.mxu1 %v8675_v25  ;;  %v12027_v33 = vpack.c.bf16 %v12025_v14, %v12026_v31  ;;  %v12059_v14 = vld [vmem:[#allocation153_spill] sm:$0xff] }
 0x4d2   :  { %5142 = vmatmul.mubr.f32.vlgmr.msra.gmra.mrb[106].mxu0 %v5141_v11  ;;  %8354 = vmatprep.subr.bf16.mxu1 %v8353_v13  ;;  %v12047_v13 = vld [vmem:[#allocation144_spill] sm:$0xff] }
 0x4d3   :  { %8332 = vmatpush1.bf16.msra.mxu0 %v12024_v30  ;;  %5232 = vmatprep.mubr.f32.mxu0 %v8675_v25  ;;  %v12058_v30 = vld [vmem:[#allocation148_spill] sm:$0xff] }
 0x4d4   :  { %5635 = vmatmul.mubr.f32.vlgmr.msra.gmra.mrb[106].mxu1 %v5634_v36  ;;  %8334 = vmatprep.subr.bf16.mxu0 %v8333_v56  ;;  %v12051_v56 = vld [vmem:[#allocation42_spill] sm:$0xff]  ;;  %v8407_v31 = vpack.c.bf16 %v12059_v14, %v12058_v30 }
 0x4d5   :  { %8356 = vmatpush1.bf16.msra.mxu1 %v12027_v33  ;;  %5725 = vmatprep.mubr.f32.mxu1 %v8675_v25  ;;  %v12052_v36 = vpack.c.bf16 %v12050_v22, %v12051_v56  ;;  %v12060_v33 = vld [vmem:[#allocation143_spill] sm:$0xff] }
 0x4d6   :  { %8358 = vmatprep.subr.bf16.mxu1 %v8357_v21  ;;  %v12056_v21 = vld [vmem:[#allocation136_spill] sm:$0xff]  ;;  %v8389_v49 = vpack.c.bf16 %v12061_v60, %v12060_v33 }
 0x4d7   :  { %v8383_v27 = vpack.c.bf16 %v12057_v59, %v12056_v21 }
 0x4da   :  { %5234 = vmatmul.mubr.f32.vlgmr.msra.gmra.mrb[106].mxu0 %v10853_v48 }
 0x4db   :  { %8336 = vmatpush1.bf16.msra.mxu0 %v8335_v41  ;;  %5312 = vmatprep.mubr.f32.mxu0 %v8675_v25  ;;  %v12062_v41 = vld [vmem:[#allocation156_spill] sm:$0xff] }
 0x4dc   :  { %5727 = vmatmul.mubr.f32.vlgmr.msra.gmra.mrb[106].mxu1 %v10857_v45  ;;  %8338 = vmatprep.subr.bf16.mxu0 %v10861_v26  ;;  %v8413_v12 = vpack.c.bf16 %v12063_v58, %v12062_v41 }
 0x4dd   :  { %8360 = vmatpush1.bf16.msra.mxu1 %v8359_v10  ;;  %5805 = vmatprep.mubr.f32.mxu1 %v8675_v25  ;;  %v12064_v10 = vld [vmem:[#allocation141_spill] sm:$0xff] }
 0x4de   :  { %8362 = vmatprep.subr.bf16.mxu1 %v10869_v52  ;;  %v8391_v6 = vpack.c.bf16 %v12065_v63, %v12064_v10 }
 0x4e2   :  { %5315 = vmatmul.mubr.f32.vlgmr.msra.gmra.mrb[106].mxu0 %v10864_v47  ;;  %v12038_v47 = vld [vmem:[#allocation129_spill] sm:$0xff] }
 0x4e3   :  { %8340 = vmatpush1.bf16.msra.mxu0 %v10885_v38  ;;  %5389 = vmatprep.mubr.f32.mxu0 %v8675_v25  ;;  %v8367_v7 = vpack.c.bf16 %v12039_v2, %v12038_v47 }
 0x4e4   :  { %5808 = vmatmul.mubr.f32.vlgmr.msra.gmra.mrb[106].mxu1 %v10872_v24  ;;  %8342 = vmatprep.subr.bf16.mxu0 %v8341_v42  ;;  %v6052_v24 = vsel %vm3032_vm9, %v3091_v62, 0  ;;  %v12066_v42 = vld [vmem:[#allocation152_spill] sm:$0xff] }
 0x4e5   :  { %8364 = vmatpush1.bf16.msra.mxu1 %v10892_v29  ;;  %5882 = vmatprep.mubr.f32.mxu1 %v8675_v25  ;;  %v10947_v8 = vand.u32 4294901760, %v6052_v24  ;;  %v8415_v18 = vpack.c.bf16 %v12067_v19, %v12066_v42  ;;  %v11027_v62 = vld [vmem:[#allocation5 + $0x8] sm:$0xff] }
 0x4e6   :  { %8366 = vmatprep.subr.bf16.mxu1 %v8365_v35  ;;  %v11025_v35 = vld [vmem:[#allocation5] sm:$0xff]  ;;  %v7051_v22 = vrot.slane %v11027_v62, 5 }
 0x4e7   :  { %v6124_v28 = vsub.f32 %v6052_v24, %v10947_v8  ;;  %v7042_v4 = vrot.slane %v11025_v35, 1  ;;  %v7052_v58 = vrot.slane %v11025_v35, 6  ;;  %v7054_v10 = vrot.slane %v11025_v35, 7 }
 0x4ea   :  { %5393 = vmatmul.mubr.f32.vlgmr.msra.gmra.mrb[106].mxu0 %v5139_v20  ;;  %v10955_v20 = vpack.c.bf16 %v11901_v0, %v12040_v51  ;;  %v6125_v0 = vand.u32 4294901760, %v6124_v28 }
 0x4eb   :  { %8344 = vmatpush1.bf16.msra.mxu0 %v8343_v61  ;;  %5475 = vmatprep.mubr.f32.mxu0 %v8675_v25  ;;  %v7043_v61 = vrot.slane %v11027_v62, 1 }
 0x4ec   :  { %5886 = vmatmul.mubr.f32.vlgmr.msra.gmra.mrb[106].mxu1 %v5632_v46  ;;  %8346 = vmatprep.subr.bf16.mxu0 %v10861_v26  ;;  %v10961_v26 = vpack.c.bf16 %v11905_v1, %v11903_v50  ;;  %v6617_v46 = vsub.f32 %v6545_v34, %v10951_v9  ;;  %v12041_v50 = vld [vmem:[#allocation133_spill] sm:$0xff]  ;;  %v6126_v43 = vsub.f32 %v6124_v28, %v6125_v0 }
 0x4ed   :  { %8368 = vmatpush1.bf16.msra.mxu1 %v8367_v7  ;;  %5968 = vmatprep.mubr.f32.mxu1 %v8675_v25  ;;  %v8375_v1 = vpack.c.bf16 %v11902_v17, %v12041_v50  ;;  %v12046_v17 = vld [vmem:[#allocation135_spill] sm:$0xff] }
 0x4ee   :  { %8370 = vmatprep.subr.bf16.mxu1 %v10869_v52  ;;  %v6618_v52 = vand.u32 4294901760, %v6617_v46  ;;  %v6127_v16 = vand.u32 4294901760, %v6126_v43  ;;  %v8381_v11 = vpack.c.bf16 %v12047_v13, %v12046_v17 }
 0x4f0   :  { %v6619_v57 = vsub.f32 %v6617_v46, %v6618_v52 }
 0x4f2   :  { %5477 = vmatmul.mubr.f32.vlgmr.msra.gmra.mrb[106].mxu0 %v10853_v48  ;;  %v6620_v53 = vand.u32 4294901760, %v6619_v57 }
 0x4f3   :  { %8348 = vmatpush1.bf16.msra.mxu0 %v10885_v38  ;;  %5551 = vmatprep.mubr.f32.mxu0 %v8675_v25  ;;  %v12043_v38 = vld [vmem:[#allocation160_spill] sm:$0xff] }
 0x4f4   :  { %5970 = vmatmul.mubr.f32.vlgmr.msra.gmra.mrb[106].mxu1 %v10857_v45  ;;  %8374 = vmatprep.subr.bf16.mxu0 %v10955_v20  ;;  %v8377_v5 = vpack.c.bf16 %v12043_v38, %v12042_v32 }
 0x4f5   :  { %8372 = vmatpush1.bf16.msra.mxu1 %v10892_v29  ;;  %6044 = vmatprep.mubr.f32.mxu1 %v8675_v25  ;;  %v12045_v29 = vld [vmem:[#allocation163_spill] sm:$0xff] }
 0x4f6   :  { %8398 = vmatprep.subr.bf16.mxu1 %v10961_v26  ;;  %v8401_v15 = vpack.c.bf16 %v12045_v29, %v12044_v37 }
 0x4fa   :  { %5553 = vmatmul.mubr.f32.vlgmr.msra.gmra.mrb[106].mxu0 %v10853_v48  ;;  %v12049_v48 = vld [vmem:[#allocation158_spill] sm:$0xff] }
 0x4fb   :  { %8376 = vmatpush1.bf16.msra.mxu0 %v8375_v1  ;;  %6122 = vmatprep.mubr.f32.mxu0 %v8675_v25  ;;  %v8405_v54 = vpack.c.bf16 %v12049_v48, %v12048_v39  ;;  %v7049_v39 = vrot.slane %v11027_v62, 4  ;;  %v7050_v48 = vrot.slane %v11025_v35, 5 }
 0x4fc   :  { %6046 = vmatmul.mubr.f32.vlgmr.msra.gmra.mrb[106].mxu1 %v10857_v45  ;;  %8378 = vmatprep.subr.bf16.mxu0 %v8377_v5  ;;  %v12053_v45 = vld [vmem:[#allocation159_spill] sm:$0xff] }
 0x4fd   :  { %8400 = vmatpush1.bf16.msra.mxu1 %v8399_v3  ;;  %6615 = vmatprep.mubr.f32.mxu1 %v8675_v25  ;;  %v12055_v23 = vpack.c.bf16 %v12053_v45, %v12054_v44 }
 0x4fe   :  { %6128 = vmatmul.mubr.f32.vlgmr.msra.gmra.mrb[108].mxu0 %v6127_v16  ;;  %8402 = vmatprep.subr.bf16.mxu1 %v8401_v15 }
 0x4ff   :  { %8380 = vmatpush1.bf16.msra.mxu0 %v12052_v36  ;;  %6218 = vmatprep.mubr.f32.mxu0 %v8675_v25 }
 0x500   :  { %6621 = vmatmul.mubr.f32.vlgmr.msra.gmra.mrb[108].mxu1 %v6620_v53  ;;  %8382 = vmatprep.subr.bf16.mxu0 %v8381_v11  ;;  %v7048_v53 = vrot.slane %v11025_v35, 4 }
 0x501   :  { %8404 = vmatpush1.bf16.msra.mxu1 %v12055_v23  ;;  %6711 = vmatprep.mubr.f32.mxu1 %v8675_v25 }
 0x502   :  { %8406 = vmatprep.subr.bf16.mxu1 %v8405_v54 }
 0x506   :  { %6220 = vmatmul.mubr.f32.vlgmr.msra.gmra.mrb[108].mxu0 %v10947_v8 }
 0x507   :  { %8384 = vmatpush1.bf16.msra.mxu0 %v8383_v27  ;;  %6298 = vmatprep.mubr.f32.mxu0 %v8675_v25 }
 0x508   :  { %6713 = vmatmul.mubr.f32.vlgmr.msra.gmra.mrb[108].mxu1 %v10951_v9  ;;  %8386 = vmatprep.subr.bf16.mxu0 %v10955_v20 }
 0x509   :  { %8408 = vmatpush1.bf16.msra.mxu1 %v8407_v31  ;;  %6791 = vmatprep.mubr.f32.mxu1 %v8675_v25 }
 0x50a   :  { %8410 = vmatprep.subr.bf16.mxu1 %v10961_v26 }
 0x50e   :  { %6301 = vmatmul.mubr.f32.vlgmr.msra.gmra.mrb[108].mxu0 %v6124_v28  ;;  %v7044_v28 = vrot.slane %v11025_v35, 2 }
 0x50f   :  { %8388 = vmatpush1.bf16.msra.mxu0 %v8375_v1  ;;  %6375 = vmatprep.mubr.f32.mxu0 %v8675_v25 }
 0x510   :  { %6794 = vmatmul.mubr.f32.vlgmr.msra.gmra.mrb[108].mxu1 %v6617_v46  ;;  %8390 = vmatprep.subr.bf16.mxu0 %v8389_v49  ;;  %v7046_v46 = vrot.slane %v11025_v35, 3 }
 0x511   :  { %8412 = vmatpush1.bf16.msra.mxu1 %v8399_v3  ;;  %6868 = vmatprep.mubr.f32.mxu1 %v8675_v25 }
 0x512   :  { %8414 = vmatprep.subr.bf16.mxu1 %v8413_v12  ;;  %v7053_v12 = vrot.slane %v11027_v62, 6 }
 0x516   :  { %6379 = vmatmul.mubr.f32.vlgmr.msra.gmra.mrb[108].mxu0 %v6125_v0 }
 0x517   :  { %8392 = vmatpush1.bf16.msra.mxu0 %v8391_v6  ;;  %6461 = vmatprep.mubr.f32.mxu0 %v8675_v25  ;;  %v7055_v6 = vrot.slane %v11027_v62, 7 }
 0x518   :  { %6872 = vmatmul.mubr.f32.vlgmr.msra.gmra.mrb[108].mxu1 %v6618_v52  ;;  %8394 = vmatprep.subr.bf16.mxu0 %v10955_v20  ;;  %v7047_v52 = vrot.slane %v11027_v62, 3 }
 0x519   :  { %8416 = vmatpush1.bf16.msra.mxu1 %v8415_v18  ;;  %6954 = vmatprep.mubr.f32.mxu1 %v8675_v25 }
 0x51a   :  { %8418 = vmatprep.subr.bf16.mxu1 %v10961_v26  ;;  %v7045_v26 = vrot.slane %v11027_v62, 2 }
 0x51e   :  { %6463 = vmatmul.mubr.f32.vlgmr.msra.gmra.mrb[108].mxu0 %v10947_v8 }
 0x51f   :  { %8396 = vmatpush1.bf16.msra.mxu0 %v8375_v1  ;;  %6537 = vmatprep.mubr.f32.mxu0 %v8675_v25 }
 0x520   :  { %6956 = vmatmul.mubr.f32.vlgmr.msra.gmra.mrb[108].mxu1 %v10951_v9 }
 0x521   :  { %8420 = vmatpush1.bf16.msra.mxu1 %v8399_v3  ;;  %7030 = vmatprep.mubr.f32.mxu1 %v8675_v25 }
 0x526   :  { %6539 = vmatmul.mubr.f32.vlgmr.msra.gmra.mrb[108].mxu0 %v10947_v8 }
 0x528   :  { %7032 = vmatmul.mubr.f32.vlgmr.msra.gmra.mrb[108].mxu1 %v10951_v9 }
 0x575   :  { %v3582_v55 = vpop.f32.mrb[102].mxu0 }
 0x576   :  { %v3584_v40 = vpop.f32.mrb[103].mxu0  ;;  %v7072_v25 = vadd.f32 %v11025_v35, %v3582_v55 }
 0x577   :  { %v4075_v47 = vpop.f32.mrb[102].mxu1  ;;  %v7073_v8 = vadd.f32 %v11027_v62, %v3584_v40 }
 0x578   :  { %v7074_v2 = vadd.f32 %v7042_v4, %v4075_v47  ;;  %v4077_v7 = vpop.f32.mrb[103].mxu1 }
 0x579   :  { %v7075_v24 = vadd.f32 %v7043_v61, %v4077_v7 }
 0x57a   :  { %v7104_v34 = vrot.slane %v7074_v2, 7 }
 0x57b   :  { %v7118_v9 = vrot.slane %v7075_v24, 7 }
 0x57c   :  { %v7105_v51 = vsel %vm3016_vm1, %v7104_v34, %v7072_v25 }
 0x57d   :  { %v7119_v20 = vsel %vm3016_vm1, %v7118_v9, %v7073_v8 }
 0x5a1   :  { %v4568_v0 = vpop.f32.mrb[104].mxu0 }
 0x5a2   :  { %v7076_v50 = vadd.f32 %v7044_v28, %v4568_v0  ;;  %v4570_v1 = vpop.f32.mrb[105].mxu0 }
 0x5a3   :  { %v7077_v43 = vadd.f32 %v7045_v26, %v4570_v1  ;;  %v5061_v32 = vpop.f32.mrb[104].mxu1 }
 0x5a4   :  { %v7106_v38 = vrot.slane %v7076_v50, 6  ;;  %v7078_v5 = vadd.f32 %v7046_v46, %v5061_v32  ;;  %v5063_v3 = vpop.f32.mrb[105].mxu1 }
 0x5a5   :  { %v7120_v57 = vrot.slane %v7077_v43, 6  ;;  %v7079_v37 = vadd.f32 %v7047_v52, %v5063_v3 }
 0x5a6   :  { %v7107_v29 = vsel %vm3018_vm2, %v7106_v38, %v7105_v51  ;;  %v7108_v15 = vrot.slane %v7078_v5, 5 }
 0x5a7   :  { %v7121_v16 = vsel %vm3018_vm2, %v7120_v57, %v7119_v20  ;;  %v7122_v17 = vrot.slane %v7079_v37, 5 }
 0x5a8   :  { %v7109_v13 = vsel %vm3020_vm3, %v7108_v15, %v7107_v29 }
 0x5a9   :  { %v7123_v11 = vsel %vm3020_vm3, %v7122_v17, %v7121_v16 }
 0x5cd   :  { %v5554_v54 = vpop.f32.mrb[106].mxu0 }
 0x5ce   :  { %v7080_v56 = vadd.f32 %v7048_v53, %v5554_v54  ;;  %v5556_v36 = vpop.f32.mrb[107].mxu0 }
 0x5cf   :  { %v7081_v45 = vadd.f32 %v7049_v39, %v5556_v36  ;;  %v6047_v44 = vpop.f32.mrb[106].mxu1 }
 0x5d0   :  { %v7110_v23 = vrot.slane %v7080_v56, 4  ;;  %v7082_v21 = vadd.f32 %v7050_v48, %v6047_v44  ;;  %v6049_v59 = vpop.f32.mrb[107].mxu1 }
 0x5d1   :  { %v7124_v27 = vrot.slane %v7081_v45, 4  ;;  %v7083_v30 = vadd.f32 %v7051_v22, %v6049_v59 }
 0x5d2   :  { %v7111_v14 = vsel %vm3022_vm4, %v7110_v23, %v7109_v13  ;;  %v7112_v31 = vrot.slane %v7082_v21, 3 }
 0x5d3   :  { %v7125_v33 = vsel %vm3022_vm4, %v7124_v27, %v7123_v11  ;;  %v7126_v60 = vrot.slane %v7083_v30, 3 }
 0x5d4   :  { %v7113_v49 = vsel %vm3024_vm5, %v7112_v31, %v7111_v14 }
 0x5d5   :  { %v7127_v41 = vsel %vm3024_vm5, %v7126_v60, %v7125_v33 }
 0x5f9   :  { %v6540_v63 = vpop.f32.mrb[108].mxu0 }
 0x5fa   :  { %v7084_v42 = vadd.f32 %v7052_v58, %v6540_v63  ;;  %v6542_v19 = vpop.f32.mrb[109].mxu0 }
 0x5fb   :  { %v7085_v18 = vadd.f32 %v7053_v12, %v6542_v19  ;;  %v7033_v4 = vpop.f32.mrb[108].mxu1 }
 0x5fc   :  { %v7114_v55 = vrot.slane %v7084_v42, 2  ;;  %v7086_v61 = vadd.f32 %v7054_v10, %v7033_v4  ;;  %v7035_v40 = vpop.f32.mrb[109].mxu1 }
 0x5fd   :  { %v7128_v47 = vrot.slane %v7085_v18, 2  ;;  %v7087_v2 = vadd.f32 %v7055_v6, %v7035_v40 }
 0x5fe   :  { %v7115_v7 = vsel %vm3026_vm6, %v7114_v55, %v7113_v49  ;;  %v7116_v24 = vrot.slane %v7086_v61, 1 }
 0x5ff   :  { %v7129_v25 = vsel %vm3026_vm6, %v7128_v47, %v7127_v41  ;;  %v7130_v35 = vrot.slane %v7087_v2, 1 }
 0x600   :  { %v7117_v34 = vsel %vm3028_vm7, %v7116_v24, %v7115_v7 }
 0x601   :  { %v7131_v62 = vsel %vm3028_vm7, %v7130_v35, %v7129_v25  ;;  %7134 = vst [vmem:[#allocation10] sm:$0xff] %v7117_v34 }
 0x602   :  { %7135 = vst [vmem:[#allocation10 + $0x8] sm:$0xff] %v7131_v62 }
 0x603   :  { %8647 = shalt.err (!%p8644_p8)
}
 0x604   :  { %s8648_s28 = scalar_lea.hbm %s11077_s6, 256 }
 0x605   :  { %p8649_p9 = scmp.ne.s32.totalorder %s11077_s6, %s8648_s28  ;;  %p8652_p10 = scmp.lt.u32.totalorder %s8648_s28, %s11077_s6 }
 0x607   :  { %p8654_p11 = pnand %p8652_p10, %p8649_p9 }
 0x609   :  { %8657 = shalt.err (!%p8654_p11)
}
 0x60a   :  { %7145 = dma.vmem_to_hbm [thread:$0]  %s7143_s23, 256, %s11077_s6, [#allocation4]  }
 0x60b   :  { %8664 = dma.done.wait [#allocation4], 256  }
 0x60c   :  { %8665 = vsyncadd [#allocation4], 4294967040 }
 0x60d   :  { %7149 = vsyncpa [#allocation3], 1 }
 0x60e   :  { %7150 = vsyncpa [#allocation6], 1 }
 0x60f   :  { %7151 = vsyncpa [#allocation9], 1 }
 0x610   :  { %7152 = vsyncpa [#allocation4], 1 }

</bundles_post_ra>
